<compile_context>
chip_gen: v7x
topology: tpu7x:2x2x1
jax: 0.10.0
libtpu: 0.0.40
codegen_flags: <defaults>
</compile_context>

<pallas_src>
import functools
import math
import warnings

import jax
import jax.numpy as jnp
from jax import lax
from jax.experimental import pallas as pl
from jax.experimental.pallas import tpu as pltpu

NUM_HEADS = 2
LN_EPS = 1e-5

_WEIGHT_NAMES = ("wq", "wk", "wv", "wo", "w1", "w2")   # matmul operands (compute dtype)
_PARAM_ORDER = ("wq", "bq", "wk", "bk", "wv", "bv", "wo", "bo",
                "g1", "be1", "g2", "be2", "w1", "bf1", "w2", "bf2")


def _cdiv(a, b):
    return -(-a // b)


def _layernorm(x, gamma, beta):
    mu = jnp.mean(x, axis=-1, keepdims=True)
    var = jnp.mean((x - mu) ** 2, axis=-1, keepdims=True)
    return (x - mu) * lax.rsqrt(var + LN_EPS) * gamma + beta


def encoder_kernel(xt_ref, xc_ref,
                   wq_ref, bq_ref, wk_ref, bk_ref, wv_ref, bv_ref,
                   wo_ref, bo_ref,
                   g1_ref, be1_ref, g2_ref, be2_ref,
                   w1_ref, bf1_ref, w2_ref, bf2_ref,
                   xt_out_ref,
                   *, num_layers, num_heads, nt, nc, unroll, approx_softmax):
    bt, _, d = xt_ref.shape          # batch tile, nt, feature
    n = nt + nc
    dh = d // num_heads
    bn = bt * n
    bnc = bt * nc
    cdt = wq_ref.dtype               # compute dtype for MXU operands (bf16 by default)

    # Weight matrices stay in compute dtype; biases / LayerNorm params are f32.
    wq = wq_ref[...]
    wk = wk_ref[...]
    wv = wv_ref[...]
    wo = wo_ref[...]
    w1 = w1_ref[...]
    w2 = w2_ref[...]
    bq = bq_ref[...]
    bk = bk_ref[...]
    bv = bv_ref[...]
    bo = bo_ref[...]
    bf1 = bf1_ref[...]
    bf2 = bf2_ref[...]
    g1 = g1_ref[...]
    be1 = be1_ref[...]
    g2 = g2_ref[...]
    be2 = be2_ref[...]

    # Assemble the [xt; xc] slab in VMEM (no host-side concat / extra HBM slab);
    # the residual stream is kept in f32.
    z0 = jnp.concatenate([xt_ref[...].astype(jnp.float32),
                          xc_ref[...].astype(jnp.float32)], axis=1)

    def layer_body(_, z):
        # ---- pre-norm multi-head cross attention: Q = LN([xt; xc]),
        #      K/V = the LN-ed context rows of the same slab ----
        zn = _layernorm(z, g1, be1)                            # (bt, n, d) f32
        zq = zn.reshape(bn, d).astype(cdt)                     # all query rows
        zc = zn[:, nt:, :].reshape(bnc, d).astype(cdt)         # context rows

        # Full-width projections (MXU N = K = d); 1/sqrt(dh) folded into wq/bq.
        q = (jnp.dot(zq, wq, preferred_element_type=jnp.float32)
             + bq).reshape(bt, n, d)
        k = (jnp.dot(zc, wk, preferred_element_type=jnp.float32)
             + bk).reshape(bt, nc, d)
        v = (jnp.dot(zc, wv, preferred_element_type=jnp.float32)
             + bv).reshape(bt, nc, d)

        heads = []
        for h in range(num_heads):                             # static unroll
            sl = slice(h * dh, (h + 1) * dh)
            qh = q[:, :, sl].astype(cdt)                       # (bt, n, dh)
            kh = k[:, :, sl].astype(cdt)                       # (bt, nc, dh)
            vh = v[:, :, sl].astype(cdt)                       # (bt, nc, dh)
            s = jnp.einsum('bqe,bke->bqk', qh, kh,
                           preferred_element_type=jnp.float32)  # (bt, n, nc) f32
            s = s - jnp.max(s, axis=-1, keepdims=True)
            e = jnp.exp(s)
            denom = jnp.sum(e, axis=-1, keepdims=True)
            if approx_softmax:
                p = e * pl.reciprocal(denom, approx=True)
            else:
                p = e / denom
            heads.append(jnp.einsum('bqk,bke->bqe', p.astype(cdt), vh,
                                    preferred_element_type=jnp.float32))
        # One full-width output projection on the concatenated head outputs.
        o = jnp.concatenate(heads, axis=-1).reshape(bn, d)
        attn = jnp.dot(o.astype(cdt), wo,
                       preferred_element_type=jnp.float32) + bo
        z = z + attn.reshape(bt, n, d)

        # ---- pre-norm ReLU MLP with residual ----
        zn2 = _layernorm(z, g2, be2).reshape(bn, d).astype(cdt)
        h1 = jnp.maximum(
            jnp.dot(zn2, w1, preferred_element_type=jnp.float32) + bf1, 0.0)
        ff = jnp.dot(h1.astype(cdt), w2,
                     preferred_element_type=jnp.float32) + bf2
        return z + ff.reshape(bt, n, d)

    z = lax.fori_loop(0, num_layers, layer_body, z0, unroll=unroll)

    # Only the target half leaves VMEM after the last layer.
    # TODO(synk): if d < 128 a lane-dense output layout (fold nt into the lane
    # axis) would avoid masked partial stores; skipped since realistic configs
    # have d >= 128.
    xt_out_ref[...] = z[:, :nt, :].astype(xt_out_ref.dtype)


def _tpu_vmem_bytes():
    try:
        return int(pltpu.get_tpu_info().vmem_capacity_bytes)
    except Exception:
        return 64 << 20            # conservative (v7x-sized) fallback


def _num_tensorcores():
    # Best effort: only used to prefer an even grid on multi-TensorCore parts.
    try:
        dev = jax.devices()[0]
        for attr in ("num_cores", "core_count"):
            val = getattr(dev, attr, None)
            if val:
                return int(val)
    except Exception:
        pass
    return 1


def _plan_tiling(m, nt, nc, d, dff, num_heads, in_bytes, out_bytes, c_bytes):
    """VMEM-budgeted batch tile; returns (b_tile, grid_len, vmem_limit_bytes)."""
    n = nt + nc
    vmem_cap = _tpu_vmem_bytes()
    budget = int(0.70 * vmem_cap)

    # Resident weights (conservatively assume double buffering) + f32 biases/LN.
    w_bytes = 2 * ((4 * d * d + 2 * d * dff) * c_bytes + (10 * d + dff) * 4)

    # Per-batch-element bytes: double-buffered in/out tiles + f32 activations
    # (residual slab, LN output, q/k/v, per-head scores, MLP hidden) + casts.
    per_b = (2 * n * d * in_bytes + 2 * nt * d * out_bytes
             + 4 * (10 * n * d + 3 * n * dff + 3 * num_heads * n * nc)
             + c_bytes * (4 * n * d + n * dff))

    b_vmem = max(1, (budget - w_bytes) // per_b)
    b_rows = max(1, 1024 // n)             # cap folded MXU rows (vreg pressure)
    b = int(max(1, min(m, b_vmem, b_rows)))

    # On multi-TC parts prefer a grid length divisible by the core count.
    tc = _num_tensorcores()
    if tc > 1 and m > 1:
        for cand in range(b, 0, -1):
            if _cdiv(m, cand) % tc == 0:
                b = cand
                break

    grid_len = _cdiv(m, b)
    est = w_bytes + b * per_b
    vmem_limit = int(min(0.92 * vmem_cap, max(2 * est, 64 << 20)))
    return b, grid_len, vmem_limit


def tnpkr_transformer_encoder(xc, xt, params, num_layers, mask=None,
                              *, num_heads=NUM_HEADS,
                              compute_dtype=jnp.bfloat16,
                              approx_softmax=True):
    """Matches TNPKRTransformerEncoder.forward: xc [m,nc,d], xt [m,nt,d] -> [m,nt,d]."""
    if mask is not None:
        warnings.warn("mask is not currently being used.")   # same as the module

    m, nt, d = xt.shape
    mc, nc, dc = xc.shape
    assert mc == m and dc == d and d % num_heads == 0
    dff = params["w1"].shape[1]
    dh = d // num_heads
    scale = 1.0 / math.sqrt(dh)

    # Host-side prep: fold the attention scale into the Q projection and cast
    # the matmul weight matrices to the compute dtype (biases / LN stay f32).
    p = {k: jnp.asarray(v, jnp.float32) for k, v in params.items()}
    p["wq"] = p["wq"] * scale
    p["bq"] = p["bq"] * scale
    for name in _WEIGHT_NAMES:
        p[name] = p[name].astype(compute_dtype)
    param_list = [p[name] for name in _PARAM_ORDER]

    in_bytes = max(jnp.dtype(xt.dtype).itemsize, jnp.dtype(xc.dtype).itemsize)
    out_bytes = jnp.dtype(xt.dtype).itemsize
    c_bytes = jnp.dtype(compute_dtype).itemsize

    b_tile, grid_len, vmem_limit = _plan_tiling(
        m, nt, nc, d, dff, num_heads, in_bytes, out_bytes, c_bytes)

    # Pad the batch dim so b_tile need not divide m (padded rows are discarded).
    m_pad = grid_len * b_tile
    if m_pad != m:
        pad = ((0, m_pad - m), (0, 0), (0, 0))
        xt_in = jnp.pad(xt, pad)
        xc_in = jnp.pad(xc, pad)
    else:
        xt_in, xc_in = xt, xc

    kernel = functools.partial(
        encoder_kernel, num_layers=num_layers, num_heads=num_heads,
        nt=nt, nc=nc, unroll=(num_layers <= 4), approx_softmax=approx_softmax)

    def _build(single_buffer_weights):
        def const_spec(shape):
            idx = (lambda b: (0,) * len(shape))   # all params are 2-D, constant
            if single_buffer_weights:
                # Layer-invariant operands: a second pipeline buffer is waste.
                return pl.BlockSpec(shape, idx, pipeline_mode=pl.Buffered(1))
            return pl.BlockSpec(shape, idx)

        in_specs = ([pl.BlockSpec((b_tile, nt, d), lambda b: (b, 0, 0)),
                     pl.BlockSpec((b_tile, nc, d), lambda b: (b, 0, 0))]
                    + [const_spec(q.shape) for q in param_list])
        out_specs = pl.BlockSpec((b_tile, nt, d), lambda b: (b, 0, 0))
        return pl.pallas_call(
            kernel,
            grid=(grid_len,),
            in_specs=in_specs,
            out_specs=out_specs,
            out_shape=jax.ShapeDtypeStruct((m_pad, nt, d), xt.dtype),
            compiler_params=pltpu.CompilerParams(
                dimension_semantics=("parallel",),
                vmem_limit_bytes=vmem_limit),
        )

    try:
        xt_out = _build(single_buffer_weights=True)(xt_in, xc_in, *param_list)
    except Exception:
        # Older Pallas without pipeline_mode / Buffered(1): default buffering.
        xt_out = _build(single_buffer_weights=False)(xt_in, xc_in, *param_list)

    return xt_out[:m] if m_pad != m else xt_out


def init_params(key, d, dff):
    ks = jax.random.split(key, 6)

    def lin(k, fan_in, shape):
        return jax.random.normal(k, shape, jnp.float32) / jnp.sqrt(fan_in)

    return dict(
        wq=lin(ks[0], d, (d, d)), bq=jnp.zeros((1, d), jnp.float32),
        wk=lin(ks[1], d, (d, d)), bk=jnp.zeros((1, d), jnp.float32),
        wv=lin(ks[2], d, (d, d)), bv=jnp.zeros((1, d), jnp.float32),
        wo=lin(ks[3], d, (d, d)), bo=jnp.zeros((1, d), jnp.float32),
        g1=jnp.ones((1, d), jnp.float32), be1=jnp.zeros((1, d), jnp.float32),
        g2=jnp.ones((1, d), jnp.float32), be2=jnp.zeros((1, d), jnp.float32),
        w1=lin(ks[4], d, (d, dff)), bf1=jnp.zeros((1, dff), jnp.float32),
        w2=lin(ks[5], dff, (dff, d)), bf2=jnp.zeros((1, d), jnp.float32),
    )


if __name__ == "__main__":
    m, nc, nt, d, dff = 2, 8, 8, 128, 256
    num_layers = 2

    key = jax.random.PRNGKey(0)
    k_xc, k_xt, k_p = jax.random.split(key, 3)
    xc = jax.random.normal(k_xc, (m, nc, d), jnp.float32)
    xt = jax.random.normal(k_xt, (m, nt, d), jnp.float32)
    params = init_params(k_p, d, dff)   # shared across layers (deepcopy init)

    out = tnpkr_transformer_encoder(xc, xt, params, num_layers)
    out = jax.block_until_ready(out)
    assert out.shape == (m, nt, d) and out.dtype == jnp.float32
    assert bool(jnp.all(jnp.isfinite(out)))
    print("KERNEL_OK")
</pallas_src>

<mosaic_0001>
module attributes {stable_mosaic.version = 11 : i64} {
  func.func @encoder_kernel(%arg0: i32, %arg1: memref<2x8x128xf32, #tpu.memory_space<vmem>>, %arg2: memref<2x8x128xf32, #tpu.memory_space<vmem>>, %arg3: memref<128x128xbf16, #tpu.memory_space<vmem>>, %arg4: memref<1x128xf32, #tpu.memory_space<vmem>>, %arg5: memref<128x128xbf16, #tpu.memory_space<vmem>>, %arg6: memref<1x128xf32, #tpu.memory_space<vmem>>, %arg7: memref<128x128xbf16, #tpu.memory_space<vmem>>, %arg8: memref<1x128xf32, #tpu.memory_space<vmem>>, %arg9: memref<128x128xbf16, #tpu.memory_space<vmem>>, %arg10: memref<1x128xf32, #tpu.memory_space<vmem>>, %arg11: memref<1x128xf32, #tpu.memory_space<vmem>>, %arg12: memref<1x128xf32, #tpu.memory_space<vmem>>, %arg13: memref<1x128xf32, #tpu.memory_space<vmem>>, %arg14: memref<1x128xf32, #tpu.memory_space<vmem>>, %arg15: memref<128x256xbf16, #tpu.memory_space<vmem>>, %arg16: memref<1x256xf32, #tpu.memory_space<vmem>>, %arg17: memref<256x128xbf16, #tpu.memory_space<vmem>>, %arg18: memref<1x128xf32, #tpu.memory_space<vmem>>, %arg19: memref<2x8x128xf32, #tpu.memory_space<vmem>>) attributes {dimension_semantics = [#tpu.dimension_semantics<parallel>], iteration_bounds = array<i64: 1>, scalar_prefetch = 0 : i64, scratch_operands = 0 : i64, tpu.core_type = #tpu.core_type<tc>, window_params = [{transform_indices = @transform_0, window_bounds = array<i64: 2, 8, 128>}, {transform_indices = @transform_1, window_bounds = array<i64: 2, 8, 128>}, {pipeline_mode = #tpu.pipeline_mode<synchronous>, transform_indices = @transform_2, window_bounds = array<i64: 128, 128>}, {pipeline_mode = #tpu.pipeline_mode<synchronous>, transform_indices = @transform_3, window_bounds = array<i64: 1, 128>}, {pipeline_mode = #tpu.pipeline_mode<synchronous>, transform_indices = @transform_4, window_bounds = array<i64: 128, 128>}, {pipeline_mode = #tpu.pipeline_mode<synchronous>, transform_indices = @transform_5, window_bounds = array<i64: 1, 128>}, {pipeline_mode = #tpu.pipeline_mode<synchronous>, transform_indices = @transform_6, window_bounds = array<i64: 128, 128>}, {pipeline_mode = #tpu.pipeline_mode<synchronous>, transform_indices = @transform_7, window_bounds = array<i64: 1, 128>}, {pipeline_mode = #tpu.pipeline_mode<synchronous>, transform_indices = @transform_8, window_bounds = array<i64: 128, 128>}, {pipeline_mode = #tpu.pipeline_mode<synchronous>, transform_indices = @transform_9, window_bounds = array<i64: 1, 128>}, {pipeline_mode = #tpu.pipeline_mode<synchronous>, transform_indices = @transform_10, window_bounds = array<i64: 1, 128>}, {pipeline_mode = #tpu.pipeline_mode<synchronous>, transform_indices = @transform_11, window_bounds = array<i64: 1, 128>}, {pipeline_mode = #tpu.pipeline_mode<synchronous>, transform_indices = @transform_12, window_bounds = array<i64: 1, 128>}, {pipeline_mode = #tpu.pipeline_mode<synchronous>, transform_indices = @transform_13, window_bounds = array<i64: 1, 128>}, {pipeline_mode = #tpu.pipeline_mode<synchronous>, transform_indices = @transform_14, window_bounds = array<i64: 128, 256>}, {pipeline_mode = #tpu.pipeline_mode<synchronous>, transform_indices = @transform_15, window_bounds = array<i64: 1, 256>}, {pipeline_mode = #tpu.pipeline_mode<synchronous>, transform_indices = @transform_16, window_bounds = array<i64: 256, 128>}, {pipeline_mode = #tpu.pipeline_mode<synchronous>, transform_indices = @transform_17, window_bounds = array<i64: 1, 128>}, {transform_indices = @transform_18, window_bounds = array<i64: 2, 8, 128>}]} {
    %c0 = arith.constant 0 : index
    %c0_0 = arith.constant 0 : index
    %0 = vector.load %arg3[%c0, %c0_0] : memref<128x128xbf16, #tpu.memory_space<vmem>>, vector<128x128xbf16>
    %c0_1 = arith.constant 0 : index
    %c0_2 = arith.constant 0 : index
    %1 = vector.load %arg5[%c0_1, %c0_2] : memref<128x128xbf16, #tpu.memory_space<vmem>>, vector<128x128xbf16>
    %c0_3 = arith.constant 0 : index
    %c0_4 = arith.constant 0 : index
    %2 = vector.load %arg7[%c0_3, %c0_4] : memref<128x128xbf16, #tpu.memory_space<vmem>>, vector<128x128xbf16>
    %c0_5 = arith.constant 0 : index
    %c0_6 = arith.constant 0 : index
    %3 = vector.load %arg9[%c0_5, %c0_6] : memref<128x128xbf16, #tpu.memory_space<vmem>>, vector<128x128xbf16>
    %c0_7 = arith.constant 0 : index
    %c0_8 = arith.constant 0 : index
    %4 = vector.load %arg15[%c0_7, %c0_8] : memref<128x256xbf16, #tpu.memory_space<vmem>>, vector<128x256xbf16>
    %c0_9 = arith.constant 0 : index
    %c0_10 = arith.constant 0 : index
    %5 = vector.load %arg17[%c0_9, %c0_10] : memref<256x128xbf16, #tpu.memory_space<vmem>>, vector<256x128xbf16>
    %c0_11 = arith.constant 0 : index
    %c0_12 = arith.constant 0 : index
    %6 = vector.load %arg4[%c0_11, %c0_12] : memref<1x128xf32, #tpu.memory_space<vmem>>, vector<1x128xf32>
    %c0_13 = arith.constant 0 : index
    %c0_14 = arith.constant 0 : index
    %7 = vector.load %arg6[%c0_13, %c0_14] : memref<1x128xf32, #tpu.memory_space<vmem>>, vector<1x128xf32>
    %c0_15 = arith.constant 0 : index
    %c0_16 = arith.constant 0 : index
    %8 = vector.load %arg8[%c0_15, %c0_16] : memref<1x128xf32, #tpu.memory_space<vmem>>, vector<1x128xf32>
    %c0_17 = arith.constant 0 : index
    %c0_18 = arith.constant 0 : index
    %9 = vector.load %arg10[%c0_17, %c0_18] : memref<1x128xf32, #tpu.memory_space<vmem>>, vector<1x128xf32>
    %c0_19 = arith.constant 0 : index
    %c0_20 = arith.constant 0 : index
    %10 = vector.load %arg16[%c0_19, %c0_20] : memref<1x256xf32, #tpu.memory_space<vmem>>, vector<1x256xf32>
    %c0_21 = arith.constant 0 : index
    %c0_22 = arith.constant 0 : index
    %11 = vector.load %arg18[%c0_21, %c0_22] : memref<1x128xf32, #tpu.memory_space<vmem>>, vector<1x128xf32>
    %c0_23 = arith.constant 0 : index
    %c0_24 = arith.constant 0 : index
    %12 = vector.load %arg11[%c0_23, %c0_24] : memref<1x128xf32, #tpu.memory_space<vmem>>, vector<1x128xf32>
    %c0_25 = arith.constant 0 : index
    %c0_26 = arith.constant 0 : index
    %13 = vector.load %arg12[%c0_25, %c0_26] : memref<1x128xf32, #tpu.memory_space<vmem>>, vector<1x128xf32>
    %c0_27 = arith.constant 0 : index
    %c0_28 = arith.constant 0 : index
    %14 = vector.load %arg13[%c0_27, %c0_28] : memref<1x128xf32, #tpu.memory_space<vmem>>, vector<1x128xf32>
    %c0_29 = arith.constant 0 : index
    %c0_30 = arith.constant 0 : index
    %15 = vector.load %arg14[%c0_29, %c0_30] : memref<1x128xf32, #tpu.memory_space<vmem>>, vector<1x128xf32>
    %c0_31 = arith.constant 0 : index
    %c0_32 = arith.constant 0 : index
    %c0_33 = arith.constant 0 : index
    %16 = vector.load %arg1[%c0_31, %c0_32, %c0_33] : memref<2x8x128xf32, #tpu.memory_space<vmem>>, vector<2x8x128xf32>
    %c0_34 = arith.constant 0 : index
    %c0_35 = arith.constant 0 : index
    %c0_36 = arith.constant 0 : index
    %17 = vector.load %arg2[%c0_34, %c0_35, %c0_36] : memref<2x8x128xf32, #tpu.memory_space<vmem>>, vector<2x8x128xf32>
    %18 = tpu.concatenate %16, %17 in 1 : vector<2x8x128xf32>, vector<2x8x128xf32> -> vector<2x16x128xf32>
    %c0_i32 = arith.constant 0 : i32
    %cst = arith.constant dense<0.000000e+00> : vector<2x16xf32>
    %19 = vector.multi_reduction <add>, %18, %cst [2] : vector<2x16x128xf32> to vector<2x16xf32>
    %20 = vector.shape_cast %19 : vector<2x16xf32> to vector<2x16x1xf32>
    %cst_37 = arith.constant 1.280000e+02 : f32
    %21 = vector.broadcast %cst_37 : f32 to vector<2x16x1xf32>
    %22 = arith.divf %20, %21 : vector<2x16x1xf32>
    %23 = vector.broadcast %22 : vector<2x16x1xf32> to vector<2x16x128xf32>
    %24 = arith.subf %18, %23 : vector<2x16x128xf32>
    %25 = arith.mulf %24, %24 : vector<2x16x128xf32>
    %cst_38 = arith.constant dense<0.000000e+00> : vector<2x16xf32>
    %26 = vector.multi_reduction <add>, %25, %cst_38 [2] : vector<2x16x128xf32> to vector<2x16xf32>
    %27 = vector.shape_cast %26 : vector<2x16xf32> to vector<2x16x1xf32>
    %cst_39 = arith.constant 1.280000e+02 : f32
    %28 = vector.broadcast %cst_39 : f32 to vector<2x16x1xf32>
    %29 = arith.divf %27, %28 : vector<2x16x1xf32>
    %30 = vector.broadcast %22 : vector<2x16x1xf32> to vector<2x16x128xf32>
    %31 = arith.subf %18, %30 : vector<2x16x128xf32>
    %cst_40 = arith.constant 9.99999974E-6 : f32
    %32 = vector.broadcast %cst_40 : f32 to vector<2x16x1xf32>
    %33 = arith.addf %29, %32 : vector<2x16x1xf32>
    %34 = math.rsqrt %33 : vector<2x16x1xf32>
    %35 = vector.broadcast %34 : vector<2x16x1xf32> to vector<2x16x128xf32>
    %36 = arith.mulf %31, %35 : vector<2x16x128xf32>
    %37 = vector.shape_cast %12 : vector<1x128xf32> to vector<1x1x128xf32>
    %38 = vector.broadcast %37 : vector<1x1x128xf32> to vector<2x16x128xf32>
    %39 = arith.mulf %36, %38 : vector<2x16x128xf32>
    %40 = vector.shape_cast %13 : vector<1x128xf32> to vector<1x1x128xf32>
    %41 = vector.broadcast %40 : vector<1x1x128xf32> to vector<2x16x128xf32>
    %42 = arith.addf %39, %41 : vector<2x16x128xf32>
    %43 = vector.shape_cast %42 : vector<2x16x128xf32> to vector<32x128xf32>
    %44 = arith.truncf %43 : vector<32x128xf32> to vector<32x128xbf16>
    %45 = vector.extract_strided_slice %42 {offsets = [0, 8, 0], sizes = [2, 8, 128], strides = [1, 1, 1]} : vector<2x16x128xf32> to vector<2x8x128xf32>
    %46 = vector.shape_cast %45 : vector<2x8x128xf32> to vector<16x128xf32>
    %47 = arith.truncf %46 : vector<16x128xf32> to vector<16x128xbf16>
    %cst_41 = arith.constant dense<0.000000e+00> : vector<32x128xf32>
    %48 = tpu.matmul %44, %0, %cst_41 {dimension_numbers = #tpu.dot_dimension_numbers<[1], [0], [0], [1], [0, 0, 1, 1], [], []>} : vector<32x128xbf16>, vector<128x128xbf16>, vector<32x128xf32> -> vector<32x128xf32>
    %49 = vector.broadcast %6 : vector<1x128xf32> to vector<32x128xf32>
    %50 = arith.addf %48, %49 : vector<32x128xf32>
    %51 = vector.shape_cast %50 : vector<32x128xf32> to vector<2x16x128xf32>
    %cst_42 = arith.constant dense<0.000000e+00> : vector<16x128xf32>
    %52 = tpu.matmul %47, %1, %cst_42 {dimension_numbers = #tpu.dot_dimension_numbers<[1], [0], [0], [1], [0, 0, 1, 1], [], []>} : vector<16x128xbf16>, vector<128x128xbf16>, vector<16x128xf32> -> vector<16x128xf32>
    %53 = vector.broadcast %7 : vector<1x128xf32> to vector<16x128xf32>
    %54 = arith.addf %52, %53 : vector<16x128xf32>
    %55 = vector.shape_cast %54 : vector<16x128xf32> to vector<2x8x128xf32>
    %cst_43 = arith.constant dense<0.000000e+00> : vector<16x128xf32>
    %56 = tpu.matmul %47, %2, %cst_43 {dimension_numbers = #tpu.dot_dimension_numbers<[1], [0], [0], [1], [0, 0, 1, 1], [], []>} : vector<16x128xbf16>, vector<128x128xbf16>, vector<16x128xf32> -> vector<16x128xf32>
    %57 = vector.broadcast %8 : vector<1x128xf32> to vector<16x128xf32>
    %58 = arith.addf %56, %57 : vector<16x128xf32>
    %59 = vector.shape_cast %58 : vector<16x128xf32> to vector<2x8x128xf32>
    %60 = vector.extract_strided_slice %51 {offsets = [0, 0, 0], sizes = [2, 16, 64], strides = [1, 1, 1]} : vector<2x16x128xf32> to vector<2x16x64xf32>
    %61 = arith.truncf %60 : vector<2x16x64xf32> to vector<2x16x64xbf16>
    %62 = vector.extract_strided_slice %55 {offsets = [0, 0, 0], sizes = [2, 8, 64], strides = [1, 1, 1]} : vector<2x8x128xf32> to vector<2x8x64xf32>
    %63 = arith.truncf %62 : vector<2x8x64xf32> to vector<2x8x64xbf16>
    %64 = vector.extract_strided_slice %59 {offsets = [0, 0, 0], sizes = [2, 8, 64], strides = [1, 1, 1]} : vector<2x8x128xf32> to vector<2x8x64xf32>
    %65 = arith.truncf %64 : vector<2x8x64xf32> to vector<2x8x64xbf16>
    "tpu.trace_start"() <{level = 10 : i32, message = "bqe,bke->bqk"}> : () -> ()
    %cst_44 = arith.constant dense<0.000000e+00> : vector<2x16x8xf32>
    %66 = tpu.matmul %61, %63, %cst_44 {dimension_numbers = #tpu.dot_dimension_numbers<[2], [2], [1], [1], [0, 0, 0, 1, 1, 1], [0], [0]>} : vector<2x16x64xbf16>, vector<2x8x64xbf16>, vector<2x16x8xf32> -> vector<2x16x8xf32>
    "tpu.trace_stop"() : () -> ()
    %cst_45 = arith.constant dense<0xFF800000> : vector<2x16xf32>
    %67 = vector.multi_reduction <maximumf>, %66, %cst_45 [2] : vector<2x16x8xf32> to vector<2x16xf32>
    %68 = vector.shape_cast %67 : vector<2x16xf32> to vector<2x16x1xf32>
    %69 = vector.broadcast %68 : vector<2x16x1xf32> to vector<2x16x8xf32>
    %70 = arith.subf %66, %69 : vector<2x16x8xf32>
    %71 = math.exp %70 : vector<2x16x8xf32>
    %cst_46 = arith.constant dense<0.000000e+00> : vector<2x16xf32>
    %72 = vector.multi_reduction <add>, %71, %cst_46 [2] : vector<2x16x8xf32> to vector<2x16xf32>
    %73 = vector.shape_cast %72 : vector<2x16xf32> to vector<2x16x1xf32>
    %74 = tpu.reciprocal %73 {approx = true} : vector<2x16x1xf32> -> vector<2x16x1xf32>
    %75 = vector.broadcast %74 : vector<2x16x1xf32> to vector<2x16x8xf32>
    %76 = arith.mulf %71, %75 : vector<2x16x8xf32>
    %77 = arith.truncf %76 : vector<2x16x8xf32> to vector<2x16x8xbf16>
    "tpu.trace_start"() <{level = 10 : i32, message = "bqk,bke->bqe"}> : () -> ()
    %cst_47 = arith.constant dense<0.000000e+00> : vector<2x16x64xf32>
    %78 = tpu.matmul %77, %65, %cst_47 {dimension_numbers = #tpu.dot_dimension_numbers<[2], [1], [1], [2], [0, 0, 0, 1, 1, 2], [0], [0]>} : vector<2x16x8xbf16>, vector<2x8x64xbf16>, vector<2x16x64xf32> -> vector<2x16x64xf32>
    "tpu.trace_stop"() : () -> ()
    %79 = vector.extract_strided_slice %51 {offsets = [0, 0, 64], sizes = [2, 16, 64], strides = [1, 1, 1]} : vector<2x16x128xf32> to vector<2x16x64xf32>
    %80 = arith.truncf %79 : vector<2x16x64xf32> to vector<2x16x64xbf16>
    %81 = vector.extract_strided_slice %55 {offsets = [0, 0, 64], sizes = [2, 8, 64], strides = [1, 1, 1]} : vector<2x8x128xf32> to vector<2x8x64xf32>
    %82 = arith.truncf %81 : vector<2x8x64xf32> to vector<2x8x64xbf16>
    %83 = vector.extract_strided_slice %59 {offsets = [0, 0, 64], sizes = [2, 8, 64], strides = [1, 1, 1]} : vector<2x8x128xf32> to vector<2x8x64xf32>
    %84 = arith.truncf %83 : vector<2x8x64xf32> to vector<2x8x64xbf16>
    "tpu.trace_start"() <{level = 10 : i32, message = "bqe,bke->bqk"}> : () -> ()
    %cst_48 = arith.constant dense<0.000000e+00> : vector<2x16x8xf32>
    %85 = tpu.matmul %80, %82, %cst_48 {dimension_numbers = #tpu.dot_dimension_numbers<[2], [2], [1], [1], [0, 0, 0, 1, 1, 1], [0], [0]>} : vector<2x16x64xbf16>, vector<2x8x64xbf16>, vector<2x16x8xf32> -> vector<2x16x8xf32>
    "tpu.trace_stop"() : () -> ()
    %cst_49 = arith.constant dense<0xFF800000> : vector<2x16xf32>
    %86 = vector.multi_reduction <maximumf>, %85, %cst_49 [2] : vector<2x16x8xf32> to vector<2x16xf32>
    %87 = vector.shape_cast %86 : vector<2x16xf32> to vector<2x16x1xf32>
    %88 = vector.broadcast %87 : vector<2x16x1xf32> to vector<2x16x8xf32>
    %89 = arith.subf %85, %88 : vector<2x16x8xf32>
    %90 = math.exp %89 : vector<2x16x8xf32>
    %cst_50 = arith.constant dense<0.000000e+00> : vector<2x16xf32>
    %91 = vector.multi_reduction <add>, %90, %cst_50 [2] : vector<2x16x8xf32> to vector<2x16xf32>
    %92 = vector.shape_cast %91 : vector<2x16xf32> to vector<2x16x1xf32>
    %93 = tpu.reciprocal %92 {approx = true} : vector<2x16x1xf32> -> vector<2x16x1xf32>
    %94 = vector.broadcast %93 : vector<2x16x1xf32> to vector<2x16x8xf32>
    %95 = arith.mulf %90, %94 : vector<2x16x8xf32>
    %96 = arith.truncf %95 : vector<2x16x8xf32> to vector<2x16x8xbf16>
    "tpu.trace_start"() <{level = 10 : i32, message = "bqk,bke->bqe"}> : () -> ()
    %cst_51 = arith.constant dense<0.000000e+00> : vector<2x16x64xf32>
    %97 = tpu.matmul %96, %84, %cst_51 {dimension_numbers = #tpu.dot_dimension_numbers<[2], [1], [1], [2], [0, 0, 0, 1, 1, 2], [0], [0]>} : vector<2x16x8xbf16>, vector<2x8x64xbf16>, vector<2x16x64xf32> -> vector<2x16x64xf32>
    "tpu.trace_stop"() : () -> ()
    %98 = tpu.concatenate %78, %97 in 2 : vector<2x16x64xf32>, vector<2x16x64xf32> -> vector<2x16x128xf32>
    %99 = vector.shape_cast %98 : vector<2x16x128xf32> to vector<32x128xf32>
    %100 = arith.truncf %99 : vector<32x128xf32> to vector<32x128xbf16>
    %cst_52 = arith.constant dense<0.000000e+00> : vector<32x128xf32>
    %101 = tpu.matmul %100, %3, %cst_52 {dimension_numbers = #tpu.dot_dimension_numbers<[1], [0], [0], [1], [0, 0, 1, 1], [], []>} : vector<32x128xbf16>, vector<128x128xbf16>, vector<32x128xf32> -> vector<32x128xf32>
    %102 = vector.broadcast %9 : vector<1x128xf32> to vector<32x128xf32>
    %103 = arith.addf %101, %102 : vector<32x128xf32>
    %104 = vector.shape_cast %103 : vector<32x128xf32> to vector<2x16x128xf32>
    %105 = arith.addf %18, %104 : vector<2x16x128xf32>
    %cst_53 = arith.constant dense<0.000000e+00> : vector<2x16xf32>
    %106 = vector.multi_reduction <add>, %105, %cst_53 [2] : vector<2x16x128xf32> to vector<2x16xf32>
    %107 = vector.shape_cast %106 : vector<2x16xf32> to vector<2x16x1xf32>
    %cst_54 = arith.constant 1.280000e+02 : f32
    %108 = vector.broadcast %cst_54 : f32 to vector<2x16x1xf32>
    %109 = arith.divf %107, %108 : vector<2x16x1xf32>
    %110 = vector.broadcast %109 : vector<2x16x1xf32> to vector<2x16x128xf32>
    %111 = arith.subf %105, %110 : vector<2x16x128xf32>
    %112 = arith.mulf %111, %111 : vector<2x16x128xf32>
    %cst_55 = arith.constant dense<0.000000e+00> : vector<2x16xf32>
    %113 = vector.multi_reduction <add>, %112, %cst_55 [2] : vector<2x16x128xf32> to vector<2x16xf32>
    %114 = vector.shape_cast %113 : vector<2x16xf32> to vector<2x16x1xf32>
    %cst_56 = arith.constant 1.280000e+02 : f32
    %115 = vector.broadcast %cst_56 : f32 to vector<2x16x1xf32>
    %116 = arith.divf %114, %115 : vector<2x16x1xf32>
    %117 = vector.broadcast %109 : vector<2x16x1xf32> to vector<2x16x128xf32>
    %118 = arith.subf %105, %117 : vector<2x16x128xf32>
    %cst_57 = arith.constant 9.99999974E-6 : f32
    %119 = vector.broadcast %cst_57 : f32 to vector<2x16x1xf32>
    %120 = arith.addf %116, %119 : vector<2x16x1xf32>
    %121 = math.rsqrt %120 : vector<2x16x1xf32>
    %122 = vector.broadcast %121 : vector<2x16x1xf32> to vector<2x16x128xf32>
    %123 = arith.mulf %118, %122 : vector<2x16x128xf32>
    %124 = vector.shape_cast %14 : vector<1x128xf32> to vector<1x1x128xf32>
    %125 = vector.broadcast %124 : vector<1x1x128xf32> to vector<2x16x128xf32>
    %126 = arith.mulf %123, %125 : vector<2x16x128xf32>
    %127 = vector.shape_cast %15 : vector<1x128xf32> to vector<1x1x128xf32>
    %128 = vector.broadcast %127 : vector<1x1x128xf32> to vector<2x16x128xf32>
    %129 = arith.addf %126, %128 : vector<2x16x128xf32>
    %130 = vector.shape_cast %129 : vector<2x16x128xf32> to vector<32x128xf32>
    %131 = arith.truncf %130 : vector<32x128xf32> to vector<32x128xbf16>
    %cst_58 = arith.constant dense<0.000000e+00> : vector<32x256xf32>
    %132 = tpu.matmul %131, %4, %cst_58 {dimension_numbers = #tpu.dot_dimension_numbers<[1], [0], [0], [1], [0, 0, 1, 1], [], []>} : vector<32x128xbf16>, vector<128x256xbf16>, vector<32x256xf32> -> vector<32x256xf32>
    %133 = vector.broadcast %10 : vector<1x256xf32> to vector<32x256xf32>
    %134 = arith.addf %132, %133 : vector<32x256xf32>
    %cst_59 = arith.constant 0.000000e+00 : f32
    %135 = vector.broadcast %cst_59 : f32 to vector<32x256xf32>
    %136 = arith.maximumf %134, %135 : vector<32x256xf32>
    %137 = arith.truncf %136 : vector<32x256xf32> to vector<32x256xbf16>
    %cst_60 = arith.constant dense<0.000000e+00> : vector<32x128xf32>
    %138 = tpu.matmul %137, %5, %cst_60 {dimension_numbers = #tpu.dot_dimension_numbers<[1], [0], [0], [1], [0, 0, 1, 1], [], []>} : vector<32x256xbf16>, vector<256x128xbf16>, vector<32x128xf32> -> vector<32x128xf32>
    %139 = vector.broadcast %11 : vector<1x128xf32> to vector<32x128xf32>
    %140 = arith.addf %138, %139 : vector<32x128xf32>
    %141 = vector.shape_cast %140 : vector<32x128xf32> to vector<2x16x128xf32>
    %142 = arith.addf %105, %141 : vector<2x16x128xf32>
    %c1_i32 = arith.constant 1 : i32
    %cst_61 = arith.constant dense<0.000000e+00> : vector<2x16xf32>
    %143 = vector.multi_reduction <add>, %142, %cst_61 [2] : vector<2x16x128xf32> to vector<2x16xf32>
    %144 = vector.shape_cast %143 : vector<2x16xf32> to vector<2x16x1xf32>
    %cst_62 = arith.constant 1.280000e+02 : f32
    %145 = vector.broadcast %cst_62 : f32 to vector<2x16x1xf32>
    %146 = arith.divf %144, %145 : vector<2x16x1xf32>
    %147 = vector.broadcast %146 : vector<2x16x1xf32> to vector<2x16x128xf32>
    %148 = arith.subf %142, %147 : vector<2x16x128xf32>
    %149 = arith.mulf %148, %148 : vector<2x16x128xf32>
    %cst_63 = arith.constant dense<0.000000e+00> : vector<2x16xf32>
    %150 = vector.multi_reduction <add>, %149, %cst_63 [2] : vector<2x16x128xf32> to vector<2x16xf32>
    %151 = vector.shape_cast %150 : vector<2x16xf32> to vector<2x16x1xf32>
    %cst_64 = arith.constant 1.280000e+02 : f32
    %152 = vector.broadcast %cst_64 : f32 to vector<2x16x1xf32>
    %153 = arith.divf %151, %152 : vector<2x16x1xf32>
    %154 = vector.broadcast %146 : vector<2x16x1xf32> to vector<2x16x128xf32>
    %155 = arith.subf %142, %154 : vector<2x16x128xf32>
    %cst_65 = arith.constant 9.99999974E-6 : f32
    %156 = vector.broadcast %cst_65 : f32 to vector<2x16x1xf32>
    %157 = arith.addf %153, %156 : vector<2x16x1xf32>
    %158 = math.rsqrt %157 : vector<2x16x1xf32>
    %159 = vector.broadcast %158 : vector<2x16x1xf32> to vector<2x16x128xf32>
    %160 = arith.mulf %155, %159 : vector<2x16x128xf32>
    %161 = vector.shape_cast %12 : vector<1x128xf32> to vector<1x1x128xf32>
    %162 = vector.broadcast %161 : vector<1x1x128xf32> to vector<2x16x128xf32>
    %163 = arith.mulf %160, %162 : vector<2x16x128xf32>
    %164 = vector.shape_cast %13 : vector<1x128xf32> to vector<1x1x128xf32>
    %165 = vector.broadcast %164 : vector<1x1x128xf32> to vector<2x16x128xf32>
    %166 = arith.addf %163, %165 : vector<2x16x128xf32>
    %167 = vector.shape_cast %166 : vector<2x16x128xf32> to vector<32x128xf32>
    %168 = arith.truncf %167 : vector<32x128xf32> to vector<32x128xbf16>
    %169 = vector.extract_strided_slice %166 {offsets = [0, 8, 0], sizes = [2, 8, 128], strides = [1, 1, 1]} : vector<2x16x128xf32> to vector<2x8x128xf32>
    %170 = vector.shape_cast %169 : vector<2x8x128xf32> to vector<16x128xf32>
    %171 = arith.truncf %170 : vector<16x128xf32> to vector<16x128xbf16>
    %cst_66 = arith.constant dense<0.000000e+00> : vector<32x128xf32>
    %172 = tpu.matmul %168, %0, %cst_66 {dimension_numbers = #tpu.dot_dimension_numbers<[1], [0], [0], [1], [0, 0, 1, 1], [], []>} : vector<32x128xbf16>, vector<128x128xbf16>, vector<32x128xf32> -> vector<32x128xf32>
    %173 = vector.broadcast %6 : vector<1x128xf32> to vector<32x128xf32>
    %174 = arith.addf %172, %173 : vector<32x128xf32>
    %175 = vector.shape_cast %174 : vector<32x128xf32> to vector<2x16x128xf32>
    %cst_67 = arith.constant dense<0.000000e+00> : vector<16x128xf32>
    %176 = tpu.matmul %171, %1, %cst_67 {dimension_numbers = #tpu.dot_dimension_numbers<[1], [0], [0], [1], [0, 0, 1, 1], [], []>} : vector<16x128xbf16>, vector<128x128xbf16>, vector<16x128xf32> -> vector<16x128xf32>
    %177 = vector.broadcast %7 : vector<1x128xf32> to vector<16x128xf32>
    %178 = arith.addf %176, %177 : vector<16x128xf32>
    %179 = vector.shape_cast %178 : vector<16x128xf32> to vector<2x8x128xf32>
    %cst_68 = arith.constant dense<0.000000e+00> : vector<16x128xf32>
    %180 = tpu.matmul %171, %2, %cst_68 {dimension_numbers = #tpu.dot_dimension_numbers<[1], [0], [0], [1], [0, 0, 1, 1], [], []>} : vector<16x128xbf16>, vector<128x128xbf16>, vector<16x128xf32> -> vector<16x128xf32>
    %181 = vector.broadcast %8 : vector<1x128xf32> to vector<16x128xf32>
    %182 = arith.addf %180, %181 : vector<16x128xf32>
    %183 = vector.shape_cast %182 : vector<16x128xf32> to vector<2x8x128xf32>
    %184 = vector.extract_strided_slice %175 {offsets = [0, 0, 0], sizes = [2, 16, 64], strides = [1, 1, 1]} : vector<2x16x128xf32> to vector<2x16x64xf32>
    %185 = arith.truncf %184 : vector<2x16x64xf32> to vector<2x16x64xbf16>
    %186 = vector.extract_strided_slice %179 {offsets = [0, 0, 0], sizes = [2, 8, 64], strides = [1, 1, 1]} : vector<2x8x128xf32> to vector<2x8x64xf32>
    %187 = arith.truncf %186 : vector<2x8x64xf32> to vector<2x8x64xbf16>
    %188 = vector.extract_strided_slice %183 {offsets = [0, 0, 0], sizes = [2, 8, 64], strides = [1, 1, 1]} : vector<2x8x128xf32> to vector<2x8x64xf32>
    %189 = arith.truncf %188 : vector<2x8x64xf32> to vector<2x8x64xbf16>
    "tpu.trace_start"() <{level = 10 : i32, message = "bqe,bke->bqk"}> : () -> ()
    %cst_69 = arith.constant dense<0.000000e+00> : vector<2x16x8xf32>
    %190 = tpu.matmul %185, %187, %cst_69 {dimension_numbers = #tpu.dot_dimension_numbers<[2], [2], [1], [1], [0, 0, 0, 1, 1, 1], [0], [0]>} : vector<2x16x64xbf16>, vector<2x8x64xbf16>, vector<2x16x8xf32> -> vector<2x16x8xf32>
    "tpu.trace_stop"() : () -> ()
    %cst_70 = arith.constant dense<0xFF800000> : vector<2x16xf32>
    %191 = vector.multi_reduction <maximumf>, %190, %cst_70 [2] : vector<2x16x8xf32> to vector<2x16xf32>
    %192 = vector.shape_cast %191 : vector<2x16xf32> to vector<2x16x1xf32>
    %193 = vector.broadcast %192 : vector<2x16x1xf32> to vector<2x16x8xf32>
    %194 = arith.subf %190, %193 : vector<2x16x8xf32>
    %195 = math.exp %194 : vector<2x16x8xf32>
    %cst_71 = arith.constant dense<0.000000e+00> : vector<2x16xf32>
    %196 = vector.multi_reduction <add>, %195, %cst_71 [2] : vector<2x16x8xf32> to vector<2x16xf32>
    %197 = vector.shape_cast %196 : vector<2x16xf32> to vector<2x16x1xf32>
    %198 = tpu.reciprocal %197 {approx = true} : vector<2x16x1xf32> -> vector<2x16x1xf32>
    %199 = vector.broadcast %198 : vector<2x16x1xf32> to vector<2x16x8xf32>
    %200 = arith.mulf %195, %199 : vector<2x16x8xf32>
    %201 = arith.truncf %200 : vector<2x16x8xf32> to vector<2x16x8xbf16>
    "tpu.trace_start"() <{level = 10 : i32, message = "bqk,bke->bqe"}> : () -> ()
    %cst_72 = arith.constant dense<0.000000e+00> : vector<2x16x64xf32>
    %202 = tpu.matmul %201, %189, %cst_72 {dimension_numbers = #tpu.dot_dimension_numbers<[2], [1], [1], [2], [0, 0, 0, 1, 1, 2], [0], [0]>} : vector<2x16x8xbf16>, vector<2x8x64xbf16>, vector<2x16x64xf32> -> vector<2x16x64xf32>
    "tpu.trace_stop"() : () -> ()
    %203 = vector.extract_strided_slice %175 {offsets = [0, 0, 64], sizes = [2, 16, 64], strides = [1, 1, 1]} : vector<2x16x128xf32> to vector<2x16x64xf32>
    %204 = arith.truncf %203 : vector<2x16x64xf32> to vector<2x16x64xbf16>
    %205 = vector.extract_strided_slice %179 {offsets = [0, 0, 64], sizes = [2, 8, 64], strides = [1, 1, 1]} : vector<2x8x128xf32> to vector<2x8x64xf32>
    %206 = arith.truncf %205 : vector<2x8x64xf32> to vector<2x8x64xbf16>
    %207 = vector.extract_strided_slice %183 {offsets = [0, 0, 64], sizes = [2, 8, 64], strides = [1, 1, 1]} : vector<2x8x128xf32> to vector<2x8x64xf32>
    %208 = arith.truncf %207 : vector<2x8x64xf32> to vector<2x8x64xbf16>
    "tpu.trace_start"() <{level = 10 : i32, message = "bqe,bke->bqk"}> : () -> ()
    %cst_73 = arith.constant dense<0.000000e+00> : vector<2x16x8xf32>
    %209 = tpu.matmul %204, %206, %cst_73 {dimension_numbers = #tpu.dot_dimension_numbers<[2], [2], [1], [1], [0, 0, 0, 1, 1, 1], [0], [0]>} : vector<2x16x64xbf16>, vector<2x8x64xbf16>, vector<2x16x8xf32> -> vector<2x16x8xf32>
    "tpu.trace_stop"() : () -> ()
    %cst_74 = arith.constant dense<0xFF800000> : vector<2x16xf32>
    %210 = vector.multi_reduction <maximumf>, %209, %cst_74 [2] : vector<2x16x8xf32> to vector<2x16xf32>
    %211 = vector.shape_cast %210 : vector<2x16xf32> to vector<2x16x1xf32>
    %212 = vector.broadcast %211 : vector<2x16x1xf32> to vector<2x16x8xf32>
    %213 = arith.subf %209, %212 : vector<2x16x8xf32>
    %214 = math.exp %213 : vector<2x16x8xf32>
    %cst_75 = arith.constant dense<0.000000e+00> : vector<2x16xf32>
    %215 = vector.multi_reduction <add>, %214, %cst_75 [2] : vector<2x16x8xf32> to vector<2x16xf32>
    %216 = vector.shape_cast %215 : vector<2x16xf32> to vector<2x16x1xf32>
    %217 = tpu.reciprocal %216 {approx = true} : vector<2x16x1xf32> -> vector<2x16x1xf32>
    %218 = vector.broadcast %217 : vector<2x16x1xf32> to vector<2x16x8xf32>
    %219 = arith.mulf %214, %218 : vector<2x16x8xf32>
    %220 = arith.truncf %219 : vector<2x16x8xf32> to vector<2x16x8xbf16>
    "tpu.trace_start"() <{level = 10 : i32, message = "bqk,bke->bqe"}> : () -> ()
    %cst_76 = arith.constant dense<0.000000e+00> : vector<2x16x64xf32>
    %221 = tpu.matmul %220, %208, %cst_76 {dimension_numbers = #tpu.dot_dimension_numbers<[2], [1], [1], [2], [0, 0, 0, 1, 1, 2], [0], [0]>} : vector<2x16x8xbf16>, vector<2x8x64xbf16>, vector<2x16x64xf32> -> vector<2x16x64xf32>
    "tpu.trace_stop"() : () -> ()
    %222 = tpu.concatenate %202, %221 in 2 : vector<2x16x64xf32>, vector<2x16x64xf32> -> vector<2x16x128xf32>
    %223 = vector.shape_cast %222 : vector<2x16x128xf32> to vector<32x128xf32>
    %224 = arith.truncf %223 : vector<32x128xf32> to vector<32x128xbf16>
    %cst_77 = arith.constant dense<0.000000e+00> : vector<32x128xf32>
    %225 = tpu.matmul %224, %3, %cst_77 {dimension_numbers = #tpu.dot_dimension_numbers<[1], [0], [0], [1], [0, 0, 1, 1], [], []>} : vector<32x128xbf16>, vector<128x128xbf16>, vector<32x128xf32> -> vector<32x128xf32>
    %226 = vector.broadcast %9 : vector<1x128xf32> to vector<32x128xf32>
    %227 = arith.addf %225, %226 : vector<32x128xf32>
    %228 = vector.shape_cast %227 : vector<32x128xf32> to vector<2x16x128xf32>
    %229 = arith.addf %142, %228 : vector<2x16x128xf32>
    %cst_78 = arith.constant dense<0.000000e+00> : vector<2x16xf32>
    %230 = vector.multi_reduction <add>, %229, %cst_78 [2] : vector<2x16x128xf32> to vector<2x16xf32>
    %231 = vector.shape_cast %230 : vector<2x16xf32> to vector<2x16x1xf32>
    %cst_79 = arith.constant 1.280000e+02 : f32
    %232 = vector.broadcast %cst_79 : f32 to vector<2x16x1xf32>
    %233 = arith.divf %231, %232 : vector<2x16x1xf32>
    %234 = vector.broadcast %233 : vector<2x16x1xf32> to vector<2x16x128xf32>
    %235 = arith.subf %229, %234 : vector<2x16x128xf32>
    %236 = arith.mulf %235, %235 : vector<2x16x128xf32>
    %cst_80 = arith.constant dense<0.000000e+00> : vector<2x16xf32>
    %237 = vector.multi_reduction <add>, %236, %cst_80 [2] : vector<2x16x128xf32> to vector<2x16xf32>
    %238 = vector.shape_cast %237 : vector<2x16xf32> to vector<2x16x1xf32>
    %cst_81 = arith.constant 1.280000e+02 : f32
    %239 = vector.broadcast %cst_81 : f32 to vector<2x16x1xf32>
    %240 = arith.divf %238, %239 : vector<2x16x1xf32>
    %241 = vector.broadcast %233 : vector<2x16x1xf32> to vector<2x16x128xf32>
    %242 = arith.subf %229, %241 : vector<2x16x128xf32>
    %cst_82 = arith.constant 9.99999974E-6 : f32
    %243 = vector.broadcast %cst_82 : f32 to vector<2x16x1xf32>
    %244 = arith.addf %240, %243 : vector<2x16x1xf32>
    %245 = math.rsqrt %244 : vector<2x16x1xf32>
    %246 = vector.broadcast %245 : vector<2x16x1xf32> to vector<2x16x128xf32>
    %247 = arith.mulf %242, %246 : vector<2x16x128xf32>
    %248 = vector.shape_cast %14 : vector<1x128xf32> to vector<1x1x128xf32>
    %249 = vector.broadcast %248 : vector<1x1x128xf32> to vector<2x16x128xf32>
    %250 = arith.mulf %247, %249 : vector<2x16x128xf32>
    %251 = vector.shape_cast %15 : vector<1x128xf32> to vector<1x1x128xf32>
    %252 = vector.broadcast %251 : vector<1x1x128xf32> to vector<2x16x128xf32>
    %253 = arith.addf %250, %252 : vector<2x16x128xf32>
    %254 = vector.shape_cast %253 : vector<2x16x128xf32> to vector<32x128xf32>
    %255 = arith.truncf %254 : vector<32x128xf32> to vector<32x128xbf16>
    %cst_83 = arith.constant dense<0.000000e+00> : vector<32x256xf32>
    %256 = tpu.matmul %255, %4, %cst_83 {dimension_numbers = #tpu.dot_dimension_numbers<[1], [0], [0], [1], [0, 0, 1, 1], [], []>} : vector<32x128xbf16>, vector<128x256xbf16>, vector<32x256xf32> -> vector<32x256xf32>
    %257 = vector.broadcast %10 : vector<1x256xf32> to vector<32x256xf32>
    %258 = arith.addf %256, %257 : vector<32x256xf32>
    %cst_84 = arith.constant 0.000000e+00 : f32
    %259 = vector.broadcast %cst_84 : f32 to vector<32x256xf32>
    %260 = arith.maximumf %258, %259 : vector<32x256xf32>
    %261 = arith.truncf %260 : vector<32x256xf32> to vector<32x256xbf16>
    %cst_85 = arith.constant dense<0.000000e+00> : vector<32x128xf32>
    %262 = tpu.matmul %261, %5, %cst_85 {dimension_numbers = #tpu.dot_dimension_numbers<[1], [0], [0], [1], [0, 0, 1, 1], [], []>} : vector<32x256xbf16>, vector<256x128xbf16>, vector<32x128xf32> -> vector<32x128xf32>
    %263 = vector.broadcast %11 : vector<1x128xf32> to vector<32x128xf32>
    %264 = arith.addf %262, %263 : vector<32x128xf32>
    %265 = vector.shape_cast %264 : vector<32x128xf32> to vector<2x16x128xf32>
    %266 = arith.addf %229, %265 : vector<2x16x128xf32>
    %267 = vector.extract_strided_slice %266 {offsets = [0, 0, 0], sizes = [2, 8, 128], strides = [1, 1, 1]} : vector<2x16x128xf32> to vector<2x8x128xf32>
    %c0_86 = arith.constant 0 : index
    %c0_87 = arith.constant 0 : index
    %c0_88 = arith.constant 0 : index
    %268 = vector.load %arg19[%c0_86, %c0_87, %c0_88] : memref<2x8x128xf32, #tpu.memory_space<vmem>>, vector<2x8x128xf32>
    tpu.vector_store %arg19[%c0_86, %c0_87, %c0_88], %267 {strides = array<i32>} : memref<2x8x128xf32, #tpu.memory_space<vmem>>, vector<2x8x128xf32>,
    return
  }
  func.func @transform_0(%arg0: i32) -> (i32, i32, i32) {
    %c0_i32 = arith.constant 0 : i32
    %c0_i32_0 = arith.constant 0 : i32
    %c0_i32_1 = arith.constant 0 : i32
    return %arg0, %c0_i32, %c0_i32_0 : i32, i32, i32
  }
  func.func @transform_1(%arg0: i32) -> (i32, i32, i32) {
    %c0_i32 = arith.constant 0 : i32
    %c0_i32_0 = arith.constant 0 : i32
    %c0_i32_1 = arith.constant 0 : i32
    return %arg0, %c0_i32, %c0_i32_0 : i32, i32, i32
  }
  func.func @transform_2(%arg0: i32) -> (i32, i32) {
    %c0_i32 = arith.constant 0 : i32
    %c0_i32_0 = arith.constant 0 : i32
    %c0_i32_1 = arith.constant 0 : i32
    return %c0_i32, %c0_i32_0 : i32, i32
  }
  func.func @transform_3(%arg0: i32) -> (i32, i32) {
    %c0_i32 = arith.constant 0 : i32
    %c0_i32_0 = arith.constant 0 : i32
    %c0_i32_1 = arith.constant 0 : i32
    return %c0_i32, %c0_i32_0 : i32, i32
  }
  func.func @transform_4(%arg0: i32) -> (i32, i32) {
    %c0_i32 = arith.constant 0 : i32
    %c0_i32_0 = arith.constant 0 : i32
    %c0_i32_1 = arith.constant 0 : i32
    return %c0_i32, %c0_i32_0 : i32, i32
  }
  func.func @transform_5(%arg0: i32) -> (i32, i32) {
    %c0_i32 = arith.constant 0 : i32
    %c0_i32_0 = arith.constant 0 : i32
    %c0_i32_1 = arith.constant 0 : i32
    return %c0_i32, %c0_i32_0 : i32, i32
  }
  func.func @transform_6(%arg0: i32) -> (i32, i32) {
    %c0_i32 = arith.constant 0 : i32
    %c0_i32_0 = arith.constant 0 : i32
    %c0_i32_1 = arith.constant 0 : i32
    return %c0_i32, %c0_i32_0 : i32, i32
  }
  func.func @transform_7(%arg0: i32) -> (i32, i32) {
    %c0_i32 = arith.constant 0 : i32
    %c0_i32_0 = arith.constant 0 : i32
    %c0_i32_1 = arith.constant 0 : i32
    return %c0_i32, %c0_i32_0 : i32, i32
  }
  func.func @transform_8(%arg0: i32) -> (i32, i32) {
    %c0_i32 = arith.constant 0 : i32
    %c0_i32_0 = arith.constant 0 : i32
    %c0_i32_1 = arith.constant 0 : i32
    return %c0_i32, %c0_i32_0 : i32, i32
  }
  func.func @transform_9(%arg0: i32) -> (i32, i32) {
    %c0_i32 = arith.constant 0 : i32
    %c0_i32_0 = arith.constant 0 : i32
    %c0_i32_1 = arith.constant 0 : i32
    return %c0_i32, %c0_i32_0 : i32, i32
  }
  func.func @transform_10(%arg0: i32) -> (i32, i32) {
    %c0_i32 = arith.constant 0 : i32
    %c0_i32_0 = arith.constant 0 : i32
    %c0_i32_1 = arith.constant 0 : i32
    return %c0_i32, %c0_i32_0 : i32, i32
  }
  func.func @transform_11(%arg0: i32) -> (i32, i32) {
    %c0_i32 = arith.constant 0 : i32
    %c0_i32_0 = arith.constant 0 : i32
    %c0_i32_1 = arith.constant 0 : i32
    return %c0_i32, %c0_i32_0 : i32, i32
  }
  func.func @transform_12(%arg0: i32) -> (i32, i32) {
    %c0_i32 = arith.constant 0 : i32
    %c0_i32_0 = arith.constant 0 : i32
    %c0_i32_1 = arith.constant 0 : i32
    return %c0_i32, %c0_i32_0 : i32, i32
  }
  func.func @transform_13(%arg0: i32) -> (i32, i32) {
    %c0_i32 = arith.constant 0 : i32
    %c0_i32_0 = arith.constant 0 : i32
    %c0_i32_1 = arith.constant 0 : i32
    return %c0_i32, %c0_i32_0 : i32, i32
  }
  func.func @transform_14(%arg0: i32) -> (i32, i32) {
    %c0_i32 = arith.constant 0 : i32
    %c0_i32_0 = arith.constant 0 : i32
    %c0_i32_1 = arith.constant 0 : i32
    return %c0_i32, %c0_i32_0 : i32, i32
  }
  func.func @transform_15(%arg0: i32) -> (i32, i32) {
    %c0_i32 = arith.constant 0 : i32
    %c0_i32_0 = arith.constant 0 : i32
    %c0_i32_1 = arith.constant 0 : i32
    return %c0_i32, %c0_i32_0 : i32, i32
  }
  func.func @transform_16(%arg0: i32) -> (i32, i32) {
    %c0_i32 = arith.constant 0 : i32
    %c0_i32_0 = arith.constant 0 : i32
    %c0_i32_1 = arith.constant 0 : i32
    return %c0_i32, %c0_i32_0 : i32, i32
  }
  func.func @transform_17(%arg0: i32) -> (i32, i32) {
    %c0_i32 = arith.constant 0 : i32
    %c0_i32_0 = arith.constant 0 : i32
    %c0_i32_1 = arith.constant 0 : i32
    return %c0_i32, %c0_i32_0 : i32, i32
  }
  func.func @transform_18(%arg0: i32) -> (i32, i32, i32) {
    %c0_i32 = arith.constant 0 : i32
    %c0_i32_0 = arith.constant 0 : i32
    %c0_i32_1 = arith.constant 0 : i32
    return %arg0, %c0_i32, %c0_i32_0 : i32, i32, i32
  }
}

module attributes {stable_mosaic.version = 11 : i64} {
  func.func @encoder_kernel(%arg0: i32, %arg1: memref<2x8x128xf32, #tpu.memory_space<vmem>>, %arg2: memref<2x8x128xf32, #tpu.memory_space<vmem>>, %arg3: memref<128x128xbf16, #tpu.memory_space<vmem>>, %arg4: memref<1x128xf32, #tpu.memory_space<vmem>>, %arg5: memref<128x128xbf16, #tpu.memory_space<vmem>>, %arg6: memref<1x128xf32, #tpu.memory_space<vmem>>, %arg7: memref<128x128xbf16, #tpu.memory_space<vmem>>, %arg8: memref<1x128xf32, #tpu.memory_space<vmem>>, %arg9: memref<128x128xbf16, #tpu.memory_space<vmem>>, %arg10: memref<1x128xf32, #tpu.memory_space<vmem>>, %arg11: memref<1x128xf32, #tpu.memory_space<vmem>>, %arg12: memref<1x128xf32, #tpu.memory_space<vmem>>, %arg13: memref<1x128xf32, #tpu.memory_space<vmem>>, %arg14: memref<1x128xf32, #tpu.memory_space<vmem>>, %arg15: memref<128x256xbf16, #tpu.memory_space<vmem>>, %arg16: memref<1x256xf32, #tpu.memory_space<vmem>>, %arg17: memref<256x128xbf16, #tpu.memory_space<vmem>>, %arg18: memref<1x128xf32, #tpu.memory_space<vmem>>, %arg19: memref<2x8x128xf32, #tpu.memory_space<vmem>>) attributes {dimension_semantics = [#tpu.dimension_semantics<parallel>], iteration_bounds = array<i64: 1>, scalar_prefetch = 0 : i64, scratch_operands = 0 : i64, tpu.core_type = #tpu.core_type<tc>, window_params = [{transform_indices = @transform_0, window_bounds = array<i64: 2, 8, 128>}, {transform_indices = @transform_1, window_bounds = array<i64: 2, 8, 128>}, {pipeline_mode = #tpu.pipeline_mode<synchronous>, transform_indices = @transform_2, window_bounds = array<i64: 128, 128>}, {pipeline_mode = #tpu.pipeline_mode<synchronous>, transform_indices = @transform_3, window_bounds = array<i64: 1, 128>}, {pipeline_mode = #tpu.pipeline_mode<synchronous>, transform_indices = @transform_4, window_bounds = array<i64: 128, 128>}, {pipeline_mode = #tpu.pipeline_mode<synchronous>, transform_indices = @transform_5, window_bounds = array<i64: 1, 128>}, {pipeline_mode = #tpu.pipeline_mode<synchronous>, transform_indices = @transform_6, window_bounds = array<i64: 128, 128>}, {pipeline_mode = #tpu.pipeline_mode<synchronous>, transform_indices = @transform_7, window_bounds = array<i64: 1, 128>}, {pipeline_mode = #tpu.pipeline_mode<synchronous>, transform_indices = @transform_8, window_bounds = array<i64: 128, 128>}, {pipeline_mode = #tpu.pipeline_mode<synchronous>, transform_indices = @transform_9, window_bounds = array<i64: 1, 128>}, {pipeline_mode = #tpu.pipeline_mode<synchronous>, transform_indices = @transform_10, window_bounds = array<i64: 1, 128>}, {pipeline_mode = #tpu.pipeline_mode<synchronous>, transform_indices = @transform_11, window_bounds = array<i64: 1, 128>}, {pipeline_mode = #tpu.pipeline_mode<synchronous>, transform_indices = @transform_12, window_bounds = array<i64: 1, 128>}, {pipeline_mode = #tpu.pipeline_mode<synchronous>, transform_indices = @transform_13, window_bounds = array<i64: 1, 128>}, {pipeline_mode = #tpu.pipeline_mode<synchronous>, transform_indices = @transform_14, window_bounds = array<i64: 128, 256>}, {pipeline_mode = #tpu.pipeline_mode<synchronous>, transform_indices = @transform_15, window_bounds = array<i64: 1, 256>}, {pipeline_mode = #tpu.pipeline_mode<synchronous>, transform_indices = @transform_16, window_bounds = array<i64: 256, 128>}, {pipeline_mode = #tpu.pipeline_mode<synchronous>, transform_indices = @transform_17, window_bounds = array<i64: 1, 128>}, {transform_indices = @transform_18, window_bounds = array<i64: 2, 8, 128>}]} {
    %c0 = arith.constant 0 : index
    %c0_0 = arith.constant 0 : index
    %0 = vector.load %arg3[%c0, %c0_0] : memref<128x128xbf16, #tpu.memory_space<vmem>>, vector<128x128xbf16>
    %c0_1 = arith.constant 0 : index
    %c0_2 = arith.constant 0 : index
    %1 = vector.load %arg5[%c0_1, %c0_2] : memref<128x128xbf16, #tpu.memory_space<vmem>>, vector<128x128xbf16>
    %c0_3 = arith.constant 0 : index
    %c0_4 = arith.constant 0 : index
    %2 = vector.load %arg7[%c0_3, %c0_4] : memref<128x128xbf16, #tpu.memory_space<vmem>>, vector<128x128xbf16>
    %c0_5 = arith.constant 0 : index
    %c0_6 = arith.constant 0 : index
    %3 = vector.load %arg9[%c0_5, %c0_6] : memref<128x128xbf16, #tpu.memory_space<vmem>>, vector<128x128xbf16>
    %c0_7 = arith.constant 0 : index
    %c0_8 = arith.constant 0 : index
    %4 = vector.load %arg15[%c0_7, %c0_8] : memref<128x256xbf16, #tpu.memory_space<vmem>>, vector<128x256xbf16>
    %c0_9 = arith.constant 0 : index
    %c0_10 = arith.constant 0 : index
    %5 = vector.load %arg17[%c0_9, %c0_10] : memref<256x128xbf16, #tpu.memory_space<vmem>>, vector<256x128xbf16>
    %c0_11 = arith.constant 0 : index
    %c0_12 = arith.constant 0 : index
    %6 = vector.load %arg4[%c0_11, %c0_12] : memref<1x128xf32, #tpu.memory_space<vmem>>, vector<1x128xf32>
    %c0_13 = arith.constant 0 : index
    %c0_14 = arith.constant 0 : index
    %7 = vector.load %arg6[%c0_13, %c0_14] : memref<1x128xf32, #tpu.memory_space<vmem>>, vector<1x128xf32>
    %c0_15 = arith.constant 0 : index
    %c0_16 = arith.constant 0 : index
    %8 = vector.load %arg8[%c0_15, %c0_16] : memref<1x128xf32, #tpu.memory_space<vmem>>, vector<1x128xf32>
    %c0_17 = arith.constant 0 : index
    %c0_18 = arith.constant 0 : index
    %9 = vector.load %arg10[%c0_17, %c0_18] : memref<1x128xf32, #tpu.memory_space<vmem>>, vector<1x128xf32>
    %c0_19 = arith.constant 0 : index
    %c0_20 = arith.constant 0 : index
    %10 = vector.load %arg16[%c0_19, %c0_20] : memref<1x256xf32, #tpu.memory_space<vmem>>, vector<1x256xf32>
    %c0_21 = arith.constant 0 : index
    %c0_22 = arith.constant 0 : index
    %11 = vector.load %arg18[%c0_21, %c0_22] : memref<1x128xf32, #tpu.memory_space<vmem>>, vector<1x128xf32>
    %c0_23 = arith.constant 0 : index
    %c0_24 = arith.constant 0 : index
    %12 = vector.load %arg11[%c0_23, %c0_24] : memref<1x128xf32, #tpu.memory_space<vmem>>, vector<1x128xf32>
    %c0_25 = arith.constant 0 : index
    %c0_26 = arith.constant 0 : index
    %13 = vector.load %arg12[%c0_25, %c0_26] : memref<1x128xf32, #tpu.memory_space<vmem>>, vector<1x128xf32>
    %c0_27 = arith.constant 0 : index
    %c0_28 = arith.constant 0 : index
    %14 = vector.load %arg13[%c0_27, %c0_28] : memref<1x128xf32, #tpu.memory_space<vmem>>, vector<1x128xf32>
    %c0_29 = arith.constant 0 : index
    %c0_30 = arith.constant 0 : index
    %15 = vector.load %arg14[%c0_29, %c0_30] : memref<1x128xf32, #tpu.memory_space<vmem>>, vector<1x128xf32>
    %c0_31 = arith.constant 0 : index
    %c0_32 = arith.constant 0 : index
    %c0_33 = arith.constant 0 : index
    %16 = vector.load %arg1[%c0_31, %c0_32, %c0_33] : memref<2x8x128xf32, #tpu.memory_space<vmem>>, vector<2x8x128xf32>
    %c0_34 = arith.constant 0 : index
    %c0_35 = arith.constant 0 : index
    %c0_36 = arith.constant 0 : index
    %17 = vector.load %arg2[%c0_34, %c0_35, %c0_36] : memref<2x8x128xf32, #tpu.memory_space<vmem>>, vector<2x8x128xf32>
    %18 = tpu.concatenate %16, %17 in 1 : vector<2x8x128xf32>, vector<2x8x128xf32> -> vector<2x16x128xf32>
    %c0_i32 = arith.constant 0 : i32
    %cst = arith.constant dense<0.000000e+00> : vector<2x16xf32>
    %19 = vector.multi_reduction <add>, %18, %cst [2] : vector<2x16x128xf32> to vector<2x16xf32>
    %20 = vector.shape_cast %19 : vector<2x16xf32> to vector<2x16x1xf32>
    %cst_37 = arith.constant 1.280000e+02 : f32
    %21 = vector.broadcast %cst_37 : f32 to vector<2x16x1xf32>
    %22 = arith.divf %20, %21 : vector<2x16x1xf32>
    %23 = vector.broadcast %22 : vector<2x16x1xf32> to vector<2x16x128xf32>
    %24 = arith.subf %18, %23 : vector<2x16x128xf32>
    %25 = arith.mulf %24, %24 : vector<2x16x128xf32>
    %cst_38 = arith.constant dense<0.000000e+00> : vector<2x16xf32>
    %26 = vector.multi_reduction <add>, %25, %cst_38 [2] : vector<2x16x128xf32> to vector<2x16xf32>
    %27 = vector.shape_cast %26 : vector<2x16xf32> to vector<2x16x1xf32>
    %cst_39 = arith.constant 1.280000e+02 : f32
    %28 = vector.broadcast %cst_39 : f32 to vector<2x16x1xf32>
    %29 = arith.divf %27, %28 : vector<2x16x1xf32>
    %30 = vector.broadcast %22 : vector<2x16x1xf32> to vector<2x16x128xf32>
    %31 = arith.subf %18, %30 : vector<2x16x128xf32>
    %cst_40 = arith.constant 9.99999974E-6 : f32
    %32 = vector.broadcast %cst_40 : f32 to vector<2x16x1xf32>
    %33 = arith.addf %29, %32 : vector<2x16x1xf32>
    %34 = math.rsqrt %33 : vector<2x16x1xf32>
    %35 = vector.broadcast %34 : vector<2x16x1xf32> to vector<2x16x128xf32>
    %36 = arith.mulf %31, %35 : vector<2x16x128xf32>
    %37 = vector.shape_cast %12 : vector<1x128xf32> to vector<1x1x128xf32>
    %38 = vector.broadcast %37 : vector<1x1x128xf32> to vector<2x16x128xf32>
    %39 = arith.mulf %36, %38 : vector<2x16x128xf32>
    %40 = vector.shape_cast %13 : vector<1x128xf32> to vector<1x1x128xf32>
    %41 = vector.broadcast %40 : vector<1x1x128xf32> to vector<2x16x128xf32>
    %42 = arith.addf %39, %41 : vector<2x16x128xf32>
    %43 = vector.shape_cast %42 : vector<2x16x128xf32> to vector<32x128xf32>
    %44 = arith.truncf %43 : vector<32x128xf32> to vector<32x128xbf16>
    %45 = vector.extract_strided_slice %42 {offsets = [0, 8, 0], sizes = [2, 8, 128], strides = [1, 1, 1]} : vector<2x16x128xf32> to vector<2x8x128xf32>
    %46 = vector.shape_cast %45 : vector<2x8x128xf32> to vector<16x128xf32>
    %47 = arith.truncf %46 : vector<16x128xf32> to vector<16x128xbf16>
    %cst_41 = arith.constant dense<0.000000e+00> : vector<32x128xf32>
    %48 = tpu.matmul %44, %0, %cst_41 {dimension_numbers = #tpu.dot_dimension_numbers<[1], [0], [0], [1], [0, 0, 1, 1], [], []>} : vector<32x128xbf16>, vector<128x128xbf16>, vector<32x128xf32> -> vector<32x128xf32>
    %49 = vector.broadcast %6 : vector<1x128xf32> to vector<32x128xf32>
    %50 = arith.addf %48, %49 : vector<32x128xf32>
    %51 = vector.shape_cast %50 : vector<32x128xf32> to vector<2x16x128xf32>
    %cst_42 = arith.constant dense<0.000000e+00> : vector<16x128xf32>
    %52 = tpu.matmul %47, %1, %cst_42 {dimension_numbers = #tpu.dot_dimension_numbers<[1], [0], [0], [1], [0, 0, 1, 1], [], []>} : vector<16x128xbf16>, vector<128x128xbf16>, vector<16x128xf32> -> vector<16x128xf32>
    %53 = vector.broadcast %7 : vector<1x128xf32> to vector<16x128xf32>
    %54 = arith.addf %52, %53 : vector<16x128xf32>
    %55 = vector.shape_cast %54 : vector<16x128xf32> to vector<2x8x128xf32>
    %cst_43 = arith.constant dense<0.000000e+00> : vector<16x128xf32>
    %56 = tpu.matmul %47, %2, %cst_43 {dimension_numbers = #tpu.dot_dimension_numbers<[1], [0], [0], [1], [0, 0, 1, 1], [], []>} : vector<16x128xbf16>, vector<128x128xbf16>, vector<16x128xf32> -> vector<16x128xf32>
    %57 = vector.broadcast %8 : vector<1x128xf32> to vector<16x128xf32>
    %58 = arith.addf %56, %57 : vector<16x128xf32>
    %59 = vector.shape_cast %58 : vector<16x128xf32> to vector<2x8x128xf32>
    %60 = vector.extract_strided_slice %51 {offsets = [0, 0, 0], sizes = [2, 16, 64], strides = [1, 1, 1]} : vector<2x16x128xf32> to vector<2x16x64xf32>
    %61 = arith.truncf %60 : vector<2x16x64xf32> to vector<2x16x64xbf16>
    %62 = vector.extract_strided_slice %55 {offsets = [0, 0, 0], sizes = [2, 8, 64], strides = [1, 1, 1]} : vector<2x8x128xf32> to vector<2x8x64xf32>
    %63 = arith.truncf %62 : vector<2x8x64xf32> to vector<2x8x64xbf16>
    %64 = vector.extract_strided_slice %59 {offsets = [0, 0, 0], sizes = [2, 8, 64], strides = [1, 1, 1]} : vector<2x8x128xf32> to vector<2x8x64xf32>
    %65 = arith.truncf %64 : vector<2x8x64xf32> to vector<2x8x64xbf16>
    "tpu.trace_start"() <{level = 10 : i32, message = "bqe,bke->bqk"}> : () -> ()
    %cst_44 = arith.constant dense<0.000000e+00> : vector<2x16x8xf32>
    %66 = tpu.matmul %61, %63, %cst_44 {dimension_numbers = #tpu.dot_dimension_numbers<[2], [2], [1], [1], [0, 0, 0, 1, 1, 1], [0], [0]>} : vector<2x16x64xbf16>, vector<2x8x64xbf16>, vector<2x16x8xf32> -> vector<2x16x8xf32>
    "tpu.trace_stop"() : () -> ()
    %cst_45 = arith.constant dense<0xFF800000> : vector<2x16xf32>
    %67 = vector.multi_reduction <maximumf>, %66, %cst_45 [2] : vector<2x16x8xf32> to vector<2x16xf32>
    %68 = vector.shape_cast %67 : vector<2x16xf32> to vector<2x16x1xf32>
    %69 = vector.broadcast %68 : vector<2x16x1xf32> to vector<2x16x8xf32>
    %70 = arith.subf %66, %69 : vector<2x16x8xf32>
    %71 = math.exp %70 : vector<2x16x8xf32>
    %cst_46 = arith.constant dense<0.000000e+00> : vector<2x16xf32>
    %72 = vector.multi_reduction <add>, %71, %cst_46 [2] : vector<2x16x8xf32> to vector<2x16xf32>
    %73 = vector.shape_cast %72 : vector<2x16xf32> to vector<2x16x1xf32>
    %74 = tpu.reciprocal %73 {approx = true} : vector<2x16x1xf32> -> vector<2x16x1xf32>
    %75 = vector.broadcast %74 : vector<2x16x1xf32> to vector<2x16x8xf32>
    %76 = arith.mulf %71, %75 : vector<2x16x8xf32>
    %77 = arith.truncf %76 : vector<2x16x8xf32> to vector<2x16x8xbf16>
    "tpu.trace_start"() <{level = 10 : i32, message = "bqk,bke->bqe"}> : () -> ()
    %cst_47 = arith.constant dense<0.000000e+00> : vector<2x16x64xf32>
    %78 = tpu.matmul %77, %65, %cst_47 {dimension_numbers = #tpu.dot_dimension_numbers<[2], [1], [1], [2], [0, 0, 0, 1, 1, 2], [0], [0]>} : vector<2x16x8xbf16>, vector<2x8x64xbf16>, vector<2x16x64xf32> -> vector<2x16x64xf32>
    "tpu.trace_stop"() : () -> ()
    %79 = vector.extract_strided_slice %51 {offsets = [0, 0, 64], sizes = [2, 16, 64], strides = [1, 1, 1]} : vector<2x16x128xf32> to vector<2x16x64xf32>
    %80 = arith.truncf %79 : vector<2x16x64xf32> to vector<2x16x64xbf16>
    %81 = vector.extract_strided_slice %55 {offsets = [0, 0, 64], sizes = [2, 8, 64], strides = [1, 1, 1]} : vector<2x8x128xf32> to vector<2x8x64xf32>
    %82 = arith.truncf %81 : vector<2x8x64xf32> to vector<2x8x64xbf16>
    %83 = vector.extract_strided_slice %59 {offsets = [0, 0, 64], sizes = [2, 8, 64], strides = [1, 1, 1]} : vector<2x8x128xf32> to vector<2x8x64xf32>
    %84 = arith.truncf %83 : vector<2x8x64xf32> to vector<2x8x64xbf16>
    "tpu.trace_start"() <{level = 10 : i32, message = "bqe,bke->bqk"}> : () -> ()
    %cst_48 = arith.constant dense<0.000000e+00> : vector<2x16x8xf32>
    %85 = tpu.matmul %80, %82, %cst_48 {dimension_numbers = #tpu.dot_dimension_numbers<[2], [2], [1], [1], [0, 0, 0, 1, 1, 1], [0], [0]>} : vector<2x16x64xbf16>, vector<2x8x64xbf16>, vector<2x16x8xf32> -> vector<2x16x8xf32>
    "tpu.trace_stop"() : () -> ()
    %cst_49 = arith.constant dense<0xFF800000> : vector<2x16xf32>
    %86 = vector.multi_reduction <maximumf>, %85, %cst_49 [2] : vector<2x16x8xf32> to vector<2x16xf32>
    %87 = vector.shape_cast %86 : vector<2x16xf32> to vector<2x16x1xf32>
    %88 = vector.broadcast %87 : vector<2x16x1xf32> to vector<2x16x8xf32>
    %89 = arith.subf %85, %88 : vector<2x16x8xf32>
    %90 = math.exp %89 : vector<2x16x8xf32>
    %cst_50 = arith.constant dense<0.000000e+00> : vector<2x16xf32>
    %91 = vector.multi_reduction <add>, %90, %cst_50 [2] : vector<2x16x8xf32> to vector<2x16xf32>
    %92 = vector.shape_cast %91 : vector<2x16xf32> to vector<2x16x1xf32>
    %93 = tpu.reciprocal %92 {approx = true} : vector<2x16x1xf32> -> vector<2x16x1xf32>
    %94 = vector.broadcast %93 : vector<2x16x1xf32> to vector<2x16x8xf32>
    %95 = arith.mulf %90, %94 : vector<2x16x8xf32>
    %96 = arith.truncf %95 : vector<2x16x8xf32> to vector<2x16x8xbf16>
    "tpu.trace_start"() <{level = 10 : i32, message = "bqk,bke->bqe"}> : () -> ()
    %cst_51 = arith.constant dense<0.000000e+00> : vector<2x16x64xf32>
    %97 = tpu.matmul %96, %84, %cst_51 {dimension_numbers = #tpu.dot_dimension_numbers<[2], [1], [1], [2], [0, 0, 0, 1, 1, 2], [0], [0]>} : vector<2x16x8xbf16>, vector<2x8x64xbf16>, vector<2x16x64xf32> -> vector<2x16x64xf32>
    "tpu.trace_stop"() : () -> ()
    %98 = tpu.concatenate %78, %97 in 2 : vector<2x16x64xf32>, vector<2x16x64xf32> -> vector<2x16x128xf32>
    %99 = vector.shape_cast %98 : vector<2x16x128xf32> to vector<32x128xf32>
    %100 = arith.truncf %99 : vector<32x128xf32> to vector<32x128xbf16>
    %cst_52 = arith.constant dense<0.000000e+00> : vector<32x128xf32>
    %101 = tpu.matmul %100, %3, %cst_52 {dimension_numbers = #tpu.dot_dimension_numbers<[1], [0], [0], [1], [0, 0, 1, 1], [], []>} : vector<32x128xbf16>, vector<128x128xbf16>, vector<32x128xf32> -> vector<32x128xf32>
    %102 = vector.broadcast %9 : vector<1x128xf32> to vector<32x128xf32>
    %103 = arith.addf %101, %102 : vector<32x128xf32>
    %104 = vector.shape_cast %103 : vector<32x128xf32> to vector<2x16x128xf32>
    %105 = arith.addf %18, %104 : vector<2x16x128xf32>
    %cst_53 = arith.constant dense<0.000000e+00> : vector<2x16xf32>
    %106 = vector.multi_reduction <add>, %105, %cst_53 [2] : vector<2x16x128xf32> to vector<2x16xf32>
    %107 = vector.shape_cast %106 : vector<2x16xf32> to vector<2x16x1xf32>
    %cst_54 = arith.constant 1.280000e+02 : f32
    %108 = vector.broadcast %cst_54 : f32 to vector<2x16x1xf32>
    %109 = arith.divf %107, %108 : vector<2x16x1xf32>
    %110 = vector.broadcast %109 : vector<2x16x1xf32> to vector<2x16x128xf32>
    %111 = arith.subf %105, %110 : vector<2x16x128xf32>
    %112 = arith.mulf %111, %111 : vector<2x16x128xf32>
    %cst_55 = arith.constant dense<0.000000e+00> : vector<2x16xf32>
    %113 = vector.multi_reduction <add>, %112, %cst_55 [2] : vector<2x16x128xf32> to vector<2x16xf32>
    %114 = vector.shape_cast %113 : vector<2x16xf32> to vector<2x16x1xf32>
    %cst_56 = arith.constant 1.280000e+02 : f32
    %115 = vector.broadcast %cst_56 : f32 to vector<2x16x1xf32>
    %116 = arith.divf %114, %115 : vector<2x16x1xf32>
    %117 = vector.broadcast %109 : vector<2x16x1xf32> to vector<2x16x128xf32>
    %118 = arith.subf %105, %117 : vector<2x16x128xf32>
    %cst_57 = arith.constant 9.99999974E-6 : f32
    %119 = vector.broadcast %cst_57 : f32 to vector<2x16x1xf32>
    %120 = arith.addf %116, %119 : vector<2x16x1xf32>
    %121 = math.rsqrt %120 : vector<2x16x1xf32>
    %122 = vector.broadcast %121 : vector<2x16x1xf32> to vector<2x16x128xf32>
    %123 = arith.mulf %118, %122 : vector<2x16x128xf32>
    %124 = vector.shape_cast %14 : vector<1x128xf32> to vector<1x1x128xf32>
    %125 = vector.broadcast %124 : vector<1x1x128xf32> to vector<2x16x128xf32>
    %126 = arith.mulf %123, %125 : vector<2x16x128xf32>
    %127 = vector.shape_cast %15 : vector<1x128xf32> to vector<1x1x128xf32>
    %128 = vector.broadcast %127 : vector<1x1x128xf32> to vector<2x16x128xf32>
    %129 = arith.addf %126, %128 : vector<2x16x128xf32>
    %130 = vector.shape_cast %129 : vector<2x16x128xf32> to vector<32x128xf32>
    %131 = arith.truncf %130 : vector<32x128xf32> to vector<32x128xbf16>
    %cst_58 = arith.constant dense<0.000000e+00> : vector<32x256xf32>
    %132 = tpu.matmul %131, %4, %cst_58 {dimension_numbers = #tpu.dot_dimension_numbers<[1], [0], [0], [1], [0, 0, 1, 1], [], []>} : vector<32x128xbf16>, vector<128x256xbf16>, vector<32x256xf32> -> vector<32x256xf32>
    %133 = vector.broadcast %10 : vector<1x256xf32> to vector<32x256xf32>
    %134 = arith.addf %132, %133 : vector<32x256xf32>
    %cst_59 = arith.constant 0.000000e+00 : f32
    %135 = vector.broadcast %cst_59 : f32 to vector<32x256xf32>
    %136 = arith.maximumf %134, %135 : vector<32x256xf32>
    %137 = arith.truncf %136 : vector<32x256xf32> to vector<32x256xbf16>
    %cst_60 = arith.constant dense<0.000000e+00> : vector<32x128xf32>
    %138 = tpu.matmul %137, %5, %cst_60 {dimension_numbers = #tpu.dot_dimension_numbers<[1], [0], [0], [1], [0, 0, 1, 1], [], []>} : vector<32x256xbf16>, vector<256x128xbf16>, vector<32x128xf32> -> vector<32x128xf32>
    %139 = vector.broadcast %11 : vector<1x128xf32> to vector<32x128xf32>
    %140 = arith.addf %138, %139 : vector<32x128xf32>
    %141 = vector.shape_cast %140 : vector<32x128xf32> to vector<2x16x128xf32>
    %142 = arith.addf %105, %141 : vector<2x16x128xf32>
    %c1_i32 = arith.constant 1 : i32
    %cst_61 = arith.constant dense<0.000000e+00> : vector<2x16xf32>
    %143 = vector.multi_reduction <add>, %142, %cst_61 [2] : vector<2x16x128xf32> to vector<2x16xf32>
    %144 = vector.shape_cast %143 : vector<2x16xf32> to vector<2x16x1xf32>
    %cst_62 = arith.constant 1.280000e+02 : f32
    %145 = vector.broadcast %cst_62 : f32 to vector<2x16x1xf32>
    %146 = arith.divf %144, %145 : vector<2x16x1xf32>
    %147 = vector.broadcast %146 : vector<2x16x1xf32> to vector<2x16x128xf32>
    %148 = arith.subf %142, %147 : vector<2x16x128xf32>
    %149 = arith.mulf %148, %148 : vector<2x16x128xf32>
    %cst_63 = arith.constant dense<0.000000e+00> : vector<2x16xf32>
    %150 = vector.multi_reduction <add>, %149, %cst_63 [2] : vector<2x16x128xf32> to vector<2x16xf32>
    %151 = vector.shape_cast %150 : vector<2x16xf32> to vector<2x16x1xf32>
    %cst_64 = arith.constant 1.280000e+02 : f32
    %152 = vector.broadcast %cst_64 : f32 to vector<2x16x1xf32>
    %153 = arith.divf %151, %152 : vector<2x16x1xf32>
    %154 = vector.broadcast %146 : vector<2x16x1xf32> to vector<2x16x128xf32>
    %155 = arith.subf %142, %154 : vector<2x16x128xf32>
    %cst_65 = arith.constant 9.99999974E-6 : f32
    %156 = vector.broadcast %cst_65 : f32 to vector<2x16x1xf32>
    %157 = arith.addf %153, %156 : vector<2x16x1xf32>
    %158 = math.rsqrt %157 : vector<2x16x1xf32>
    %159 = vector.broadcast %158 : vector<2x16x1xf32> to vector<2x16x128xf32>
    %160 = arith.mulf %155, %159 : vector<2x16x128xf32>
    %161 = vector.shape_cast %12 : vector<1x128xf32> to vector<1x1x128xf32>
    %162 = vector.broadcast %161 : vector<1x1x128xf32> to vector<2x16x128xf32>
    %163 = arith.mulf %160, %162 : vector<2x16x128xf32>
    %164 = vector.shape_cast %13 : vector<1x128xf32> to vector<1x1x128xf32>
    %165 = vector.broadcast %164 : vector<1x1x128xf32> to vector<2x16x128xf32>
    %166 = arith.addf %163, %165 : vector<2x16x128xf32>
    %167 = vector.shape_cast %166 : vector<2x16x128xf32> to vector<32x128xf32>
    %168 = arith.truncf %167 : vector<32x128xf32> to vector<32x128xbf16>
    %169 = vector.extract_strided_slice %166 {offsets = [0, 8, 0], sizes = [2, 8, 128], strides = [1, 1, 1]} : vector<2x16x128xf32> to vector<2x8x128xf32>
    %170 = vector.shape_cast %169 : vector<2x8x128xf32> to vector<16x128xf32>
    %171 = arith.truncf %170 : vector<16x128xf32> to vector<16x128xbf16>
    %cst_66 = arith.constant dense<0.000000e+00> : vector<32x128xf32>
    %172 = tpu.matmul %168, %0, %cst_66 {dimension_numbers = #tpu.dot_dimension_numbers<[1], [0], [0], [1], [0, 0, 1, 1], [], []>} : vector<32x128xbf16>, vector<128x128xbf16>, vector<32x128xf32> -> vector<32x128xf32>
    %173 = vector.broadcast %6 : vector<1x128xf32> to vector<32x128xf32>
    %174 = arith.addf %172, %173 : vector<32x128xf32>
    %175 = vector.shape_cast %174 : vector<32x128xf32> to vector<2x16x128xf32>
    %cst_67 = arith.constant dense<0.000000e+00> : vector<16x128xf32>
    %176 = tpu.matmul %171, %1, %cst_67 {dimension_numbers = #tpu.dot_dimension_numbers<[1], [0], [0], [1], [0, 0, 1, 1], [], []>} : vector<16x128xbf16>, vector<128x128xbf16>, vector<16x128xf32> -> vector<16x128xf32>
    %177 = vector.broadcast %7 : vector<1x128xf32> to vector<16x128xf32>
    %178 = arith.addf %176, %177 : vector<16x128xf32>
    %179 = vector.shape_cast %178 : vector<16x128xf32> to vector<2x8x128xf32>
    %cst_68 = arith.constant dense<0.000000e+00> : vector<16x128xf32>
    %180 = tpu.matmul %171, %2, %cst_68 {dimension_numbers = #tpu.dot_dimension_numbers<[1], [0], [0], [1], [0, 0, 1, 1], [], []>} : vector<16x128xbf16>, vector<128x128xbf16>, vector<16x128xf32> -> vector<16x128xf32>
    %181 = vector.broadcast %8 : vector<1x128xf32> to vector<16x128xf32>
    %182 = arith.addf %180, %181 : vector<16x128xf32>
    %183 = vector.shape_cast %182 : vector<16x128xf32> to vector<2x8x128xf32>
    %184 = vector.extract_strided_slice %175 {offsets = [0, 0, 0], sizes = [2, 16, 64], strides = [1, 1, 1]} : vector<2x16x128xf32> to vector<2x16x64xf32>
    %185 = arith.truncf %184 : vector<2x16x64xf32> to vector<2x16x64xbf16>
    %186 = vector.extract_strided_slice %179 {offsets = [0, 0, 0], sizes = [2, 8, 64], strides = [1, 1, 1]} : vector<2x8x128xf32> to vector<2x8x64xf32>
    %187 = arith.truncf %186 : vector<2x8x64xf32> to vector<2x8x64xbf16>
    %188 = vector.extract_strided_slice %183 {offsets = [0, 0, 0], sizes = [2, 8, 64], strides = [1, 1, 1]} : vector<2x8x128xf32> to vector<2x8x64xf32>
    %189 = arith.truncf %188 : vector<2x8x64xf32> to vector<2x8x64xbf16>
    "tpu.trace_start"() <{level = 10 : i32, message = "bqe,bke->bqk"}> : () -> ()
    %cst_69 = arith.constant dense<0.000000e+00> : vector<2x16x8xf32>
    %190 = tpu.matmul %185, %187, %cst_69 {dimension_numbers = #tpu.dot_dimension_numbers<[2], [2], [1], [1], [0, 0, 0, 1, 1, 1], [0], [0]>} : vector<2x16x64xbf16>, vector<2x8x64xbf16>, vector<2x16x8xf32> -> vector<2x16x8xf32>
    "tpu.trace_stop"() : () -> ()
    %cst_70 = arith.constant dense<0xFF800000> : vector<2x16xf32>
    %191 = vector.multi_reduction <maximumf>, %190, %cst_70 [2] : vector<2x16x8xf32> to vector<2x16xf32>
    %192 = vector.shape_cast %191 : vector<2x16xf32> to vector<2x16x1xf32>
    %193 = vector.broadcast %192 : vector<2x16x1xf32> to vector<2x16x8xf32>
    %194 = arith.subf %190, %193 : vector<2x16x8xf32>
    %195 = math.exp %194 : vector<2x16x8xf32>
    %cst_71 = arith.constant dense<0.000000e+00> : vector<2x16xf32>
    %196 = vector.multi_reduction <add>, %195, %cst_71 [2] : vector<2x16x8xf32> to vector<2x16xf32>
    %197 = vector.shape_cast %196 : vector<2x16xf32> to vector<2x16x1xf32>
    %198 = tpu.reciprocal %197 {approx = true} : vector<2x16x1xf32> -> vector<2x16x1xf32>
    %199 = vector.broadcast %198 : vector<2x16x1xf32> to vector<2x16x8xf32>
    %200 = arith.mulf %195, %199 : vector<2x16x8xf32>
    %201 = arith.truncf %200 : vector<2x16x8xf32> to vector<2x16x8xbf16>
    "tpu.trace_start"() <{level = 10 : i32, message = "bqk,bke->bqe"}> : () -> ()
    %cst_72 = arith.constant dense<0.000000e+00> : vector<2x16x64xf32>
    %202 = tpu.matmul %201, %189, %cst_72 {dimension_numbers = #tpu.dot_dimension_numbers<[2], [1], [1], [2], [0, 0, 0, 1, 1, 2], [0], [0]>} : vector<2x16x8xbf16>, vector<2x8x64xbf16>, vector<2x16x64xf32> -> vector<2x16x64xf32>
    "tpu.trace_stop"() : () -> ()
    %203 = vector.extract_strided_slice %175 {offsets = [0, 0, 64], sizes = [2, 16, 64], strides = [1, 1, 1]} : vector<2x16x128xf32> to vector<2x16x64xf32>
    %204 = arith.truncf %203 : vector<2x16x64xf32> to vector<2x16x64xbf16>
    %205 = vector.extract_strided_slice %179 {offsets = [0, 0, 64], sizes = [2, 8, 64], strides = [1, 1, 1]} : vector<2x8x128xf32> to vector<2x8x64xf32>
    %206 = arith.truncf %205 : vector<2x8x64xf32> to vector<2x8x64xbf16>
    %207 = vector.extract_strided_slice %183 {offsets = [0, 0, 64], sizes = [2, 8, 64], strides = [1, 1, 1]} : vector<2x8x128xf32> to vector<2x8x64xf32>
    %208 = arith.truncf %207 : vector<2x8x64xf32> to vector<2x8x64xbf16>
    "tpu.trace_start"() <{level = 10 : i32, message = "bqe,bke->bqk"}> : () -> ()
    %cst_73 = arith.constant dense<0.000000e+00> : vector<2x16x8xf32>
    %209 = tpu.matmul %204, %206, %cst_73 {dimension_numbers = #tpu.dot_dimension_numbers<[2], [2], [1], [1], [0, 0, 0, 1, 1, 1], [0], [0]>} : vector<2x16x64xbf16>, vector<2x8x64xbf16>, vector<2x16x8xf32> -> vector<2x16x8xf32>
    "tpu.trace_stop"() : () -> ()
    %cst_74 = arith.constant dense<0xFF800000> : vector<2x16xf32>
    %210 = vector.multi_reduction <maximumf>, %209, %cst_74 [2] : vector<2x16x8xf32> to vector<2x16xf32>
    %211 = vector.shape_cast %210 : vector<2x16xf32> to vector<2x16x1xf32>
    %212 = vector.broadcast %211 : vector<2x16x1xf32> to vector<2x16x8xf32>
    %213 = arith.subf %209, %212 : vector<2x16x8xf32>
    %214 = math.exp %213 : vector<2x16x8xf32>
    %cst_75 = arith.constant dense<0.000000e+00> : vector<2x16xf32>
    %215 = vector.multi_reduction <add>, %214, %cst_75 [2] : vector<2x16x8xf32> to vector<2x16xf32>
    %216 = vector.shape_cast %215 : vector<2x16xf32> to vector<2x16x1xf32>
    %217 = tpu.reciprocal %216 {approx = true} : vector<2x16x1xf32> -> vector<2x16x1xf32>
    %218 = vector.broadcast %217 : vector<2x16x1xf32> to vector<2x16x8xf32>
    %219 = arith.mulf %214, %218 : vector<2x16x8xf32>
    %220 = arith.truncf %219 : vector<2x16x8xf32> to vector<2x16x8xbf16>
    "tpu.trace_start"() <{level = 10 : i32, message = "bqk,bke->bqe"}> : () -> ()
    %cst_76 = arith.constant dense<0.000000e+00> : vector<2x16x64xf32>
    %221 = tpu.matmul %220, %208, %cst_76 {dimension_numbers = #tpu.dot_dimension_numbers<[2], [1], [1], [2], [0, 0, 0, 1, 1, 2], [0], [0]>} : vector<2x16x8xbf16>, vector<2x8x64xbf16>, vector<2x16x64xf32> -> vector<2x16x64xf32>
    "tpu.trace_stop"() : () -> ()
    %222 = tpu.concatenate %202, %221 in 2 : vector<2x16x64xf32>, vector<2x16x64xf32> -> vector<2x16x128xf32>
    %223 = vector.shape_cast %222 : vector<2x16x128xf32> to vector<32x128xf32>
    %224 = arith.truncf %223 : vector<32x128xf32> to vector<32x128xbf16>
    %cst_77 = arith.constant dense<0.000000e+00> : vector<32x128xf32>
    %225 = tpu.matmul %224, %3, %cst_77 {dimension_numbers = #tpu.dot_dimension_numbers<[1], [0], [0], [1], [0, 0, 1, 1], [], []>} : vector<32x128xbf16>, vector<128x128xbf16>, vector<32x128xf32> -> vector<32x128xf32>
    %226 = vector.broadcast %9 : vector<1x128xf32> to vector<32x128xf32>
    %227 = arith.addf %225, %226 : vector<32x128xf32>
    %228 = vector.shape_cast %227 : vector<32x128xf32> to vector<2x16x128xf32>
    %229 = arith.addf %142, %228 : vector<2x16x128xf32>
    %cst_78 = arith.constant dense<0.000000e+00> : vector<2x16xf32>
    %230 = vector.multi_reduction <add>, %229, %cst_78 [2] : vector<2x16x128xf32> to vector<2x16xf32>
    %231 = vector.shape_cast %230 : vector<2x16xf32> to vector<2x16x1xf32>
    %cst_79 = arith.constant 1.280000e+02 : f32
    %232 = vector.broadcast %cst_79 : f32 to vector<2x16x1xf32>
    %233 = arith.divf %231, %232 : vector<2x16x1xf32>
    %234 = vector.broadcast %233 : vector<2x16x1xf32> to vector<2x16x128xf32>
    %235 = arith.subf %229, %234 : vector<2x16x128xf32>
    %236 = arith.mulf %235, %235 : vector<2x16x128xf32>
    %cst_80 = arith.constant dense<0.000000e+00> : vector<2x16xf32>
    %237 = vector.multi_reduction <add>, %236, %cst_80 [2] : vector<2x16x128xf32> to vector<2x16xf32>
    %238 = vector.shape_cast %237 : vector<2x16xf32> to vector<2x16x1xf32>
    %cst_81 = arith.constant 1.280000e+02 : f32
    %239 = vector.broadcast %cst_81 : f32 to vector<2x16x1xf32>
    %240 = arith.divf %238, %239 : vector<2x16x1xf32>
    %241 = vector.broadcast %233 : vector<2x16x1xf32> to vector<2x16x128xf32>
    %242 = arith.subf %229, %241 : vector<2x16x128xf32>
    %cst_82 = arith.constant 9.99999974E-6 : f32
    %243 = vector.broadcast %cst_82 : f32 to vector<2x16x1xf32>
    %244 = arith.addf %240, %243 : vector<2x16x1xf32>
    %245 = math.rsqrt %244 : vector<2x16x1xf32>
    %246 = vector.broadcast %245 : vector<2x16x1xf32> to vector<2x16x128xf32>
    %247 = arith.mulf %242, %246 : vector<2x16x128xf32>
    %248 = vector.shape_cast %14 : vector<1x128xf32> to vector<1x1x128xf32>
    %249 = vector.broadcast %248 : vector<1x1x128xf32> to vector<2x16x128xf32>
    %250 = arith.mulf %247, %249 : vector<2x16x128xf32>
    %251 = vector.shape_cast %15 : vector<1x128xf32> to vector<1x1x128xf32>
    %252 = vector.broadcast %251 : vector<1x1x128xf32> to vector<2x16x128xf32>
    %253 = arith.addf %250, %252 : vector<2x16x128xf32>
    %254 = vector.shape_cast %253 : vector<2x16x128xf32> to vector<32x128xf32>
    %255 = arith.truncf %254 : vector<32x128xf32> to vector<32x128xbf16>
    %cst_83 = arith.constant dense<0.000000e+00> : vector<32x256xf32>
    %256 = tpu.matmul %255, %4, %cst_83 {dimension_numbers = #tpu.dot_dimension_numbers<[1], [0], [0], [1], [0, 0, 1, 1], [], []>} : vector<32x128xbf16>, vector<128x256xbf16>, vector<32x256xf32> -> vector<32x256xf32>
    %257 = vector.broadcast %10 : vector<1x256xf32> to vector<32x256xf32>
    %258 = arith.addf %256, %257 : vector<32x256xf32>
    %cst_84 = arith.constant 0.000000e+00 : f32
    %259 = vector.broadcast %cst_84 : f32 to vector<32x256xf32>
    %260 = arith.maximumf %258, %259 : vector<32x256xf32>
    %261 = arith.truncf %260 : vector<32x256xf32> to vector<32x256xbf16>
    %cst_85 = arith.constant dense<0.000000e+00> : vector<32x128xf32>
    %262 = tpu.matmul %261, %5, %cst_85 {dimension_numbers = #tpu.dot_dimension_numbers<[1], [0], [0], [1], [0, 0, 1, 1], [], []>} : vector<32x256xbf16>, vector<256x128xbf16>, vector<32x128xf32> -> vector<32x128xf32>
    %263 = vector.broadcast %11 : vector<1x128xf32> to vector<32x128xf32>
    %264 = arith.addf %262, %263 : vector<32x128xf32>
    %265 = vector.shape_cast %264 : vector<32x128xf32> to vector<2x16x128xf32>
    %266 = arith.addf %229, %265 : vector<2x16x128xf32>
    %267 = vector.extract_strided_slice %266 {offsets = [0, 0, 0], sizes = [2, 8, 128], strides = [1, 1, 1]} : vector<2x16x128xf32> to vector<2x8x128xf32>
    %c0_86 = arith.constant 0 : index
    %c0_87 = arith.constant 0 : index
    %c0_88 = arith.constant 0 : index
    %268 = vector.load %arg19[%c0_86, %c0_87, %c0_88] : memref<2x8x128xf32, #tpu.memory_space<vmem>>, vector<2x8x128xf32>
    tpu.vector_store %arg19[%c0_86, %c0_87, %c0_88], %267 {strides = array<i32>} : memref<2x8x128xf32, #tpu.memory_space<vmem>>, vector<2x8x128xf32>,
    return
  }
  func.func @transform_0(%arg0: i32) -> (i32, i32, i32) {
    %c0_i32 = arith.constant 0 : i32
    %c0_i32_0 = arith.constant 0 : i32
    %c0_i32_1 = arith.constant 0 : i32
    return %arg0, %c0_i32, %c0_i32_0 : i32, i32, i32
  }
  func.func @transform_1(%arg0: i32) -> (i32, i32, i32) {
    %c0_i32 = arith.constant 0 : i32
    %c0_i32_0 = arith.constant 0 : i32
    %c0_i32_1 = arith.constant 0 : i32
    return %arg0, %c0_i32, %c0_i32_0 : i32, i32, i32
  }
  func.func @transform_2(%arg0: i32) -> (i32, i32) {
    %c0_i32 = arith.constant 0 : i32
    %c0_i32_0 = arith.constant 0 : i32
    %c0_i32_1 = arith.constant 0 : i32
    return %c0_i32, %c0_i32_0 : i32, i32
  }
  func.func @transform_3(%arg0: i32) -> (i32, i32) {
    %c0_i32 = arith.constant 0 : i32
    %c0_i32_0 = arith.constant 0 : i32
    %c0_i32_1 = arith.constant 0 : i32
    return %c0_i32, %c0_i32_0 : i32, i32
  }
  func.func @transform_4(%arg0: i32) -> (i32, i32) {
    %c0_i32 = arith.constant 0 : i32
    %c0_i32_0 = arith.constant 0 : i32
    %c0_i32_1 = arith.constant 0 : i32
    return %c0_i32, %c0_i32_0 : i32, i32
  }
  func.func @transform_5(%arg0: i32) -> (i32, i32) {
    %c0_i32 = arith.constant 0 : i32
    %c0_i32_0 = arith.constant 0 : i32
    %c0_i32_1 = arith.constant 0 : i32
    return %c0_i32, %c0_i32_0 : i32, i32
  }
  func.func @transform_6(%arg0: i32) -> (i32, i32) {
    %c0_i32 = arith.constant 0 : i32
    %c0_i32_0 = arith.constant 0 : i32
    %c0_i32_1 = arith.constant 0 : i32
    return %c0_i32, %c0_i32_0 : i32, i32
  }
  func.func @transform_7(%arg0: i32) -> (i32, i32) {
    %c0_i32 = arith.constant 0 : i32
    %c0_i32_0 = arith.constant 0 : i32
    %c0_i32_1 = arith.constant 0 : i32
    return %c0_i32, %c0_i32_0 : i32, i32
  }
  func.func @transform_8(%arg0: i32) -> (i32, i32) {
    %c0_i32 = arith.constant 0 : i32
    %c0_i32_0 = arith.constant 0 : i32
    %c0_i32_1 = arith.constant 0 : i32
    return %c0_i32, %c0_i32_0 : i32, i32
  }
  func.func @transform_9(%arg0: i32) -> (i32, i32) {
    %c0_i32 = arith.constant 0 : i32
    %c0_i32_0 = arith.constant 0 : i32
    %c0_i32_1 = arith.constant 0 : i32
    return %c0_i32, %c0_i32_0 : i32, i32
  }
  func.func @transform_10(%arg0: i32) -> (i32, i32) {
    %c0_i32 = arith.constant 0 : i32
    %c0_i32_0 = arith.constant 0 : i32
    %c0_i32_1 = arith.constant 0 : i32
    return %c0_i32, %c0_i32_0 : i32, i32
  }
  func.func @transform_11(%arg0: i32) -> (i32, i32) {
    %c0_i32 = arith.constant 0 : i32
    %c0_i32_0 = arith.constant 0 : i32
    %c0_i32_1 = arith.constant 0 : i32
    return %c0_i32, %c0_i32_0 : i32, i32
  }
  func.func @transform_12(%arg0: i32) -> (i32, i32) {
    %c0_i32 = arith.constant 0 : i32
    %c0_i32_0 = arith.constant 0 : i32
    %c0_i32_1 = arith.constant 0 : i32
    return %c0_i32, %c0_i32_0 : i32, i32
  }
  func.func @transform_13(%arg0: i32) -> (i32, i32) {
    %c0_i32 = arith.constant 0 : i32
    %c0_i32_0 = arith.constant 0 : i32
    %c0_i32_1 = arith.constant 0 : i32
    return %c0_i32, %c0_i32_0 : i32, i32
  }
  func.func @transform_14(%arg0: i32) -> (i32, i32) {
    %c0_i32 = arith.constant 0 : i32
    %c0_i32_0 = arith.constant 0 : i32
    %c0_i32_1 = arith.constant 0 : i32
    return %c0_i32, %c0_i32_0 : i32, i32
  }
  func.func @transform_15(%arg0: i32) -> (i32, i32) {
    %c0_i32 = arith.constant 0 : i32
    %c0_i32_0 = arith.constant 0 : i32
    %c0_i32_1 = arith.constant 0 : i32
    return %c0_i32, %c0_i32_0 : i32, i32
  }
  func.func @transform_16(%arg0: i32) -> (i32, i32) {
    %c0_i32 = arith.constant 0 : i32
    %c0_i32_0 = arith.constant 0 : i32
    %c0_i32_1 = arith.constant 0 : i32
    return %c0_i32, %c0_i32_0 : i32, i32
  }
  func.func @transform_17(%arg0: i32) -> (i32, i32) {
    %c0_i32 = arith.constant 0 : i32
    %c0_i32_0 = arith.constant 0 : i32
    %c0_i32_1 = arith.constant 0 : i32
    return %c0_i32, %c0_i32_0 : i32, i32
  }
  func.func @transform_18(%arg0: i32) -> (i32, i32, i32) {
    %c0_i32 = arith.constant 0 : i32
    %c0_i32_0 = arith.constant 0 : i32
    %c0_i32_1 = arith.constant 0 : i32
    return %arg0, %c0_i32, %c0_i32_0 : i32, i32, i32
  }
}

</mosaic_0001>

<bundles_post_ra>
// kernel: tpu_custom_call.1
= control target key start
LH: loop header
LB: loop body
LE: loop exit
PB: predicated region body
PF: predicated region fallthrough
CT: control target
= control target key end

     0   :  { %s4396_s0 = inlined_call_operand.hbm [shape: f32[2,8,128], index: 0, kind: input, shape index: {}]   ;;  %s4397_s1 = inlined_call_operand.hbm [shape: f32[2,8,128], index: 1, kind: input, shape index: {}]   ;;  %s4398_s2 = inlined_call_operand.hbm [shape: bf16[128,128], index: 2, kind: input, shape index: {}]   ;;  %s4399_s3 = inlined_call_operand.vmem [shape: f32[1,128], index: 3, kind: input, shape index: {}]   ;;  %s4400_s4 = inlined_call_operand.hbm [shape: bf16[128,128], index: 4, kind: input, shape index: {}]   ;;  %s4401_s5 = inlined_call_operand.vmem [shape: f32[1,128], index: 5, kind: input, shape index: {}]   ;;  %s4402_s6 = inlined_call_operand.hbm [shape: bf16[128,128], index: 6, kind: input, shape index: {}]   ;;  %s4403_s7 = inlined_call_operand.vmem [shape: f32[1,128], index: 7, kind: input, shape index: {}]   ;;  %s4404_s8 = inlined_call_operand.hbm [shape: bf16[128,128], index: 8, kind: input, shape index: {}]   ;;  %s4405_s9 = inlined_call_operand.vmem [shape: f32[1,128], index: 9, kind: input, shape index: {}]   ;;  %s4406_s10 = inlined_call_operand.vmem [shape: f32[1,128], index: 10, kind: input, shape index: {}]   ;;  %s4407_s11 = inlined_call_operand.vmem [shape: f32[1,128], index: 11, kind: input, shape index: {}]   ;;  %s4408_s12 = inlined_call_operand.vmem [shape: f32[1,128], index: 12, kind: input, shape index: {}]   ;;  %s4409_s13 = inlined_call_operand.vmem [shape: f32[1,128], index: 13, kind: input, shape index: {}]   ;;  %s4410_s14 = inlined_call_operand.hbm [shape: bf16[128,256], index: 14, kind: input, shape index: {}]   ;;  %s4411_s15 = inlined_call_operand.vmem [shape: f32[1,256], index: 15, kind: input, shape index: {}]   ;;  %s4412_s16 = inlined_call_operand.hbm [shape: bf16[256,128], index: 16, kind: input, shape index: {}]   ;;  %s4413_s17 = inlined_call_operand.vmem [shape: f32[1,128], index: 17, kind: input, shape index: {}]   ;;  %s4414_s18 = inlined_call_operand.hbm [shape: f32[2,8,128], index: 18, kind: output, shape index: {}]  }
   0x1   :  { %4421 = sst [smem:[#allocation23_spill]] %s4396_s0 }
   0x2   :  { %4422 = sst [smem:[#allocation24_spill]] %s4397_s1 }
   0x3   :  { %4423 = sst [smem:[#allocation25_spill]] %s4398_s2 }
   0x4   :  { %4424 = sst [smem:[#allocation26_spill]] %s4413_s17 }
   0x5   :  { %4425 = sst [smem:[#allocation27_spill]] %s4414_s18 }
   0x6   :  { %23 = vsyncpa [#allocation3], 0 }
   0x7   :  { %24 = vsyncpa [#allocation6], 0 }
   0x8   :  { %25 = vsyncpa [#allocation9], 0 }
   0x9   :  { %26 = vsyncpa [#allocation12], 0 }
   0xa   :  { %27 = vsyncpa [#allocation15], 0 }
   0xb   :  { %28 = vsyncpa [#allocation4], 0  ;;  %s3567_s27 = smov [#allocation5]   ;;  %s4426_s0 = sld [smem:[#allocation24_spill]] }
   0xc   :  { %s46_s28 = sshll.u32 %s3567_s27, 4  ;;  %s47_s28 = int_to_ptr.vmem [resolvable:$true] %s46_s28 }
  0x11   :  { %s3357_s19 = scalar_lea.hbm %s4426_s0, 256 }
  0x12   :  { %p3358_p0 = scmp.ne.s32.totalorder %s4426_s0, %s3357_s19  ;;  %p3361_p1 = scmp.lt.u32.totalorder %s3357_s19, %s4426_s0 }
  0x14   :  { %p3363_p2 = pnand %p3361_p1, %p3358_p0 }
  0x16   :  { %3366 = shalt.err (!%p3363_p2)
}
  0x17   :  { %s3367_s2 = scalar_lea.vmem %s47_s28, 256  ;;  %p3372_p4 = scmp.lt.s32.totalorder %s47_s28, %s47_s28 }
  0x18   :  { %p3368_p3 = scmp.ne.s32.totalorder %s47_s28, %s3367_s2  ;;  %p3373_p5 = scmp.lt.s32.totalorder %s3367_s2, %s3367_s2 }
  0x1a   :  { %p3374_p6 = por %p3373_p5, %p3372_p4 }
  0x1c   :  { %p3375_p7 = pnand %p3374_p6, %p3368_p3 }
  0x1e   :  { %3378 = shalt.err (!%p3375_p7)
}
  0x1f   :  { %s4419_s23 = smov 128   ;;  %s3569_s24 = smov 8  }
  0x20   :  { %52 = dma.hbm_to_vmem [thread:$0]  %s4426_s0, 256, %s47_s28, [#allocation6], %s4419_s23, %s4419_s23, %s3569_s24  }
  0x21   :  { %s3570_s27 = smov [#allocation8]   ;;  %s3571_s30 = smov [#allocation11]  }
  0x22   :  { %s72_s29 = sshll.u32 %s3570_s27, 4  ;;  %s100_s19 = sshll.u32 %s3571_s30, 4  ;;  %s73_s29 = int_to_ptr.vmem [resolvable:$true] %s72_s29  ;;  %s101_s19 = int_to_ptr.vmem [resolvable:$true] %s100_s19 }
  0x23   :  { %s3379_s21 = scalar_lea.hbm %s4400_s4, 1024 }
  0x24   :  { %p3380_p8 = scmp.ne.s32.totalorder %s4400_s4, %s3379_s21  ;;  %p3383_p9 = scmp.lt.u32.totalorder %s3379_s21, %s4400_s4 }
  0x26   :  { %p3385_p10 = pnand %p3383_p9, %p3380_p8 }
  0x28   :  { %3388 = shalt.err (!%p3385_p10)
}
  0x29   :  { %s3389_s28 = scalar_lea.vmem %s73_s29, 1024  ;;  %p3394_p12 = scmp.lt.s32.totalorder %s73_s29, %s73_s29 }
  0x2a   :  { %p3390_p11 = scmp.ne.s32.totalorder %s73_s29, %s3389_s28  ;;  %p3395_p13 = scmp.lt.s32.totalorder %s3389_s28, %s3389_s28 }
  0x2c   :  { %p3396_p0 = por %p3395_p13, %p3394_p12 }
  0x2e   :  { %p3397_p1 = pnand %p3396_p0, %p3390_p11 }
  0x30   :  { %3400 = shalt.err (!%p3397_p1)
}
  0x31   :  { %s3572_s0 = smov 64   ;;  %s3573_s25 = smov 4  }
  0x32   :  { %78 = dma.hbm_to_vmem [thread:$0]  %s4400_s4, 1024, %s73_s29, [#allocation9], %s3572_s0, %s3572_s0, %s3573_s25  }
  0x33   :  { %s3401_s30 = scalar_lea.hbm %s4404_s8, 1024 }
  0x34   :  { %p3402_p2 = scmp.ne.s32.totalorder %s4404_s8, %s3401_s30  ;;  %p3405_p3 = scmp.lt.u32.totalorder %s3401_s30, %s4404_s8 }
  0x36   :  { %p3407_p4 = pnand %p3405_p3, %p3402_p2 }
  0x38   :  { %3410 = shalt.err (!%p3407_p4)
}
  0x39   :  { %s3411_s2 = scalar_lea.vmem %s101_s19, 1024  ;;  %p3416_p6 = scmp.lt.s32.totalorder %s101_s19, %s101_s19 }
  0x3a   :  { %p3412_p5 = scmp.ne.s32.totalorder %s101_s19, %s3411_s2  ;;  %p3417_p7 = scmp.lt.s32.totalorder %s3411_s2, %s3411_s2 }
  0x3c   :  { %p3418_p8 = por %p3417_p7, %p3416_p6 }
  0x3e   :  { %p3419_p9 = pnand %p3418_p8, %p3412_p5 }
  0x40   :  { %3422 = shalt.err (!%p3419_p9)
}
  0x41   :  { %106 = dma.hbm_to_vmem [thread:$0]  %s4404_s8, 1024, %s101_s19, [#allocation12], %s3572_s0, %s3572_s0, %s3573_s25  }
  0x42   :  { %s3574_s28 = smov [#allocation2]   ;;  %s3575_s27 = smov [#allocation7]  }
  0x43   :  { %s34_s26 = sshll.u32 %s3574_s28, 4  ;;  %s58_s17 = sshll.u32 %s3575_s27, 4  ;;  %s35_s26 = int_to_ptr.vmem [resolvable:$true] %s34_s26  ;;  %s59_s17 = int_to_ptr.vmem [resolvable:$true] %s58_s17 }
  0x44   :  { %s4427_s1 = sld [smem:[#allocation23_spill]] }
  0x4a   :  { %s3423_s20 = scalar_lea.hbm %s4427_s1, 256 }
  0x4b   :  { %p3424_p10 = scmp.ne.s32.totalorder %s4427_s1, %s3423_s20  ;;  %p3427_p11 = scmp.lt.u32.totalorder %s3423_s20, %s4427_s1 }
  0x4d   :  { %p3429_p12 = pnand %p3427_p11, %p3424_p10 }
  0x4f   :  { %3432 = shalt.err (!%p3429_p12)
}
  0x50   :  { %s3433_s8 = scalar_lea.vmem %s35_s26, 256  ;;  %p3438_p0 = scmp.lt.s32.totalorder %s35_s26, %s35_s26 }
  0x51   :  { %p3434_p13 = scmp.ne.s32.totalorder %s35_s26, %s3433_s8  ;;  %p3439_p1 = scmp.lt.s32.totalorder %s3433_s8, %s3433_s8 }
  0x53   :  { %p3440_p2 = por %p3439_p1, %p3438_p0 }
  0x55   :  { %p3441_p3 = pnand %p3440_p2, %p3434_p13 }
  0x57   :  { %3444 = shalt.err (!%p3441_p3)
}
  0x58   :  { %s4428_s19 = smov 128   ;;  %s4429_s27 = sld [smem:[#allocation25_spill]] }
  0x59   :  { %40 = dma.hbm_to_vmem [thread:$0]  %s4427_s1, 256, %s35_s26, [#allocation3], %s4428_s19, %s4428_s19, %s3569_s24  }
  0x5e   :  { %s3445_s18 = scalar_lea.hbm %s4429_s27, 1024 }
  0x5f   :  { %p3446_p4 = scmp.ne.s32.totalorder %s4429_s27, %s3445_s18  ;;  %p3449_p5 = scmp.lt.u32.totalorder %s3445_s18, %s4429_s27 }
  0x61   :  { %p3451_p6 = pnand %p3449_p5, %p3446_p4 }
  0x63   :  { %3454 = shalt.err (!%p3451_p6)
}
  0x64   :  { %s3455_s2 = scalar_lea.vmem %s59_s17, 1024  ;;  %p3460_p8 = scmp.lt.s32.totalorder %s59_s17, %s59_s17 }
  0x65   :  { %p3456_p7 = scmp.ne.s32.totalorder %s59_s17, %s3455_s2  ;;  %p3461_p9 = scmp.lt.s32.totalorder %s3455_s2, %s3455_s2 }
  0x67   :  { %p3462_p10 = por %p3461_p9, %p3460_p8 }
  0x69   :  { %p3463_p11 = pnand %p3462_p10, %p3456_p7 }
  0x6b   :  { %3466 = shalt.err (!%p3463_p11)
}
  0x6c   :  { %64 = dma.hbm_to_vmem [thread:$0]  %s4429_s27, 1024, %s59_s17, [#allocation6], %s3572_s0, %s3572_s0, %s3573_s25  }
  0x6d   :  { %s3576_s8 = smov [#allocation10]   ;;  %s3577_s29 = smov [#allocation13]  }
  0x6e   :  { %s86_s4 = sshll.u32 %s3576_s8, 4  ;;  %s122_s28 = sshll.u32 %s3577_s29, 4  ;;  %s87_s4 = int_to_ptr.vmem [resolvable:$true] %s86_s4  ;;  %s123_s28 = int_to_ptr.vmem [resolvable:$true] %s122_s28 }
  0x6f   :  { %s3467_s30 = scalar_lea.hbm %s4402_s6, 1024 }
  0x70   :  { %p3468_p12 = scmp.ne.s32.totalorder %s4402_s6, %s3467_s30  ;;  %p3471_p13 = scmp.lt.u32.totalorder %s3467_s30, %s4402_s6 }
  0x72   :  { %p3473_p0 = pnand %p3471_p13, %p3468_p12 }
  0x74   :  { %3476 = shalt.err (!%p3473_p0)
}
  0x75   :  { %s3477_s17 = scalar_lea.vmem %s87_s4, 1024  ;;  %p3482_p2 = scmp.lt.s32.totalorder %s87_s4, %s87_s4 }
  0x76   :  { %p3478_p1 = scmp.ne.s32.totalorder %s87_s4, %s3477_s17  ;;  %p3483_p3 = scmp.lt.s32.totalorder %s3477_s17, %s3477_s17 }
  0x78   :  { %p3484_p4 = por %p3483_p3, %p3482_p2 }
  0x7a   :  { %p3485_p5 = pnand %p3484_p4, %p3478_p1 }
  0x7c   :  { %3488 = shalt.err (!%p3485_p5)
}
  0x7d   :  { %92 = dma.hbm_to_vmem [thread:$0]  %s4402_s6, 1024, %s87_s4, [#allocation9], %s3572_s0, %s3572_s0, %s3573_s25  }
  0x7e   :  { %s3489_s29 = scalar_lea.hbm %s4410_s14, 2048 }
  0x7f   :  { %p3490_p6 = scmp.ne.s32.totalorder %s4410_s14, %s3489_s29  ;;  %p3493_p7 = scmp.lt.u32.totalorder %s3489_s29, %s4410_s14 }
  0x81   :  { %p3495_p8 = pnand %p3493_p7, %p3490_p6 }
  0x83   :  { %3498 = shalt.err (!%p3495_p8)
}
  0x84   :  { %s3499_s21 = scalar_lea.vmem %s123_s28, 2048  ;;  %p3504_p10 = scmp.lt.s32.totalorder %s123_s28, %s123_s28 }
  0x85   :  { %p3500_p9 = scmp.ne.s32.totalorder %s123_s28, %s3499_s21  ;;  %p3505_p11 = scmp.lt.s32.totalorder %s3499_s21, %s3499_s21 }
  0x87   :  { %p3506_p12 = por %p3505_p11, %p3504_p10 }
  0x89   :  { %p3507_p13 = pnand %p3506_p12, %p3500_p9 }
  0x8b   :  { %3510 = shalt.err (!%p3507_p13)
}
  0x8c   :  { %128 = dma.hbm_to_vmem [thread:$0]  %s4410_s14, 2048, %s123_s28, [#allocation12], %s4428_s19, %s4428_s19, %s3569_s24  }
  0x8d   :  { %s3578_s22 = smov [#allocation14]   ;;  %s3511_s26 = scalar_lea.hbm %s4412_s16, 2048 }
  0x8e   :  { %s136_s2 = sshll.u32 %s3578_s22, 4  ;;  %p3512_p0 = scmp.ne.s32.totalorder %s4412_s16, %s3511_s26  ;;  %s137_s2 = int_to_ptr.vmem [resolvable:$true] %s136_s2 }
  0x8f   :  { %p3515_p1 = scmp.lt.u32.totalorder %s3511_s26, %s4412_s16 }
  0x91   :  { %p3517_p2 = pnand %p3515_p1, %p3512_p0 }
  0x93   :  { %3520 = shalt.err (!%p3517_p2)
}
  0x94   :  { %s3521_s18 = scalar_lea.vmem %s137_s2, 2048  ;;  %p3526_p4 = scmp.lt.s32.totalorder %s137_s2, %s137_s2 }
  0x95   :  { %p3522_p3 = scmp.ne.s32.totalorder %s137_s2, %s3521_s18  ;;  %p3527_p5 = scmp.lt.s32.totalorder %s3521_s18, %s3521_s18 }
  0x97   :  { %p3528_p6 = por %p3527_p5, %p3526_p4 }
  0x99   :  { %p3529_p7 = pnand %p3528_p6, %p3522_p3 }
  0x9b   :  { %3532 = shalt.err (!%p3529_p7)
}
  0x9c   :  { %142 = dma.hbm_to_vmem [thread:$0]  %s4412_s16, 2048, %s137_s2, [#allocation15], %s3572_s0, %s3572_s0, %s3573_s25  }
  0x9d   :  { %3555 = dma.done.wait [#allocation3], 256  }
  0x9e   :  { %3556 = vsyncadd [#allocation3], 4294967040 }
  0x9f   :  { %3557 = dma.done.wait [#allocation6], 1280  }
  0xa0   :  { %3558 = vsyncadd [#allocation6], 4294966016 }
  0xa1   :  { %3559 = dma.done.wait [#allocation9], 2048  }
  0xa2   :  { %3560 = vsyncadd [#allocation9], 4294965248 }
  0xa3   :  { %3561 = dma.done.wait [#allocation12], 3072  }
  0xa4   :  { %3562 = vsyncadd [#allocation12], 4294964224 }
  0xa5   :  { %3563 = dma.done.wait [#allocation15], 2048  }
  0xa6   :  { %3564 = vsyncadd [#allocation15], 4294965248  ;;  %v294_v0 = vld [vmem:[#allocation5] sm:$0xff]  ;;  %v295_v1 = vld [vmem:[#allocation5 + $0x8] sm:$0xff]  ;;  %v3579_v6 = vmov 0.0   ;;  %vm3580_vm0 = vmmov 0  }
  0xa7   :  { %v292_v2 = vld [vmem:[#allocation2] sm:$0xff]  ;;  %298 = vadd.xlane.f32.xlu0 %v294_v0  ;;  %v293_v3 = vld [vmem:[#allocation2 + $0x8] sm:$0xff]  ;;  %2875 = vmatprep.subr.bf16.mxu1 %v3579_v6  ;;  %v3151_v25 = vld [vmem:[#allocation8 + $0x10] sm:$0xff]   ;;  %vm663_vm1 = vcmask 523264   ;;  %vm808_vm2 = vcmask 1043456   ;;  %vm758_vm3 = vcmask 64512  }
  0xa8   :  { %296 = vadd.xlane.f32.xlu1 %v292_v2  ;;  %v3147_v4 = vld [vmem:[#allocation8] sm:$0xff]   ;;  %v3149_v23 = vld [vmem:[#allocation8 + $0x8] sm:$0xff]   ;;  %v3825_v26 = vld [vmem:[#allocation7 + $0x10] sm:$0xff]   ;;  %2891 = vmatprep.mubr.msk.bf16.mxu1 %vm3580_vm0, %v3579_v6  ;;  %s4430_s16 = sld [smem:[#allocation26_spill]] }
  0xa9   :  { %v3798_v5 = vld [vmem:[#allocation7] sm:$0xff]   ;;  %2876 = vmatpush3.bf16.msra.mxu1 %v3147_v4  ;;  %v3820_v24 = vld [vmem:[#allocation7 + $0x8] sm:$0xff]   ;;  %v3153_v27 = vld [vmem:[#allocation8 + $0x18] sm:$0xff]  }
  0xaa   :  { %2855 = vmatprep.subr.bf16.mxu0 %v3798_v5  ;;  %2877 = vmatprep.subr.bf16.mxu1 %v3579_v6  ;;  %v3830_v28 = vld [vmem:[#allocation7 + $0x18] sm:$0xff]   ;;  %v3155_v29 = vld [vmem:[#allocation8 + $0x20] sm:$0xff]   ;;  %v3157_v31 = vld [vmem:[#allocation8 + $0x28] sm:$0xff]  }
  0xab   :  { %302 = vadd.xlane.f32.xlu0 %v295_v1  ;;  %2856 = vmatpush3.bf16.msra.mxu0 %v3798_v5  ;;  %v3835_v30 = vld [vmem:[#allocation7 + $0x20] sm:$0xff]   ;;  %v3837_v32 = vld [vmem:[#allocation7 + $0x28] sm:$0xff]   ;;  %v3159_v33 = vld [vmem:[#allocation8 + $0x30] sm:$0xff]  }
  0xac   :  { %300 = vadd.xlane.f32.xlu1 %v293_v3  ;;  %2857 = vmatprep.subr.bf16.mxu0 %v3820_v24  ;;  %v3845_v34 = vld [vmem:[#allocation7 + $0x30] sm:$0xff]   ;;  %v3161_v35 = vld [vmem:[#allocation8 + $0x38] sm:$0xff]   ;;  %v2602_v51 = vld [vmem:[%s4406_s10] ss:$0 sm:$0xff] }
  0xad   :  { %2878 = vmatpush3.bf16.msra.mxu1 %v3149_v23  ;;  %v3850_v36 = vld [vmem:[#allocation7 + $0x38] sm:$0xff]   ;;  %v2603_v56 = vld [vmem:[%s4407_s11] ss:$0 sm:$0xff] }
  0xae   :  { %2879 = vmatprep.subr.bf16.mxu1 %v3579_v6 }
  0xaf   :  { %2858 = vmatpush3.bf16.msra.mxu0 %v3820_v24 }
  0xb0   :  { %2859 = vmatprep.subr.bf16.mxu0 %v3825_v26 }
  0xb1   :  { %2880 = vmatpush3.bf16.msra.mxu1 %v3151_v25  ;;  %v2604_v25 = vld [vmem:[%s4399_s3] ss:$0 sm:$0xff] }
  0xb2   :  { %2881 = vmatprep.subr.bf16.mxu1 %v3579_v6 }
  0xb3   :  { %2860 = vmatpush3.bf16.msra.mxu0 %v3825_v26 }
  0xb4   :  { %2861 = vmatprep.subr.bf16.mxu0 %v3830_v28 }
  0xb5   :  { %2882 = vmatpush3.bf16.msra.mxu1 %v3153_v27 }
  0xb6   :  { %2883 = vmatprep.subr.bf16.mxu1 %v3579_v6 }
  0xb7   :  { %2862 = vmatpush3.bf16.msra.mxu0 %v3830_v28 }
  0xb8   :  { %2863 = vmatprep.subr.bf16.mxu0 %v3835_v30 }
  0xb9   :  { %2884 = vmatpush3.bf16.msra.mxu1 %v3155_v29 }
  0xba   :  { %2885 = vmatprep.subr.bf16.mxu1 %v3579_v6 }
  0xbb   :  { %2864 = vmatpush3.bf16.msra.mxu0 %v3835_v30 }
  0xbc   :  { %2865 = vmatprep.subr.bf16.mxu0 %v3837_v32 }
  0xbd   :  { %2886 = vmatpush3.bf16.msra.mxu1 %v3157_v31 }
  0xbe   :  { %2887 = vmatprep.subr.bf16.mxu1 %v3579_v6 }
  0xbf   :  { %2866 = vmatpush3.bf16.msra.mxu0 %v3837_v32 }
  0xc0   :  { %2867 = vmatprep.subr.bf16.mxu0 %v3845_v34 }
  0xc1   :  { %2888 = vmatpush3.bf16.msra.mxu1 %v3159_v33 }
  0xc2   :  { %2889 = vmatprep.subr.bf16.mxu1 %v3579_v6 }
  0xc3   :  { %2868 = vmatpush3.bf16.msra.mxu0 %v3845_v34 }
  0xc4   :  { %2869 = vmatprep.subr.bf16.mxu0 %v3850_v36 }
  0xc5   :  { %2890 = vmatpush3.bf16.msra.mxu1 %v3161_v35 }
  0xc6   :  { %2915 = vmatprep.subr.bf16.mxu1 %v3579_v6 }
  0xc7   :  { %2870 = vmatpush3.bf16.msra.mxu0 %v3850_v36 }
  0xc8   :  { %2895 = vmatprep.subr.bf16.mxu0 %v3579_v6 }
 0x134   :  { %v299_v7 = vpop.xlane.xlu0 %298 }
 0x135   :  { %v297_v8 = vpop.xlane.xlu1 %296  ;;  %v306_v9 = vmul.f32 0.0078125, %v299_v7  ;;  %v3163_v7 = vld [vmem:[#allocation10] sm:$0xff]  }
 0x136   :  { %v305_v10 = vmul.f32 0.0078125, %v297_v8 }
 0x137   :  { %v3804_v11 = vsub.f32 %v294_v0, %v306_v9  ;;  %v3164_v9 = vld [vmem:[#allocation10 + $0x8] sm:$0xff]  }
 0x138   :  { %v3806_v12 = vsub.f32 %v292_v2, %v305_v10  ;;  %v303_v13 = vpop.xlane.xlu0 %302  ;;  %v3165_v10 = vld [vmem:[#allocation10 + $0x10] sm:$0xff]  }
 0x139   :  { %v301_v14 = vpop.xlane.xlu1 %300  ;;  %v308_v15 = vmul.f32 0.0078125, %v303_v13  ;;  %v314_v16 = vmul.f32 %v3804_v11, %v3804_v11  ;;  %v3168_v13 = vld [vmem:[#allocation10 + $0x28] sm:$0xff]  }
 0x13a   :  { %v307_v17 = vmul.f32 0.0078125, %v301_v14  ;;  %v313_v20 = vmul.f32 %v3806_v12, %v3806_v12  ;;  %v3169_v14 = vld [vmem:[#allocation10 + $0x30] sm:$0xff]  }
 0x13b   :  { %v3810_v18 = vsub.f32 %v295_v1, %v308_v15  ;;  %319 = vadd.xlane.f32.xlu0 %v314_v16  ;;  %v3170_v15 = vld [vmem:[#allocation10 + $0x38] sm:$0xff]   ;;  %v2613_v16 = vld [vmem:[%s4401_s5] ss:$0 sm:$0xff] }
 0x13c   :  { %v3812_v19 = vsub.f32 %v293_v3, %v307_v17 }
 0x13d   :  { %v316_v21 = vmul.f32 %v3810_v18, %v3810_v18 }
 0x13e   :  { %v315_v22 = vmul.f32 %v3812_v19, %v3812_v19 }
 0x13f   :  { %323 = vadd.xlane.f32.xlu1 %v316_v21  ;;  %317 = vadd.xlane.f32.xlu0 %v313_v20 }
 0x143   :  { %321 = vadd.xlane.f32.xlu1 %v315_v22 }
 0x1c8   :  { %v320_v37 = vpop.xlane.xlu0 %319 }
 0x1c9   :  { %v326_v38 = vmul.f32 0.0078125, %v320_v37 }
 0x1cb   :  { %v330_v39 = vadd.f32 1e-05, %v326_v38 }
 0x1cc   :  { %v318_v40 = vpop.xlane.xlu0 %317  ;;  %v324_v41 = vpop.xlane.xlu1 %323 }
 0x1cd   :  { %3219 = vrsqrt.f32 %v330_v39  ;;  %v325_v42 = vmul.f32 0.0078125, %v318_v40  ;;  %v328_v43 = vmul.f32 0.0078125, %v324_v41 }
 0x1cf   :  { %v329_v44 = vadd.f32 1e-05, %v325_v42  ;;  %v332_v45 = vadd.f32 1e-05, %v328_v43 }
 0x1d0   :  { %v322_v46 = vpop.xlane.xlu1 %321 }
 0x1d1   :  { %3221 = vrsqrt.f32 %v329_v44  ;;  %v327_v47 = vmul.f32 0.0078125, %v322_v46 }
 0x1d2   :  { %3223 = vrsqrt.f32 %v332_v45  ;;  %v3910_v45 = vld [vmem:[%s4403_s7] ss:$0 sm:$0xff] }
 0x1d3   :  { %v331_v48 = vadd.f32 1e-05, %v327_v47 }
 0x1d5   :  { %3225 = vrsqrt.f32 %v331_v48 }
 0x1d7   :  { %v3220_v49 = vpop.eup %3219 }
 0x1d8   :  { %v338_v50 = vmul.f32 %v3220_v49, %v3804_v11  ;;  %v3166_v11 = vld [vmem:[#allocation10 + $0x18] sm:$0xff]  }
 0x1da   :  { %v348_v55 = vmul.f32 %v2602_v51, %v338_v50 }
 0x1db   :  { %v3222_v52 = vpop.eup %3221 }
 0x1dc   :  { %v3224_v53 = vpop.eup %3223  ;;  %v337_v54 = vmul.f32 %v3222_v52, %v3806_v12  ;;  %v358_v62 = vadd.f32 %v2603_v56, %v348_v55  ;;  %v3167_v12 = vld [vmem:[#allocation10 + $0x20] sm:$0xff]  }
 0x1dd   :  { %v340_v57 = vmul.f32 %v3224_v53, %v3810_v18 }
 0x1de   :  { %v347_v58 = vmul.f32 %v2602_v51, %v337_v54 }
 0x1df   :  { %v3226_v59 = vpop.eup %3225  ;;  %v350_v60 = vmul.f32 %v2602_v51, %v340_v57 }
 0x1e0   :  { %v357_v61 = vadd.f32 %v2603_v56, %v347_v58  ;;  %v339_v63 = vmul.f32 %v3226_v59, %v3812_v19 }
 0x1e1   :  { %v360_v0 = vadd.f32 %v2603_v56, %v350_v60 }
 0x1e2   :  { %v361_v1 = vpack.c.bf16 %v358_v62, %v357_v61  ;;  %v349_v2 = vmul.f32 %v2602_v51, %v339_v63 }
 0x1e3   :  { %v363_v3 = vpack.c.bf16 %v360_v0, %v358_v62 }
 0x1e4   :  { %2871 = vmatprep.mubr.bf16.mxu0 %v361_v1  ;;  %v359_v4 = vadd.f32 %v2603_v56, %v349_v2 }
 0x1e5   :  { %2892 = vmatmul.mubr.bf16.vlgmr.msra.gmra.mrb[0].mxu1 %v363_v3 }
 0x1e6   :  { %v362_v8 = vpack.c.bf16 %v360_v0, %v359_v4  ;;  %2917 = vmatprep.mubr.msk.bf16.mxu1 %vm3580_vm0, %v3579_v6 }
 0x1e8   :  { %2872 = vmatmul.mubr.bf16.vlgmr.msra.gmra.mrb[0].mxu0 %v362_v8 }
 0x1e9   :  { %2896 = vmatpush3.bf16.msra.mxu0 %v3163_v7  ;;  %2911 = vmatprep.mubr.msk.bf16.mxu0 %vm3580_vm0, %v3579_v6 }
 0x1ea   :  { %2897 = vmatprep.subr.bf16.mxu0 %v3579_v6 }
 0x1ed   :  { %2898 = vmatpush3.bf16.msra.mxu0 %v3164_v9 }
 0x1ee   :  { %2899 = vmatprep.subr.bf16.mxu0 %v3579_v6 }
 0x1f1   :  { %2900 = vmatpush3.bf16.msra.mxu0 %v3165_v10 }
 0x1f2   :  { %2901 = vmatprep.subr.bf16.mxu0 %v3579_v6 }
 0x1f5   :  { %2902 = vmatpush3.bf16.msra.mxu0 %v3166_v11 }
 0x1f6   :  { %2903 = vmatprep.subr.bf16.mxu0 %v3579_v6 }
 0x1f9   :  { %2904 = vmatpush3.bf16.msra.mxu0 %v3167_v12 }
 0x1fa   :  { %2905 = vmatprep.subr.bf16.mxu0 %v3579_v6 }
 0x1fd   :  { %2906 = vmatpush3.bf16.msra.mxu0 %v3168_v13 }
 0x1fe   :  { %2907 = vmatprep.subr.bf16.mxu0 %v3579_v6 }
 0x201   :  { %2908 = vmatpush3.bf16.msra.mxu0 %v3169_v14 }
 0x202   :  { %2909 = vmatprep.subr.bf16.mxu0 %v3579_v6 }
 0x205   :  { %2910 = vmatpush3.bf16.msra.mxu0 %v3170_v15 }
 0x208   :  { %2912 = vmatmul.mubr.bf16.vlgmr.msra.gmra.mrb[4].mxu0 %v363_v3 }
 0x2b8   :  { %v555_v17 = vpop.f32.mrb[0].mxu1 }
 0x2b9   :  { %v556_v18 = vadd.f32 %v2613_v16, %v555_v17  ;;  %v2893_v19 = vpop.f32.mrb[1].mxu1 }
 0x2ba   :  { %v558_v20 = vpop.f32.mrb[2].mxu1 }
 0x2bb   :  { %v3882_v21 = vpack.c.bf16 %v556_v18, %v556_v18  ;;  %v2894_v22 = vpop.f32.mrb[3].mxu1  ;;  %v2873_v23 = vpop.f32.mrb[0].mxu0  ;;  %v559_v31 = vadd.f32 %v2613_v16, %v558_v20 }
 0x2bc   :  { %v452_v27 = vpop.f32.mrb[1].mxu0  ;;  %v461_v35 = vadd.f32 %v2873_v23, %v2604_v25 }
 0x2bd   :  { %v668_v29 = vsel %vm663_vm1, %v3882_v21, 0  ;;  %v2874_v33 = vpop.f32.mrb[2].mxu0  ;;  %v453_v39 = vadd.f32 %v2604_v25, %v452_v27  ;;  %v3892_v42 = vpack.c.bf16 %v559_v31, %v559_v31 }
 0x2be   :  { %v464_v37 = vadd.f32 %v2874_v33, %v2604_v25  ;;  %2916 = vmatpush3.bf16.xpose.msra.mxu1 %v668_v29  ;;  %v455_v38 = vpop.f32.mrb[3].mxu0 }
 0x2bf   :  { %v456_v40 = vadd.f32 %v2604_v25, %v455_v38  ;;  %2921 = vmatprep.subr.bf16.mxu1 %v3579_v6  ;;  %v715_v44 = vsel %vm663_vm1, %v3892_v42, 0 }
 0x2c0   :  { %v3890_v41 = vpack.c.bf16 %v464_v37, %v461_v35 }
 0x2c1   :  { %v3894_v43 = vpack.c.bf16 %v456_v40, %v453_v39 }
 0x2c5   :  { %2918 = vmatmul.mubr.msk.bf16.vlgmr.msra.gmra.mrb[4].mxu1 %vm663_vm1, %v3894_v43 }
 0x2c6   :  { %2922 = vmatpush3.bf16.xpose.msra.mxu1 %v715_v44  ;;  %2923 = vmatprep.mubr.msk.bf16.mxu1 %vm3580_vm0, %v3579_v6 }
 0x2c7   :  { %2927 = vmatprep.subr.bf16.mxu1 %v3579_v6 }
 0x2cd   :  { %2924 = vmatmul.mubr.msk.bf16.vlgmr.msra.gmra.mrb[8].mxu1 %vm663_vm1, %v3890_v41 }
 0x2ce   :  { %2929 = vmatprep.mubr.msk.bf16.mxu1 %vm3580_vm0, %v3579_v6 }
 0x2db   :  { %v650_v46 = vpop.f32.mrb[4].mxu0 }
 0x2dc   :  { %v651_v47 = vadd.f32 %v3910_v45, %v650_v46  ;;  %v2913_v48 = vpop.f32.mrb[5].mxu0 }
 0x2dd   :  { %v653_v49 = vpop.f32.mrb[6].mxu0 }
 0x2de   :  { %v3913_v50 = vpack.c.bf16 %v651_v47, %v651_v47  ;;  %v2914_v51 = vpop.f32.mrb[7].mxu0  ;;  %v654_v31 = vadd.f32 %v3910_v45, %v653_v49 }
 0x2e0   :  { %v810_v52 = vsel %vm808_vm2, %v3913_v50, 0  ;;  %v3935_v38 = vpack.c.bf16 %v654_v31, %v654_v31 }
 0x2e1   :  { %2928 = vmatpush3.bf16.msra.mxu1 %v810_v52 }
 0x2e2   :  { %2933 = vmatprep.subr.bf16.mxu1 %v3579_v6 }
 0x398   :  { %v704_v53 = vpop.f32.mrb[4].mxu1 }
 0x399   :  { %v2919_v54 = vpop.f32.mrb[5].mxu1  ;;  %v759_v55 = vsel %vm758_vm3, %v704_v53, -inf }
 0x39a   :  { %760 = vmax.xlane.f32.xlu0 %v759_v55  ;;  %v707_v56 = vpop.f32.mrb[6].mxu1 }
 0x39b   :  { %v2920_v57 = vpop.f32.mrb[7].mxu1  ;;  %v762_v58 = vsel %vm758_vm3, %v707_v56, -inf }
 0x39c   :  { %763 = vmax.xlane.f32.xlu1 %v762_v58 }
 0x3a0   :  { %v751_v59 = vpop.f32.mrb[8].mxu1 }
 0x3a1   :  { %v2925_v60 = vpop.f32.mrb[9].mxu1  ;;  %v765_v61 = vsel %vm758_vm3, %v751_v59, -inf }
 0x3a2   :  { %766 = vmax.xlane.f32.xlu0 %v765_v61  ;;  %v754_v62 = vpop.f32.mrb[10].mxu1 }
 0x3a3   :  { %v2926_v63 = vpop.f32.mrb[11].mxu1  ;;  %v768_v0 = vsel %vm758_vm3, %v754_v62, -inf }
 0x3a4   :  { %769 = vmax.xlane.f32.xlu1 %v768_v0 }
 0x427   :  { %v761_v1 = vpop.xlane.xlu0 %760 }
 0x428   :  { %v771_v2 = vsub.f32 %v704_v53, %v761_v1 }
 0x429   :  { %v764_v3 = vpop.xlane.xlu1 %763 }
 0x42a   :  { %v775_v4 = vmul.f32 1.442695, %v771_v2  ;;  %v772_v7 = vsub.f32 %v707_v56, %v764_v3 }
 0x42c   :  { %3227 = vpow2.f32 %v775_v4  ;;  %v777_v8 = vmul.f32 1.442695, %v772_v7 }
 0x42e   :  { %3229 = vpow2.f32 %v777_v8 }
 0x42f   :  { %v767_v9 = vpop.xlane.xlu0 %766 }
 0x430   :  { %v773_v10 = vsub.f32 %v751_v59, %v767_v9 }
 0x431   :  { %v770_v11 = vpop.xlane.xlu1 %769 }
 0x432   :  { %v779_v12 = vmul.f32 1.442695, %v773_v10  ;;  %v774_v13 = vsub.f32 %v754_v62, %v770_v11 }
 0x434   :  { %3231 = vpow2.f32 %v779_v12  ;;  %v781_v14 = vmul.f32 1.442695, %v774_v13 }
 0x436   :  { %v3228_v15 = vpop.eup %3227  ;;  %3233 = vpow2.f32 %v781_v14 }
 0x437   :  { %v783_v16 = vsel %vm758_vm3, %v3228_v15, 0.0 }
 0x438   :  { %v3230_v17 = vpop.eup %3229  ;;  %784 = vadd.xlane.f32.xlu0 %v783_v16 }
 0x439   :  { %v786_v18 = vsel %vm758_vm3, %v3230_v17, 0.0 }
 0x43a   :  { %787 = vadd.xlane.f32.xlu1 %v786_v18 }
 0x43e   :  { %v3232_v19 = vpop.eup %3231 }
 0x43f   :  { %v789_v20 = vsel %vm758_vm3, %v3232_v19, 0.0 }
 0x440   :  { %v3234_v22 = vpop.eup %3233  ;;  %790 = vadd.xlane.f32.xlu0 %v789_v20 }
 0x441   :  { %v792_v23 = vsel %vm758_vm3, %v3234_v22, 0.0 }
 0x442   :  { %793 = vadd.xlane.f32.xlu1 %v792_v23 }
 0x453   :  { %901 = vrot.lane.b32.xlu1 %v3894_v43, %s3572_s0 }
 0x456   :  { %904 = vrot.lane.b32.xlu0 %v3882_v21, %s3572_s0 }
 0x457   :  { %957 = vrot.lane.b32.xlu1 %v3892_v42, %s3572_s0 }
 0x45b   :  { %954 = vrot.lane.b32.xlu1 %v3890_v41, %s3572_s0  ;;  %v857_v41 = vsel %vm808_vm2, %v3935_v38, 0 }
 0x4c5   :  { %v785_v25 = vpop.xlane.xlu0 %784 }
 0x4c6   :  { %3235 = vrcp.f32 %v785_v25 }
 0x4c7   :  { %v788_v27 = vpop.xlane.xlu1 %787 }
 0x4c8   :  { %3237 = vrcp.f32 %v788_v27 }
 0x4cd   :  { %v791_v29 = vpop.xlane.xlu0 %790 }
 0x4ce   :  { %3239 = vrcp.f32 %v791_v29 }
 0x4cf   :  { %v794_v33 = vpop.xlane.xlu1 %793 }
 0x4d0   :  { %v3236_v35 = vpop.eup %3235  ;;  %3241 = vrcp.f32 %v794_v33 }
 0x4d1   :  { %v799_v21 = vmul.f32 %v3236_v35, %v3228_v15  ;;  %v905_v46 = vpop.permute.xlu0 %904 }
 0x4d2   :  { %v3238_v37 = vpop.eup %3237  ;;  %v910_v49 = vsel %vm663_vm1, %v905_v46, 0 }
 0x4d3   :  { %v800_v39 = vmul.f32 %v3238_v37, %v3230_v17  ;;  %v902_v48 = vpop.permute.xlu1 %901 }
 0x4d5   :  { %v803_v40 = vpack.c.bf16 %v800_v39, %v799_v21 }
 0x4d7   :  { %2930 = vmatmul.mubr.msk.bf16.vlgmr.msra.gmra.mrb[12].mxu1 %vm758_vm3, %v803_v40  ;;  %v958_v51 = vpop.permute.xlu1 %957 }
 0x4d8   :  { %v3240_v42 = vpop.eup %3239  ;;  %2934 = vmatpush3.bf16.msra.mxu1 %v857_v41  ;;  %2935 = vmatprep.mubr.msk.bf16.mxu1 %vm3580_vm0, %v3579_v6  ;;  %v963_v52 = vsel %vm663_vm1, %v958_v51, 0 }
 0x4d9   :  { %2939 = vmatprep.subr.bf16.mxu1 %v3579_v6  ;;  %v801_v44 = vmul.f32 %v3240_v42, %v3232_v19 }
 0x4da   :  { %v3242_v43 = vpop.eup %3241 }
 0x4db   :  { %v802_v45 = vmul.f32 %v3242_v43, %v3234_v22  ;;  %v955_v53 = vpop.permute.xlu1 %954 }
 0x4dd   :  { %v804_v47 = vpack.c.bf16 %v802_v45, %v801_v44 }
 0x4df   :  { %2936 = vmatmul.mubr.msk.bf16.vlgmr.msra.gmra.mrb[16].mxu1 %vm758_vm3, %v804_v47 }
 0x4e0   :  { %2941 = vmatprep.mubr.msk.bf16.mxu1 %vm3580_vm0, %v3579_v6 }
 0x4e1   :  { %2940 = vmatpush3.bf16.xpose.msra.mxu1 %v910_v49 }
 0x4e2   :  { %2945 = vmatprep.subr.bf16.mxu1 %v3579_v6 }
 0x4e8   :  { %2942 = vmatmul.mubr.msk.bf16.vlgmr.msra.gmra.mrb[20].mxu1 %vm663_vm1, %v902_v48 }
 0x4e9   :  { %2946 = vmatpush3.bf16.xpose.msra.mxu1 %v963_v52  ;;  %2947 = vmatprep.mubr.msk.bf16.mxu1 %vm3580_vm0, %v3579_v6 }
 0x4ea   :  { %2951 = vmatprep.subr.bf16.mxu1 %v3579_v6 }
 0x4f0   :  { %2948 = vmatmul.mubr.msk.bf16.vlgmr.msra.gmra.mrb[24].mxu1 %vm663_vm1, %v955_v53 }
 0x4f1   :  { %2953 = vmatprep.mubr.msk.bf16.mxu1 %vm3580_vm0, %v3579_v6 }
 0x5aa   :  { %v3956_v54 = vpop.f32.mrb[12].mxu1 }
 0x5ab   :  { %v2931_v55 = vpop.f32.mrb[13].mxu1 }
 0x5ac   :  { %v3958_v56 = vpop.f32.mrb[14].mxu1 }
 0x5ad   :  { %v2932_v57 = vpop.f32.mrb[15].mxu1 }
 0x5b2   :  { %v3960_v58 = vpop.f32.mrb[16].mxu1 }
 0x5b3   :  { %v2937_v59 = vpop.f32.mrb[17].mxu1 }
 0x5b4   :  { %v3962_v60 = vpop.f32.mrb[18].mxu1 }
 0x5b5   :  { %v2938_v61 = vpop.f32.mrb[19].mxu1 }
 0x5b6   :  { %v3171_v61 = vld [vmem:[#allocation11] sm:$0xff]  }
 0x5b7   :  { %2963 = vmatprep.subr.bf16.mxu0 %v3171_v61 }
 0x5b8   :  { %2964 = vmatpush3.bf16.msra.mxu0 %v3171_v61 }
 0x5bb   :  { %v946_v62 = vpop.f32.mrb[20].mxu1 }
 0x5bc   :  { %v2943_v63 = vpop.f32.mrb[21].mxu1  ;;  %v1006_v0 = vsel %vm758_vm3, %v946_v62, -inf }
 0x5bd   :  { %1007 = vmax.xlane.f32.xlu0 %v1006_v0  ;;  %v949_v1 = vpop.f32.mrb[22].mxu1  ;;  %v3173_v63 = vld [vmem:[#allocation11 + $0x10] sm:$0xff]   ;;  %v3174_v0 = vld [vmem:[#allocation11 + $0x18] sm:$0xff]  }
 0x5be   :  { %v2944_v2 = vpop.f32.mrb[23].mxu1  ;;  %v1009_v3 = vsel %vm758_vm3, %v949_v1, -inf }
 0x5bf   :  { %1010 = vmax.xlane.f32.xlu1 %v1009_v3  ;;  %v3176_v2 = vld [vmem:[#allocation11 + $0x28] sm:$0xff]   ;;  %v3177_v3 = vld [vmem:[#allocation11 + $0x30] sm:$0xff]  }
 0x5c3   :  { %v999_v4 = vpop.f32.mrb[24].mxu1 }
 0x5c4   :  { %v2949_v7 = vpop.f32.mrb[25].mxu1  ;;  %v1012_v8 = vsel %vm758_vm3, %v999_v4, -inf }
 0x5c5   :  { %1013 = vmax.xlane.f32.xlu0 %v1012_v8  ;;  %v1002_v9 = vpop.f32.mrb[26].mxu1 }
 0x5c6   :  { %v2950_v10 = vpop.f32.mrb[27].mxu1  ;;  %v1015_v11 = vsel %vm758_vm3, %v1002_v9, -inf }
 0x5c9   :  { %1016 = vmax.xlane.f32.xlu0 %v1015_v11 }
 0x64a   :  { %v1008_v12 = vpop.xlane.xlu0 %1007 }
 0x64b   :  { %v1018_v13 = vsub.f32 %v946_v62, %v1008_v12  ;;  %v3172_v62 = vld [vmem:[#allocation11 + $0x8] sm:$0xff]  }
 0x64c   :  { %v1011_v14 = vpop.xlane.xlu1 %1010  ;;  %2965 = vmatprep.subr.bf16.mxu0 %v3172_v62 }
 0x64d   :  { %v1022_v15 = vmul.f32 1.442695, %v1018_v13  ;;  %v1019_v16 = vsub.f32 %v949_v1, %v1011_v14  ;;  %2966 = vmatpush3.bf16.msra.mxu0 %v3172_v62  ;;  %v3175_v1 = vld [vmem:[#allocation11 + $0x20] sm:$0xff]  }
 0x64e   :  { %2967 = vmatprep.subr.bf16.mxu0 %v3173_v63 }
 0x64f   :  { %3243 = vpow2.f32 %v1022_v15  ;;  %v1024_v17 = vmul.f32 1.442695, %v1019_v16 }
 0x651   :  { %3245 = vpow2.f32 %v1024_v17  ;;  %2968 = vmatpush3.bf16.msra.mxu0 %v3173_v63 }
 0x652   :  { %v1014_v18 = vpop.xlane.xlu0 %1013  ;;  %2969 = vmatprep.subr.bf16.mxu0 %v3174_v0 }
 0x653   :  { %v1020_v19 = vsub.f32 %v999_v4, %v1014_v18 }
 0x655   :  { %v1026_v20 = vmul.f32 1.442695, %v1020_v19  ;;  %2970 = vmatpush3.bf16.msra.mxu0 %v3174_v0 }
 0x656   :  { %v1017_v22 = vpop.xlane.xlu0 %1016  ;;  %2971 = vmatprep.subr.bf16.mxu0 %v3175_v1 }
 0x657   :  { %3247 = vpow2.f32 %v1026_v20  ;;  %v1021_v23 = vsub.f32 %v1002_v9, %v1017_v22  ;;  %v3178_v9 = vld [vmem:[#allocation11 + $0x38] sm:$0xff]  }
 0x659   :  { %v3244_v25 = vpop.eup %3243  ;;  %v1028_v27 = vmul.f32 1.442695, %v1021_v23  ;;  %2972 = vmatpush3.bf16.msra.mxu0 %v3175_v1 }
 0x65a   :  { %v1030_v29 = vsel %vm758_vm3, %v3244_v25, 0.0  ;;  %2973 = vmatprep.subr.bf16.mxu0 %v3176_v2 }
 0x65b   :  { %v3246_v31 = vpop.eup %3245  ;;  %3249 = vpow2.f32 %v1028_v27  ;;  %1031 = vadd.xlane.f32.xlu0 %v1030_v29 }
 0x65c   :  { %v1033_v33 = vsel %vm758_vm3, %v3246_v31, 0.0 }
 0x65d   :  { %1034 = vadd.xlane.f32.xlu1 %v1033_v33  ;;  %2974 = vmatpush3.bf16.msra.mxu0 %v3176_v2 }
 0x65e   :  { %2975 = vmatprep.subr.bf16.mxu0 %v3177_v3 }
 0x661   :  { %v3248_v35 = vpop.eup %3247  ;;  %2976 = vmatpush3.bf16.msra.mxu0 %v3177_v3 }
 0x662   :  { %v1036_v37 = vsel %vm758_vm3, %v3248_v35, 0.0  ;;  %2977 = vmatprep.subr.bf16.mxu0 %v3178_v9 }
 0x663   :  { %1037 = vadd.xlane.f32.xlu0 %v1036_v37 }
 0x665   :  { %v3250_v21 = vpop.eup %3249  ;;  %2978 = vmatpush3.bf16.msra.mxu0 %v3178_v9 }
 0x666   :  { %v1039_v39 = vsel %vm758_vm3, %v3250_v21, 0.0 }
 0x667   :  { %1040 = vadd.xlane.f32.xlu1 %v1039_v39 }
 0x678   :  { %1103 = vrot.lane.b32.xlu1 %v3935_v38, %s3572_s0 }
 0x679   :  { %1053 = vrot.lane.b32.xlu0 %v3913_v50, %s3572_s0 }
 0x6e8   :  { %v1032_v40 = vpop.xlane.xlu0 %1031 }
 0x6e9   :  { %3251 = vrcp.f32 %v1032_v40 }
 0x6ea   :  { %v1035_v41 = vpop.xlane.xlu1 %1034 }
 0x6eb   :  { %3253 = vrcp.f32 %v1035_v41 }
 0x6f0   :  { %v1038_v42 = vpop.xlane.xlu0 %1037 }
 0x6f1   :  { %3255 = vrcp.f32 %v1038_v42  ;;  %v3315_v42 = vld [vmem:[#allocation2] sm:$0xff] }
 0x6f3   :  { %v3252_v43 = vpop.eup %3251 }
 0x6f4   :  { %v1041_v44 = vpop.xlane.xlu1 %1040  ;;  %v1054_v45 = vpop.permute.xlu0 %1053  ;;  %v1046_v48 = vmul.f32 %v3252_v43, %v3244_v25 }
 0x6f5   :  { %v3254_v46 = vpop.eup %3253  ;;  %3257 = vrcp.f32 %v1041_v44  ;;  %v1059_v47 = vsel %vm808_vm2, %v1054_v45, 0 }
 0x6f6   :  { %v1047_v49 = vmul.f32 %v3254_v46, %v3246_v31  ;;  %2952 = vmatpush3.bf16.msra.mxu1 %v1059_v47 }
 0x6f7   :  { %2957 = vmatprep.subr.bf16.mxu1 %v3579_v6 }
 0x6f8   :  { %v1104_v38 = vpop.permute.xlu1 %1103  ;;  %v1050_v50 = vpack.c.bf16 %v1047_v49, %v1046_v48  ;;  %v3318_v48 = vld [vmem:[#allocation5 + $0x8] sm:$0xff] }
 0x6f9   :  { %v1109_v51 = vsel %vm808_vm2, %v1104_v38, 0  ;;  %v3179_v38 = vld [vmem:[#allocation13] ss:$8 sps:$4 sm:$0xff]  }
 0x6fa   :  { %2954 = vmatmul.mubr.msk.bf16.vlgmr.msra.gmra.mrb[28].mxu1 %vm758_vm3, %v1050_v50  ;;  %v4008_v50 = vld [vmem:[#allocation13 + $0x4] ss:$8 sps:$4 sm:$0xff]  }
 0x6fb   :  { %2958 = vmatpush3.bf16.msra.mxu1 %v1109_v51  ;;  %2959 = vmatprep.mubr.msk.bf16.mxu1 %vm3580_vm0, %v3579_v6  ;;  %v3256_v52 = vpop.eup %3255  ;;  %v3184_v51 = vld [vmem:[#allocation13 + $0x14] ss:$8 sps:$4 sm:$0xff]  }
 0x6fc   :  { %v1048_v55 = vmul.f32 %v3256_v52, %v3248_v35  ;;  %1438 = vmatprep.subr.bf16.mxu1 %v4008_v50  ;;  %v3182_v52 = vld [vmem:[#allocation13 + $0x10] ss:$8 sps:$4 sm:$0xff]  }
 0x6ff   :  { %v3258_v53 = vpop.eup %3257 }
 0x700   :  { %v1049_v57 = vmul.f32 %v3258_v53, %v3250_v21 }
 0x702   :  { %v1051_v59 = vpack.c.bf16 %v1049_v57, %v1048_v55 }
 0x704   :  { %2960 = vmatmul.mubr.msk.bf16.vlgmr.msra.gmra.mrb[32].mxu1 %vm758_vm3, %v1051_v59 }
 0x705   :  { %1439 = vmatpush1.bf16.msra.mxu1 %v3179_v38 }
 0x706   :  { %1440 = vmatprep.subr.bf16.mxu1 %v3184_v51 }
 0x709   :  { %1441 = vmatpush1.bf16.msra.mxu1 %v3182_v52 }
 0x7cd   :  { %v1095_v4 = vpop.f32.mrb[28].mxu1 }
 0x7ce   :  { %v2955_v7 = vpop.f32.mrb[29].mxu1 }
 0x7cf   :  { %v1098_v8 = vpop.f32.mrb[30].mxu1 }
 0x7d0   :  { %v3127_v10 = vpack.i.bf16 %v1098_v8, %v1095_v4  ;;  %v2956_v11 = vpop.f32.mrb[31].mxu1 }
 0x7d1   :  { %v4031_v11 = vld [vmem:[#allocation13 + $0x24] ss:$8 sps:$4 sm:$0xff]  }
 0x7d2   :  { %3128 = vrot.lane.b32.xlu1 %v3127_v10, %s3572_s0  ;;  %1442 = vmatprep.subr.bf16.mxu1 %v4031_v11 }
 0x7d7   :  { %v1145_v12 = vpop.f32.mrb[32].mxu1 }
 0x7d8   :  { %v2961_v13 = vpop.f32.mrb[33].mxu1 }
 0x7d9   :  { %v1148_v14 = vpop.f32.mrb[34].mxu1  ;;  %v4037_v13 = vld [vmem:[#allocation13 + $0x34] ss:$8 sps:$4 sm:$0xff]  }
 0x7da   :  { %v3132_v15 = vpack.i.bf16 %v1148_v14, %v1145_v12  ;;  %v2962_v16 = vpop.f32.mrb[35].mxu1  ;;  %v4033_v12 = vld [vmem:[#allocation13 + $0x20] ss:$8 sps:$4 sm:$0xff]   ;;  %v4039_v14 = vld [vmem:[#allocation13 + $0x30] ss:$8 sps:$4 sm:$0xff]  }
 0x7db   :  { %1443 = vmatpush1.bf16.msra.mxu1 %v4033_v12  ;;  %v4045_v16 = vld [vmem:[#allocation13 + $0x40] ss:$8 sps:$4 sm:$0xff]  }
 0x7dc   :  { %3133 = vrot.lane.b32.xlu1 %v3132_v15, %s3572_s0  ;;  %1444 = vmatprep.subr.bf16.mxu1 %v4037_v13  ;;  %v4043_v15 = vld [vmem:[#allocation13 + $0x44] ss:$8 sps:$4 sm:$0xff]  }
 0x7df   :  { %1445 = vmatpush1.bf16.msra.mxu1 %v4039_v14 }
 0x7e0   :  { %1446 = vmatprep.subr.bf16.mxu1 %v4043_v15 }
 0x7e3   :  { %1447 = vmatpush1.bf16.msra.mxu1 %v4045_v16 }
 0x844   :  { %v3129_v17 = vpop.permute.xlu1 %3128 }
 0x845   :  { %v3131_v18 = vunpack.i.h.bf16 %v3129_v17  ;;  %v3130_v19 = vunpack.i.l.bf16 %v3129_v17  ;;  %v4049_v17 = vld [vmem:[#allocation13 + $0x54] ss:$8 sps:$4 sm:$0xff]  }
 0x846   :  { %1448 = vmatprep.subr.bf16.mxu1 %v4049_v17 }
 0x847   :  { %v1168_v20 = vsel %vm663_vm1, %v3956_v54, %v3130_v19  ;;  %v1169_v22 = vsel %vm663_vm1, %v3958_v56, %v3131_v18  ;;  %v2639_v54 = vld [vmem:[%s4405_s9] ss:$0 sm:$0xff]  ;;  %v4051_v18 = vld [vmem:[#allocation13 + $0x50] ss:$8 sps:$4 sm:$0xff]   ;;  %v4055_v19 = vld [vmem:[#allocation13 + $0x64] ss:$8 sps:$4 sm:$0xff]  }
 0x848   :  { %v1172_v23 = vpack.c.bf16 %v1169_v22, %v1168_v20  ;;  %1449 = vmatpush1.bf16.msra.mxu1 %v4051_v18  ;;  %v4057_v20 = vld [vmem:[#allocation13 + $0x60] ss:$8 sps:$4 sm:$0xff]   ;;  %v4059_v22 = vld [vmem:[#allocation13 + $0x74] ss:$8 sps:$4 sm:$0xff]  }
 0x849   :  { %1450 = vmatprep.subr.bf16.mxu1 %v4055_v19 }
 0x84a   :  { %2979 = vmatprep.mubr.bf16.mxu0 %v1172_v23  ;;  %v4063_v23 = vld [vmem:[#allocation13 + $0x70] ss:$8 sps:$4 sm:$0xff]  }
 0x84c   :  { %1451 = vmatpush1.bf16.msra.mxu1 %v4057_v20 }
 0x84d   :  { %1452 = vmatprep.subr.bf16.mxu1 %v4059_v22 }
 0x84e   :  { %v3134_v25 = vpop.permute.xlu1 %3133 }
 0x84f   :  { %v3136_v27 = vunpack.i.h.bf16 %v3134_v25  ;;  %v3135_v29 = vunpack.i.l.bf16 %v3134_v25  ;;  %v3581_v25 = vmov 0  }
 0x850   :  { %1470 = vmatprep.mubr.bf16.mxu1 %v3581_v25  ;;  %1453 = vmatpush1.bf16.msra.mxu1 %v4063_v23 }
 0x851   :  { %v1171_v31 = vsel %vm663_vm1, %v3962_v60, %v3136_v27  ;;  %v1170_v33 = vsel %vm663_vm1, %v3960_v58, %v3135_v29  ;;  %v3316_v60 = vld [vmem:[#allocation5] sm:$0xff]  ;;  %v3317_v58 = vld [vmem:[#allocation2 + $0x8] sm:$0xff]  ;;  %2983 = vmatprep.subr.bf16.mxu1 %v3798_v5  ;;  %v4069_v27 = vld [vmem:[#allocation14 + $0x40] sm:$0xff]  }
 0x852   :  { %v1173_v35 = vpack.c.bf16 %v1171_v31, %v1170_v33  ;;  %v3204_v29 = vld [vmem:[#allocation14] sm:$0xff]   ;;  %v3205_v31 = vld [vmem:[#allocation14 + $0x48] sm:$0xff]   ;;  %2745 = vmatprep.subr.bf16.mxu0 %v4069_v27  ;;  %v4083_v5 = vld [vmem:[#allocation14 + $0x18] sm:$0xff]  }
 0x853   :  { %v4072_v33 = vld [vmem:[#allocation14 + $0x8] sm:$0xff]  }
 0x854   :  { %2980 = vmatmul.mubr.bf16.vlgmr.msra.gmra.mrb[8].mxu0 %v1173_v35  ;;  %v4074_v35 = vld [vmem:[#allocation14 + $0x50] sm:$0xff]  }
 0x855   :  { %2746 = vmatpush3.bf16.msra.mxu0 %v3204_v29 }
 0x856   :  { %2747 = vmatprep.subr.bf16.mxu0 %v3205_v31 }
 0x859   :  { %2748 = vmatpush3.bf16.msra.mxu0 %v4072_v33 }
 0x85a   :  { %2749 = vmatprep.subr.bf16.mxu0 %v4074_v35 }
 0x927   :  { %v2981_v37 = vpop.f32.mrb[8].mxu0 }
 0x928   :  { %v1262_v21 = vpop.f32.mrb[9].mxu0  ;;  %v1271_v41 = vadd.f32 %v2981_v37, %v2639_v54  ;;  %v4080_v37 = vld [vmem:[#allocation14 + $0x58] sm:$0xff]  }
 0x929   :  { %v1263_v56 = vadd.f32 %v2639_v54, %v1262_v21  ;;  %v2982_v39 = vpop.f32.mrb[10].mxu0  ;;  %v4086_v21 = vld [vmem:[#allocation14 + $0x60] sm:$0xff]  }
 0x92a   :  { %v1265_v40 = vpop.f32.mrb[11].mxu0  ;;  %v4001_v46 = vadd.f32 %v3317_v58, %v1271_v41  ;;  %v1274_v47 = vadd.f32 %v2982_v39, %v2639_v54  ;;  %v4092_v39 = vld [vmem:[#allocation14 + $0x68] sm:$0xff]  }
 0x92b   :  { %v3996_v43 = vadd.f32 %v3315_v42, %v1263_v56  ;;  %v1266_v44 = vadd.f32 %v2639_v54, %v1265_v40  ;;  %v4077_v54 = vld [vmem:[#allocation14 + $0x10] sm:$0xff]   ;;  %v4089_v56 = vld [vmem:[#allocation14 + $0x20] sm:$0xff]  }
 0x92c   :  { %v4005_v49 = vadd.f32 %v3318_v48, %v1274_v47  ;;  %2750 = vmatpush3.bf16.msra.mxu0 %v4077_v54 }
 0x92d   :  { %v3998_v45 = vadd.f32 %v3316_v60, %v1266_v44  ;;  %1281 = vadd.xlane.f32.xlu0 %v3996_v43  ;;  %2751 = vmatprep.subr.bf16.mxu0 %v4080_v37 }
 0x92f   :  { %1283 = vadd.xlane.f32.xlu1 %v3998_v45 }
 0x930   :  { %2752 = vmatpush3.bf16.msra.mxu0 %v4083_v5 }
 0x931   :  { %1285 = vadd.xlane.f32.xlu0 %v4001_v46  ;;  %2753 = vmatprep.subr.bf16.mxu0 %v4086_v21 }
 0x934   :  { %2754 = vmatpush3.bf16.msra.mxu0 %v4089_v56 }
 0x935   :  { %1287 = vadd.xlane.f32.xlu0 %v4005_v49  ;;  %2755 = vmatprep.subr.bf16.mxu0 %v4092_v39 }
 0x9ba   :  { %v1282_v53 = vpop.xlane.xlu0 %1281 }
 0x9bb   :  { %v1289_v55 = vmul.f32 0.0078125, %v1282_v53 }
 0x9bc   :  { %v1284_v57 = vpop.xlane.xlu1 %1283 }
 0x9bd   :  { %v4012_v59 = vsub.f32 %v3996_v43, %v1289_v55  ;;  %v1290_v61 = vmul.f32 0.0078125, %v1284_v57  ;;  %v2648_v57 = vld [vmem:[%s4408_s12] ss:$0 sm:$0xff] }
 0x9be   :  { %v1286_v62 = vpop.xlane.xlu0 %1285 }
 0x9bf   :  { %v4015_v63 = vsub.f32 %v3998_v45, %v1290_v61  ;;  %v1291_v0 = vmul.f32 0.0078125, %v1286_v62  ;;  %v1297_v1 = vmul.f32 %v4012_v59, %v4012_v59 }
 0x9c1   :  { %v4020_v2 = vsub.f32 %v4001_v46, %v1291_v0  ;;  %1301 = vadd.xlane.f32.xlu0 %v1297_v1  ;;  %v1298_v3 = vmul.f32 %v4015_v63, %v4015_v63 }
 0x9c2   :  { %v1288_v4 = vpop.xlane.xlu0 %1287 }
 0x9c3   :  { %v1292_v7 = vmul.f32 0.0078125, %v1288_v4  ;;  %1303 = vadd.xlane.f32.xlu1 %v1298_v3  ;;  %v1299_v8 = vmul.f32 %v4020_v2, %v4020_v2  ;;  %v2649_v4 = vld [vmem:[%s4409_s13] ss:$0 sm:$0xff] }
 0x9c5   :  { %v4027_v9 = vsub.f32 %v4005_v49, %v1292_v7  ;;  %1305 = vadd.xlane.f32.xlu0 %v1299_v8 }
 0x9c7   :  { %v1300_v10 = vmul.f32 %v4027_v9, %v4027_v9 }
 0x9c9   :  { %1307 = vadd.xlane.f32.xlu1 %v1300_v10 }
 0xa4e   :  { %v1302_v40 = vpop.xlane.xlu0 %1301 }
 0xa4f   :  { %v1309_v41 = vmul.f32 0.0078125, %v1302_v40 }
 0xa50   :  { %v1304_v42 = vpop.xlane.xlu1 %1303 }
 0xa51   :  { %v1313_v44 = vadd.f32 1e-05, %v1309_v41  ;;  %v1310_v60 = vmul.f32 0.0078125, %v1304_v42 }
 0xa52   :  { %v1306_v58 = vpop.xlane.xlu0 %1305 }
 0xa53   :  { %3259 = vrsqrt.f32 %v1313_v44  ;;  %v1314_v47 = vadd.f32 1e-05, %v1310_v60  ;;  %v1311_v48 = vmul.f32 0.0078125, %v1306_v58 }
 0xa55   :  { %3261 = vrsqrt.f32 %v1314_v47  ;;  %v1315_v38 = vadd.f32 1e-05, %v1311_v48 }
 0xa56   :  { %v1308_v51 = vpop.xlane.xlu1 %1307 }
 0xa57   :  { %3263 = vrsqrt.f32 %v1315_v38  ;;  %v1312_v52 = vmul.f32 0.0078125, %v1308_v51 }
 0xa59   :  { %v1316_v53 = vadd.f32 1e-05, %v1312_v52 }
 0xa5b   :  { %3265 = vrsqrt.f32 %v1316_v53 }
 0xa5d   :  { %v3260_v55 = vpop.eup %3259 }
 0xa5e   :  { %v1321_v61 = vmul.f32 %v3260_v55, %v4012_v59 }
 0xa5f   :  { %v3262_v62 = vpop.eup %3261 }
 0xa60   :  { %v1322_v0 = vmul.f32 %v3262_v62, %v4015_v63  ;;  %v1331_v1 = vmul.f32 %v2648_v57, %v1321_v61  ;;  %v3319_v63 = vld [vmem:[#allocation7] sm:$0xff]  }
 0xa61   :  { %v3264_v3 = vpop.eup %3263 }
 0xa62   :  { %v1332_v7 = vmul.f32 %v2648_v57, %v1322_v0  ;;  %v1341_v8 = vadd.f32 %v2649_v4, %v1331_v1  ;;  %v1323_v29 = vmul.f32 %v3264_v3, %v4020_v2 }
 0xa64   :  { %v1342_v10 = vadd.f32 %v2649_v4, %v1332_v7  ;;  %v1333_v59 = vmul.f32 %v2648_v57, %v1323_v29 }
 0xa65   :  { %v3266_v31 = vpop.eup %3265 }
 0xa66   :  { %v1345_v40 = vpack.c.bf16 %v1342_v10, %v1341_v8  ;;  %v1324_v41 = vmul.f32 %v3266_v31, %v4027_v9  ;;  %v1343_v60 = vadd.f32 %v2649_v4, %v1333_v59  ;;  %v286_v9 = vld [vmem:[%s4411_s15] sm:$0x3] }
 0xa68   :  { %1471 = vmatmul.mubr.bf16.vlgmr.msra.gmra.mrb[36].mxu1 %v1345_v40  ;;  %v1334_v42 = vmul.f32 %v2648_v57, %v1324_v41 }
 0xa69   :  { %1480 = vmatprep.mubr.bf16.mxu1 %v3581_v25  ;;  %2984 = vmatpush3.bf16.msra.mxu1 %v3319_v63 }
 0xa6a   :  { %v1344_v44 = vadd.f32 %v2649_v4, %v1334_v42  ;;  %2985 = vmatprep.subr.bf16.mxu1 %v3820_v24 }
 0xa6c   :  { %v1346_v58 = vpack.c.bf16 %v1344_v44, %v1343_v60  ;;  %v3320_v60 = vld [vmem:[#allocation8] sm:$0xff]  }
 0xa6d   :  { %2986 = vmatpush3.bf16.msra.mxu1 %v3820_v24  ;;  %v4122_v24 = vld [vmem:[#allocation14 + $0x28] sm:$0xff]  }
 0xa6e   :  { %2987 = vmatprep.subr.bf16.mxu1 %v3825_v26  ;;  %2756 = vmatpush3.bf16.msra.mxu0 %v4122_v24 }
 0xa70   :  { %1481 = vmatmul.mubr.bf16.gmra.mrb[40].mxu1 %v1346_v58 }
 0xa71   :  { %2988 = vmatpush3.bf16.msra.mxu1 %v3825_v26  ;;  %v4125_v26 = vld [vmem:[#allocation14 + $0x70] sm:$0xff]  }
 0xa72   :  { %2989 = vmatprep.subr.bf16.mxu1 %v3830_v28  ;;  %2757 = vmatprep.subr.bf16.mxu0 %v4125_v26 }
 0xa75   :  { %2990 = vmatpush3.bf16.msra.mxu1 %v3830_v28  ;;  %v4127_v28 = vld [vmem:[#allocation14 + $0x30] sm:$0xff]  }
 0xa76   :  { %2991 = vmatprep.subr.bf16.mxu1 %v3835_v30  ;;  %2758 = vmatpush3.bf16.msra.mxu0 %v4127_v28 }
 0xa79   :  { %2992 = vmatpush3.bf16.msra.mxu1 %v3835_v30  ;;  %v4131_v30 = vld [vmem:[#allocation14 + $0x78] sm:$0xff]  }
 0xa7a   :  { %2993 = vmatprep.subr.bf16.mxu1 %v3837_v32  ;;  %2759 = vmatprep.subr.bf16.mxu0 %v4131_v30 }
 0xa7d   :  { %2994 = vmatpush3.bf16.msra.mxu1 %v3837_v32  ;;  %v4133_v32 = vld [vmem:[#allocation14 + $0x38] sm:$0xff]  }
 0xa7e   :  { %2995 = vmatprep.subr.bf16.mxu1 %v3845_v34  ;;  %2760 = vmatpush3.bf16.msra.mxu0 %v4133_v32 }
 0xa7f   :  { %3003 = vmatprep.subr.bf16.mxu0 %v3579_v6 }
 0xa81   :  { %2996 = vmatpush3.bf16.msra.mxu1 %v3845_v34  ;;  %v1348_v34 = vlaneseq }
 0xa82   :  { %2997 = vmatprep.subr.bf16.mxu1 %v3850_v36 }
 0xa85   :  { %2998 = vmatpush3.bf16.msra.mxu1 %v3850_v36  ;;  %v1349_v36 = vshrl.u32 %v1348_v34, 7 }
 0xa86   :  { %3023 = vmatprep.subr.bf16.mxu1 %v3579_v6 }
 0xa87   :  { %v1350_v2 = vsub.s32 0, %v1349_v36  ;;  %v1354_v47 = vsub.s32 1, %v1349_v36 }
 0xa89   :  { %v4141_v48 = vrot.slane %v286_v9, %v1350_v2  ;;  %v4143_v38 = vrot.slane %v286_v9, %v1354_v47 }
 0xb3b   :  { %v1472_v51 = vpop.f32.mrb[36].mxu1 }
 0xb3c   :  { %v1473_v52 = vadd.f32 %v1472_v51, %v4141_v48  ;;  %v1474_v53 = vpop.f32.mrb[37].mxu1  ;;  %v3321_v51 = vld [vmem:[#allocation8 + $0x8] sm:$0xff]  }
 0xb3d   :  { %v1475_v55 = vadd.f32 %v1474_v53, %v4143_v38  ;;  %v1476_v57 = vpop.f32.mrb[38].mxu1  ;;  %v3323_v53 = vld [vmem:[#allocation8 + $0x18] sm:$0xff]  }
 0xb3e   :  { %v1477_v61 = vadd.f32 %v1476_v57, %v4141_v48  ;;  %v1478_v62 = vpop.f32.mrb[39].mxu1  ;;  %v1491_v1 = vmax.f32 %v1473_v52, 0.0  ;;  %v3322_v52 = vld [vmem:[#allocation8 + $0x10] sm:$0xff]   ;;  %v3325_v57 = vld [vmem:[#allocation8 + $0x28] sm:$0xff]  }
 0xb3f   :  { %v1479_v0 = vadd.f32 %v1478_v62, %v4143_v38  ;;  %v1492_v4 = vmax.f32 %v1475_v55, 0.0  ;;  %v3324_v55 = vld [vmem:[#allocation8 + $0x20] sm:$0xff]   ;;  %v3327_v62 = vld [vmem:[#allocation8 + $0x38] sm:$0xff]  }
 0xb40   :  { %v1493_v3 = vmax.f32 %v1477_v61, 0.0  ;;  %v3326_v61 = vld [vmem:[#allocation8 + $0x30] sm:$0xff]  }
 0xb41   :  { %v1494_v7 = vmax.f32 %v1479_v0, 0.0 }
 0xb42   :  { %v1499_v8 = vpack.c.bf16 %v1493_v3, %v1491_v1 }
 0xb43   :  { %v1500_v10 = vpack.c.bf16 %v1494_v7, %v1492_v4  ;;  %v1482_v29 = vpop.f32.mrb[40].mxu1 }
 0xb44   :  { %v1483_v31 = vadd.f32 %v1482_v29, %v4141_v48  ;;  %v1484_v40 = vpop.f32.mrb[41].mxu1 }
 0xb45   :  { %v1485_v41 = vadd.f32 %v1484_v40, %v4143_v38  ;;  %v1486_v59 = vpop.f32.mrb[42].mxu1  ;;  %1637 = vmatprep.mubr.bf16.mxu0 %v1500_v10  ;;  %v4166_v10 = vld [vmem:[%s4430_s16] ss:$0 sm:$0xff] }
 0xb46   :  { %v1487_v42 = vadd.f32 %v1486_v59, %v4141_v48  ;;  %v1488_v63 = vpop.f32.mrb[43].mxu1  ;;  %1638 = vmatmul.mubr.bf16.vlgmr.msra.gmra.mrb[12].mxu0 %v1499_v8  ;;  %v1495_v58 = vmax.f32 %v1483_v31, 0.0 }
 0xb47   :  { %v1489_v44 = vadd.f32 %v1488_v63, %v4143_v38  ;;  %3004 = vmatpush3.bf16.msra.mxu0 %v3320_v60  ;;  %v1496_v36 = vmax.f32 %v1485_v41, 0.0 }
 0xb48   :  { %v1497_v34 = vmax.f32 %v1487_v42, 0.0  ;;  %3005 = vmatprep.subr.bf16.mxu0 %v3579_v6 }
 0xb49   :  { %v1498_v2 = vmax.f32 %v1489_v44, 0.0 }
 0xb4a   :  { %v1501_v9 = vpack.c.bf16 %v1497_v34, %v1495_v58 }
 0xb4b   :  { %v1502_v47 = vpack.c.bf16 %v1498_v2, %v1496_v36  ;;  %3006 = vmatpush3.bf16.msra.mxu0 %v3321_v51 }
 0xb4c   :  { %3007 = vmatprep.subr.bf16.mxu0 %v3579_v6 }
 0xb4d   :  { %1645 = vmatprep.mubr.bf16.mxu0 %v1502_v47 }
 0xb4e   :  { %1646 = vmatmul.mubr.bf16.gmra.mrb[16].mxu0 %v1501_v9 }
 0xb4f   :  { %3008 = vmatpush3.bf16.msra.mxu0 %v3322_v52  ;;  %3019 = vmatprep.mubr.msk.bf16.mxu0 %vm3580_vm0, %v3579_v6 }
 0xb50   :  { %3009 = vmatprep.subr.bf16.mxu0 %v3579_v6 }
 0xb53   :  { %3010 = vmatpush3.bf16.msra.mxu0 %v3323_v53 }
 0xb54   :  { %3011 = vmatprep.subr.bf16.mxu0 %v3579_v6 }
 0xb57   :  { %3012 = vmatpush3.bf16.msra.mxu0 %v3324_v55 }
 0xb58   :  { %3013 = vmatprep.subr.bf16.mxu0 %v3579_v6 }
 0xb5b   :  { %3014 = vmatpush3.bf16.msra.mxu0 %v3325_v57 }
 0xb5c   :  { %3015 = vmatprep.subr.bf16.mxu0 %v3579_v6 }
 0xb5f   :  { %3016 = vmatpush3.bf16.msra.mxu0 %v3326_v61 }
 0xb60   :  { %3017 = vmatprep.subr.bf16.mxu0 %v3579_v6 }
 0xb63   :  { %3018 = vmatpush3.bf16.msra.mxu0 %v3327_v62 }
 0xb64   :  { %3043 = vmatprep.subr.bf16.mxu0 %v3579_v6 }
 0xc19   :  { %v2761_v0 = vpop.f32.mrb[12].mxu0 }
 0xc1a   :  { %v2762_v1 = vpop.f32.mrb[13].mxu0 }
 0xc1b   :  { %v2763_v3 = vadd.f32 %v2762_v1, %v2761_v0  ;;  %v2764_v4 = vpop.f32.mrb[14].mxu0 }
 0xc1c   :  { %v2765_v7 = vpop.f32.mrb[15].mxu0 }
 0xc1d   :  { %v2766_v8 = vadd.f32 %v2765_v7, %v2764_v4  ;;  %v1640_v31 = vadd.f32 %v2763_v3, %v4166_v10 }
 0xc1f   :  { %v1643_v29 = vadd.f32 %v2766_v8, %v4166_v10  ;;  %v4175_v58 = vadd.f32 %v1640_v31, %v3996_v43 }
 0xc21   :  { %v2767_v40 = vpop.f32.mrb[16].mxu0  ;;  %v4171_v41 = vadd.f32 %v1643_v29, %v3998_v45 }
 0xc22   :  { %v2768_v59 = vpop.f32.mrb[17].mxu0 }
 0xc23   :  { %v2769_v42 = vadd.f32 %v2768_v59, %v2767_v40  ;;  %v2770_v63 = vpop.f32.mrb[18].mxu0  ;;  %1660 = vadd.xlane.f32.xlu0 %v4171_v41 }
 0xc24   :  { %v2771_v44 = vpop.f32.mrb[19].mxu0 }
 0xc25   :  { %v2772_v60 = vadd.f32 %v2771_v44, %v2770_v63  ;;  %v1648_v36 = vadd.f32 %v2769_v42, %v4166_v10 }
 0xc27   :  { %v1651_v34 = vadd.f32 %v2772_v60, %v4166_v10  ;;  %1658 = vadd.xlane.f32.xlu0 %v4175_v58  ;;  %v4185_v45 = vadd.f32 %v1648_v36, %v4001_v46 }
 0xc29   :  { %v4181_v2 = vadd.f32 %v1651_v34, %v4005_v49 }
 0xc2b   :  { %1664 = vadd.xlane.f32.xlu1 %v4181_v2 }
 0xc2f   :  { %1662 = vadd.xlane.f32.xlu1 %v4185_v45 }
 0xcb0   :  { %v1661_v9 = vpop.xlane.xlu0 %1660 }
 0xcb1   :  { %v1667_v47 = vmul.f32 0.0078125, %v1661_v9 }
 0xcb3   :  { %v1671_v43 = vsub.f32 %v4171_v41, %v1667_v47 }
 0xcb4   :  { %v1659_v51 = vpop.xlane.xlu0 %1658 }
 0xcb5   :  { %v1666_v52 = vmul.f32 0.0078125, %v1659_v51  ;;  %v1675_v53 = vmul.f32 %v1671_v43, %v1671_v43 }
 0xcb7   :  { %v1670_v55 = vsub.f32 %v4175_v58, %v1666_v52  ;;  %1680 = vadd.xlane.f32.xlu0 %v1675_v53  ;;  %v3328_v53 = vld [vmem:[%s4406_s10] ss:$0 sm:$0xff] }
 0xcb8   :  { %v1665_v57 = vpop.xlane.xlu1 %1664 }
 0xcb9   :  { %v1669_v49 = vmul.f32 0.0078125, %v1665_v57  ;;  %v1674_v61 = vmul.f32 %v1670_v55, %v1670_v55 }
 0xcbb   :  { %v1673_v62 = vsub.f32 %v4181_v2, %v1669_v49  ;;  %1678 = vadd.xlane.f32.xlu0 %v1674_v61 }
 0xcbc   :  { %v1663_v46 = vpop.xlane.xlu1 %1662 }
 0xcbd   :  { %v1668_v0 = vmul.f32 0.0078125, %v1663_v46  ;;  %v1677_v1 = vmul.f32 %v1673_v62, %v1673_v62 }
 0xcbf   :  { %v1672_v3 = vsub.f32 %v4185_v45, %v1668_v0  ;;  %1684 = vadd.xlane.f32.xlu1 %v1677_v1  ;;  %v3329_v0 = vld [vmem:[%s4407_s11] ss:$0 sm:$0xff] }
 0xcc1   :  { %v1676_v4 = vmul.f32 %v1672_v3, %v1672_v3 }
 0xcc3   :  { %1682 = vadd.xlane.f32.xlu1 %v1676_v4 }
 0xd44   :  { %v1681_v7 = vpop.xlane.xlu0 %1680 }
 0xd45   :  { %v1687_v8 = vmul.f32 0.0078125, %v1681_v7 }
 0xd47   :  { %v1691_v29 = vadd.f32 1e-05, %v1687_v8 }
 0xd48   :  { %v1679_v31 = vpop.xlane.xlu0 %1678 }
 0xd49   :  { %3267 = vrsqrt.f32 %v1691_v29  ;;  %v1686_v40 = vmul.f32 0.0078125, %v1679_v31 }
 0xd4b   :  { %v1690_v59 = vadd.f32 1e-05, %v1686_v40 }
 0xd4c   :  { %v1685_v42 = vpop.xlane.xlu1 %1684 }
 0xd4d   :  { %3269 = vrsqrt.f32 %v1690_v59  ;;  %v1689_v63 = vmul.f32 0.0078125, %v1685_v42  ;;  %v3330_v42 = vld [vmem:[#allocation10] sm:$0xff]  }
 0xd4f   :  { %v1693_v44 = vadd.f32 1e-05, %v1689_v63  ;;  %v3331_v63 = vld [vmem:[#allocation10 + $0x8] sm:$0xff]  }
 0xd50   :  { %v1683_v60 = vpop.xlane.xlu1 %1682 }
 0xd51   :  { %3271 = vrsqrt.f32 %v1693_v44  ;;  %v1688_v34 = vmul.f32 0.0078125, %v1683_v60  ;;  %v3333_v44 = vld [vmem:[#allocation10 + $0x18] sm:$0xff]   ;;  %v3334_v60 = vld [vmem:[#allocation10 + $0x20] sm:$0xff]  }
 0xd53   :  { %v3268_v36 = vpop.eup %3267  ;;  %v1692_v9 = vadd.f32 1e-05, %v1688_v34  ;;  %v3335_v34 = vld [vmem:[#allocation10 + $0x28] sm:$0xff]  }
 0xd54   :  { %v1699_v47 = vmul.f32 %v3268_v36, %v1671_v43  ;;  %v3336_v36 = vld [vmem:[#allocation10 + $0x30] sm:$0xff]  }
 0xd55   :  { %3273 = vrsqrt.f32 %v1692_v9  ;;  %v3337_v9 = vld [vmem:[#allocation10 + $0x38] sm:$0xff]  }
 0xd56   :  { %v1703_v57 = vmul.f32 %v3328_v53, %v1699_v47 }
 0xd57   :  { %v3270_v51 = vpop.eup %3269 }
 0xd58   :  { %v1698_v52 = vmul.f32 %v3270_v51, %v1670_v55  ;;  %v1707_v4 = vadd.f32 %v3329_v0, %v1703_v57  ;;  %v3338_v51 = vld [vmem:[%s4401_s5] ss:$0 sm:$0xff] }
 0xd5a   :  { %v1702_v49 = vmul.f32 %v3328_v53, %v1698_v52 }
 0xd5b   :  { %v3272_v61 = vpop.eup %3271 }
 0xd5c   :  { %v1701_v46 = vmul.f32 %v3272_v61, %v1673_v62  ;;  %v1706_v1 = vadd.f32 %v3329_v0, %v1702_v49 }
 0xd5e   :  { %v1705_v7 = vmul.f32 %v3328_v53, %v1701_v46  ;;  %v1710_v8 = vpack.c.bf16 %v1707_v4, %v1706_v1 }
 0xd5f   :  { %v3274_v43 = vpop.eup %3273 }
 0xd60   :  { %v1700_v29 = vmul.f32 %v3274_v43, %v1672_v3  ;;  %v1709_v31 = vadd.f32 %v3329_v0, %v1705_v7  ;;  %2999 = vmatprep.mubr.bf16.mxu1 %v1710_v8  ;;  %v3332_v3 = vld [vmem:[#allocation10 + $0x10] sm:$0xff]  }
 0xd62   :  { %v1704_v55 = vmul.f32 %v3328_v53, %v1700_v29  ;;  %v1712_v40 = vpack.c.bf16 %v1709_v31, %v1707_v4  ;;  %v3339_v29 = vld [vmem:[%s4399_s3] ss:$0 sm:$0xff] }
 0xd64   :  { %3020 = vmatmul.mubr.bf16.vlgmr.msra.gmra.mrb[20].mxu0 %v1712_v40  ;;  %v1708_v59 = vadd.f32 %v3329_v0, %v1704_v55 }
 0xd65   :  { %3045 = vmatprep.mubr.msk.bf16.mxu0 %vm3580_vm0, %v3579_v6 }
 0xd66   :  { %v1711_v62 = vpack.c.bf16 %v1709_v31, %v1708_v59 }
 0xd68   :  { %3000 = vmatmul.mubr.bf16.vlgmr.msra.gmra.mrb[44].mxu1 %v1711_v62 }
 0xd69   :  { %3024 = vmatpush3.bf16.msra.mxu1 %v3330_v42  ;;  %3039 = vmatprep.mubr.msk.bf16.mxu1 %vm3580_vm0, %v3579_v6 }
 0xd6a   :  { %3025 = vmatprep.subr.bf16.mxu1 %v3579_v6 }
 0xd6d   :  { %3026 = vmatpush3.bf16.msra.mxu1 %v3331_v63 }
 0xd6e   :  { %3027 = vmatprep.subr.bf16.mxu1 %v3579_v6 }
 0xd71   :  { %3028 = vmatpush3.bf16.msra.mxu1 %v3332_v3 }
 0xd72   :  { %3029 = vmatprep.subr.bf16.mxu1 %v3579_v6 }
 0xd75   :  { %3030 = vmatpush3.bf16.msra.mxu1 %v3333_v44  ;;  %v3340_v44 = vld [vmem:[%s4403_s7] ss:$0 sm:$0xff] }
 0xd76   :  { %3031 = vmatprep.subr.bf16.mxu1 %v3579_v6 }
 0xd79   :  { %3032 = vmatpush3.bf16.msra.mxu1 %v3334_v60 }
 0xd7a   :  { %3033 = vmatprep.subr.bf16.mxu1 %v3579_v6 }
 0xd7d   :  { %3034 = vmatpush3.bf16.msra.mxu1 %v3335_v34 }
 0xd7e   :  { %3035 = vmatprep.subr.bf16.mxu1 %v3579_v6 }
 0xd81   :  { %3036 = vmatpush3.bf16.msra.mxu1 %v3336_v36 }
 0xd82   :  { %3037 = vmatprep.subr.bf16.mxu1 %v3579_v6 }
 0xd85   :  { %3038 = vmatpush3.bf16.msra.mxu1 %v3337_v9 }
 0xd86   :  { %3049 = vmatprep.subr.bf16.mxu1 %v3579_v6 }
 0xd88   :  { %3040 = vmatmul.mubr.bf16.vlgmr.msra.gmra.mrb[48].mxu1 %v1712_v40 }
 0xd89   :  { %3051 = vmatprep.mubr.msk.bf16.mxu1 %vm3580_vm0, %v3579_v6 }
 0xe37   :  { %v1796_v47 = vpop.f32.mrb[20].mxu0 }
 0xe38   :  { %v1797_v52 = vadd.f32 %v3338_v51, %v1796_v47  ;;  %v3021_v53 = vpop.f32.mrb[21].mxu0 }
 0xe39   :  { %v1799_v57 = vpop.f32.mrb[22].mxu0 }
 0xe3a   :  { %v4215_v49 = vpack.c.bf16 %v1797_v52, %v1797_v52  ;;  %v1800_v61 = vadd.f32 %v3338_v51, %v1799_v57  ;;  %v3022_v46 = vpop.f32.mrb[23].mxu0 }
 0xe3b   :  { %v3001_v0 = vpop.f32.mrb[44].mxu1 }
 0xe3c   :  { %v1854_v1 = vsel %vm663_vm1, %v4215_v49, 0  ;;  %v4219_v4 = vpack.c.bf16 %v1800_v61, %v1800_v61  ;;  %v1747_v7 = vpop.f32.mrb[45].mxu1  ;;  %v1756_v31 = vadd.f32 %v3339_v29, %v3001_v0 }
 0xe3d   :  { %v3002_v8 = vpop.f32.mrb[46].mxu1  ;;  %3044 = vmatpush3.bf16.xpose.msra.mxu0 %v1854_v1  ;;  %v1748_v59 = vadd.f32 %v3339_v29, %v1747_v7 }
 0xe3e   :  { %v1901_v43 = vsel %vm663_vm1, %v4219_v4, 0  ;;  %v1759_v55 = vadd.f32 %v3339_v29, %v3002_v8  ;;  %v1750_v40 = vpop.f32.mrb[47].mxu1  ;;  %3055 = vmatprep.subr.bf16.mxu0 %v3579_v6 }
 0xe3f   :  { %v1751_v62 = vadd.f32 %v3339_v29, %v1750_v40  ;;  %3050 = vmatpush3.bf16.xpose.msra.mxu1 %v1901_v43 }
 0xe40   :  { %v4227_v42 = vpack.c.bf16 %v1759_v55, %v1756_v31  ;;  %3061 = vmatprep.subr.bf16.mxu1 %v3579_v6 }
 0xe41   :  { %v4230_v63 = vpack.c.bf16 %v1751_v62, %v1748_v59 }
 0xe44   :  { %3046 = vmatmul.mubr.msk.bf16.vlgmr.msra.gmra.mrb[24].mxu0 %vm663_vm1, %v4230_v63 }
 0xe45   :  { %3057 = vmatprep.mubr.msk.bf16.mxu0 %vm3580_vm0, %v3579_v6 }
 0xe46   :  { %3052 = vmatmul.mubr.msk.bf16.vlgmr.msra.gmra.mrb[52].mxu1 %vm663_vm1, %v4227_v42 }
 0xe47   :  { %3063 = vmatprep.mubr.msk.bf16.mxu1 %vm3580_vm0, %v3579_v6 }
 0xe5b   :  { %v1837_v3 = vpop.f32.mrb[48].mxu1 }
 0xe5c   :  { %v1838_v60 = vadd.f32 %v3340_v44, %v1837_v3  ;;  %v3041_v34 = vpop.f32.mrb[49].mxu1 }
 0xe5d   :  { %v1840_v36 = vpop.f32.mrb[50].mxu1 }
 0xe5e   :  { %v4243_v9 = vpack.c.bf16 %v1838_v60, %v1838_v60  ;;  %v1841_v47 = vadd.f32 %v3340_v44, %v1840_v36  ;;  %v3042_v51 = vpop.f32.mrb[51].mxu1 }
 0xe60   :  { %v1994_v52 = vsel %vm808_vm2, %v4243_v9, 0  ;;  %v4247_v53 = vpack.c.bf16 %v1841_v47, %v1841_v47 }
 0xe61   :  { %3056 = vmatpush3.bf16.msra.mxu0 %v1994_v52 }
 0xe62   :  { %v2041_v57 = vsel %vm808_vm2, %v4247_v53, 0  ;;  %3067 = vmatprep.subr.bf16.mxu0 %v3579_v6 }
 0xe63   :  { %3062 = vmatpush3.bf16.msra.mxu1 %v2041_v57 }
 0xe64   :  { %3073 = vmatprep.subr.bf16.mxu1 %v3579_v6 }
 0xf17   :  { %v1890_v61 = vpop.f32.mrb[24].mxu0 }
 0xf18   :  { %v3047_v46 = vpop.f32.mrb[25].mxu0  ;;  %v1944_v0 = vsel %vm758_vm3, %v1890_v61, -inf }
 0xf19   :  { %v1937_v1 = vpop.f32.mrb[52].mxu1  ;;  %1945 = vmax.xlane.f32.xlu0 %v1944_v0  ;;  %v1893_v7 = vpop.f32.mrb[26].mxu0 }
 0xf1a   :  { %v3048_v8 = vpop.f32.mrb[27].mxu0  ;;  %v3053_v43 = vpop.f32.mrb[53].mxu1  ;;  %v1947_v29 = vsel %vm758_vm3, %v1893_v7, -inf  ;;  %v1950_v40 = vsel %vm758_vm3, %v1937_v1, -inf }
 0xf1b   :  { %v1940_v31 = vpop.f32.mrb[54].mxu1  ;;  %1948 = vmax.xlane.f32.xlu1 %v1947_v29 }
 0xf1c   :  { %v3054_v55 = vpop.f32.mrb[55].mxu1  ;;  %v1953_v59 = vsel %vm758_vm3, %v1940_v31, -inf }
 0xf1d   :  { %1951 = vmax.xlane.f32.xlu0 %v1950_v40 }
 0xf1f   :  { %1954 = vmax.xlane.f32.xlu1 %v1953_v59 }
 0xfa6   :  { %v1946_v62 = vpop.xlane.xlu0 %1945 }
 0xfa7   :  { %v1956_v3 = vsub.f32 %v1890_v61, %v1946_v62 }
 0xfa8   :  { %v1949_v44 = vpop.xlane.xlu1 %1948 }
 0xfa9   :  { %v1960_v60 = vmul.f32 1.442695, %v1956_v3  ;;  %v1957_v34 = vsub.f32 %v1893_v7, %v1949_v44 }
 0xfaa   :  { %v1952_v36 = vpop.xlane.xlu0 %1951 }
 0xfab   :  { %3275 = vpow2.f32 %v1960_v60  ;;  %v1962_v47 = vmul.f32 1.442695, %v1957_v34  ;;  %v1958_v51 = vsub.f32 %v1937_v1, %v1952_v36 }
 0xfac   :  { %v1955_v1 = vpop.xlane.xlu1 %1954 }
 0xfad   :  { %3277 = vpow2.f32 %v1962_v47  ;;  %v1964_v52 = vmul.f32 1.442695, %v1958_v51  ;;  %v1959_v7 = vsub.f32 %v1940_v31, %v1955_v1 }
 0xfaf   :  { %3279 = vpow2.f32 %v1964_v52  ;;  %v1966_v29 = vmul.f32 1.442695, %v1959_v7 }
 0xfb1   :  { %3281 = vpow2.f32 %v1966_v29 }
 0xfb5   :  { %v3276_v57 = vpop.eup %3275 }
 0xfb6   :  { %v1968_v46 = vsel %vm758_vm3, %v3276_v57, 0.0 }
 0xfb7   :  { %v3278_v0 = vpop.eup %3277  ;;  %1969 = vadd.xlane.f32.xlu0 %v1968_v46 }
 0xfb8   :  { %v1971_v8 = vsel %vm758_vm3, %v3278_v0, 0.0 }
 0xfb9   :  { %v3280_v43 = vpop.eup %3279  ;;  %1972 = vadd.xlane.f32.xlu1 %v1971_v8 }
 0xfba   :  { %v1974_v61 = vsel %vm758_vm3, %v3280_v43, 0.0 }
 0xfbb   :  { %1975 = vadd.xlane.f32.xlu0 %v1974_v61  ;;  %v3282_v55 = vpop.eup %3281 }
 0xfbc   :  { %v1977_v40 = vsel %vm758_vm3, %v3282_v55, 0.0 }
 0xfca   :  { %2141 = vrot.lane.b32.xlu1 %v4219_v4, %s3572_s0 }
 0xfd1   :  { %2088 = vrot.lane.b32.xlu0 %v4215_v49, %s3572_s0 }
 0xfee   :  { %1978 = vadd.xlane.f32.xlu1 %v1977_v40 }
 0xfff   :  { %2085 = vrot.lane.b32.xlu1 %v4230_v63, %s3572_s0 }
0x1003   :  { %2138 = vrot.lane.b32.xlu1 %v4227_v42, %s3572_s0 }
0x1044   :  { %v1970_v59 = vpop.xlane.xlu0 %1969 }
0x1045   :  { %3283 = vrcp.f32 %v1970_v59 }
0x1046   :  { %v1973_v4 = vpop.xlane.xlu1 %1972 }
0x1047   :  { %3285 = vrcp.f32 %v1973_v4 }
0x1048   :  { %v1976_v62 = vpop.xlane.xlu0 %1975 }
0x1049   :  { %3287 = vrcp.f32 %v1976_v62 }
0x104a   :  { %v2142_v42 = vpop.permute.xlu1 %2141 }
0x104b   :  { %v2147_v8 = vsel %vm663_vm1, %v2142_v42, 0 }
0x104c   :  { %v2089_v60 = vpop.permute.xlu0 %2088 }
0x104d   :  { %v2094_v36 = vsel %vm663_vm1, %v2089_v60, 0 }
0x104f   :  { %v3284_v49 = vpop.eup %3283 }
0x1050   :  { %v1984_v31 = vmul.f32 %v3284_v49, %v3276_v57 }
0x1051   :  { %v3286_v3 = vpop.eup %3285 }
0x1052   :  { %v1985_v44 = vmul.f32 %v3286_v3, %v3278_v0 }
0x1053   :  { %v3288_v51 = vpop.eup %3287 }
0x1054   :  { %v1988_v34 = vpack.c.bf16 %v1985_v44, %v1984_v31  ;;  %v1986_v57 = vmul.f32 %v3288_v51, %v3280_v43 }
0x1056   :  { %3058 = vmatmul.mubr.msk.bf16.vlgmr.msra.gmra.mrb[28].mxu0 %vm758_vm3, %v1988_v34 }
0x1057   :  { %3068 = vmatpush3.bf16.xpose.msra.mxu0 %v2094_v36  ;;  %3069 = vmatprep.mubr.msk.bf16.mxu0 %vm3580_vm0, %v3579_v6 }
0x1058   :  { %3079 = vmatprep.subr.bf16.mxu0 %v3579_v6 }
0x107b   :  { %v1979_v63 = vpop.xlane.xlu1 %1978 }
0x107c   :  { %3289 = vrcp.f32 %v1979_v63 }
0x107f   :  { %v2086_v47 = vpop.permute.xlu1 %2085 }
0x1080   :  { %3070 = vmatmul.mubr.msk.bf16.vlgmr.msra.gmra.mrb[32].mxu0 %vm663_vm1, %v2086_v47 }
0x1081   :  { %3081 = vmatprep.mubr.msk.bf16.mxu0 %vm3580_vm0, %v3579_v6 }
0x1083   :  { %v2139_v61 = vpop.permute.xlu1 %2138 }
0x1086   :  { %v3290_v52 = vpop.eup %3289 }
0x1087   :  { %v1987_v46 = vmul.f32 %v3290_v52, %v3282_v55 }
0x1089   :  { %v1989_v0 = vpack.c.bf16 %v1987_v46, %v1986_v57 }
0x108b   :  { %3064 = vmatmul.mubr.msk.bf16.vlgmr.msra.gmra.mrb[56].mxu1 %vm758_vm3, %v1989_v0 }
0x108c   :  { %3074 = vmatpush3.bf16.xpose.msra.mxu1 %v2147_v8  ;;  %3075 = vmatprep.mubr.msk.bf16.mxu1 %vm3580_vm0, %v3579_v6 }
0x108d   :  { %3085 = vmatprep.subr.bf16.mxu1 %v3579_v6 }
0x1093   :  { %3076 = vmatmul.mubr.msk.bf16.vlgmr.msra.gmra.mrb[60].mxu1 %vm663_vm1, %v2139_v61 }
0x1094   :  { %3087 = vmatprep.mubr.msk.bf16.mxu1 %vm3580_vm0, %v3579_v6 }
0x1129   :  { %v4285_v1 = vpop.f32.mrb[28].mxu0 }
0x112a   :  { %v3059_v43 = vpop.f32.mrb[29].mxu0 }
0x112b   :  { %v4287_v7 = vpop.f32.mrb[30].mxu0 }
0x112c   :  { %v3060_v29 = vpop.f32.mrb[31].mxu0 }
0x1153   :  { %v2130_v55 = vpop.f32.mrb[32].mxu0 }
0x1154   :  { %v3071_v40 = vpop.f32.mrb[33].mxu0  ;;  %v2190_v59 = vsel %vm758_vm3, %v2130_v55, -inf }
0x1155   :  { %2191 = vmax.xlane.f32.xlu0 %v2190_v59  ;;  %v2133_v4 = vpop.f32.mrb[34].mxu0 }
0x1156   :  { %v3072_v62 = vpop.f32.mrb[35].mxu0  ;;  %v2193_v49 = vsel %vm758_vm3, %v2133_v4, -inf }
0x1157   :  { %2194 = vmax.xlane.f32.xlu1 %v2193_v49 }
0x115e   :  { %v4291_v3 = vpop.f32.mrb[56].mxu1 }
0x115f   :  { %v3065_v31 = vpop.f32.mrb[57].mxu1 }
0x1160   :  { %v4293_v6 = vpop.f32.mrb[58].mxu1 }
0x1161   :  { %v3066_v44 = vpop.f32.mrb[59].mxu1 }
0x1166   :  { %v2183_v60 = vpop.f32.mrb[60].mxu1 }
0x1167   :  { %v3077_v34 = vpop.f32.mrb[61].mxu1  ;;  %v2196_v36 = vsel %vm758_vm3, %v2183_v60, -inf }
0x1168   :  { %v2186_v42 = vpop.f32.mrb[62].mxu1  ;;  %2197 = vmax.xlane.f32.xlu0 %v2196_v36 }
0x1169   :  { %v3078_v63 = vpop.f32.mrb[63].mxu1  ;;  %v2199_v47 = vsel %vm758_vm3, %v2186_v42, -inf }
0x116c   :  { %2200 = vmax.xlane.f32.xlu0 %v2199_v47 }
0x11e2   :  { %v2192_v51 = vpop.xlane.xlu0 %2191 }
0x11e3   :  { %v2202_v52 = vsub.f32 %v2130_v55, %v2192_v51 }
0x11e4   :  { %v2195_v57 = vpop.xlane.xlu1 %2194 }
0x11e5   :  { %v2206_v46 = vmul.f32 1.442695, %v2202_v52  ;;  %v2203_v0 = vsub.f32 %v2133_v4, %v2195_v57 }
0x11e7   :  { %3291 = vpow2.f32 %v2206_v46  ;;  %v2208_v8 = vmul.f32 1.442695, %v2203_v0 }
0x11e9   :  { %3293 = vpow2.f32 %v2208_v8 }
0x11f1   :  { %v3292_v61 = vpop.eup %3291 }
0x11f2   :  { %v2214_v43 = vsel %vm758_vm3, %v3292_v61, 0.0 }
0x11f3   :  { %v3294_v29 = vpop.eup %3293  ;;  %2215 = vadd.xlane.f32.xlu0 %v2214_v43 }
0x11f4   :  { %v2217_v40 = vsel %vm758_vm3, %v3294_v29, 0.0 }
0x11f5   :  { %v2198_v59 = vpop.xlane.xlu0 %2197  ;;  %2218 = vadd.xlane.f32.xlu1 %v2217_v40  ;;  %v3341_v40 = vld [vmem:[#allocation11] sm:$0xff]  }
0x11f6   :  { %v2204_v62 = vsub.f32 %v2183_v60, %v2198_v59 }
0x11f8   :  { %v2210_v49 = vmul.f32 1.442695, %v2204_v62  ;;  %v3342_v62 = vld [vmem:[#allocation11 + $0x8] sm:$0xff]  }
0x11f9   :  { %v2201_v31 = vpop.xlane.xlu0 %2200 }
0x11fa   :  { %3295 = vpow2.f32 %v2210_v49  ;;  %v2205_v55 = vsub.f32 %v2186_v42, %v2201_v31  ;;  %v3343_v49 = vld [vmem:[#allocation11 + $0x10] sm:$0xff]  }
0x11fc   :  { %v2212_v44 = vmul.f32 1.442695, %v2205_v55 }
0x11fe   :  { %3297 = vpow2.f32 %v2212_v44 }
0x1204   :  { %v3296_v4 = vpop.eup %3295 }
0x1205   :  { %v2220_v34 = vsel %vm758_vm3, %v3296_v4, 0.0 }
0x1206   :  { %2221 = vadd.xlane.f32.xlu0 %v2220_v34  ;;  %v3344_v34 = vld [vmem:[#allocation11 + $0x18] sm:$0xff]  }
0x1208   :  { %v3298_v36 = vpop.eup %3297 }
0x1209   :  { %v2223_v63 = vsel %vm758_vm3, %v3298_v36, 0.0 }
0x120a   :  { %2224 = vadd.xlane.f32.xlu1 %v2223_v63  ;;  %v3345_v63 = vld [vmem:[#allocation13] ss:$8 sps:$4 sm:$0xff]  }
0x121b   :  { %2287 = vrot.lane.b32.xlu1 %v4247_v53, %s3572_s0 }
0x121c   :  { %2237 = vrot.lane.b32.xlu0 %v4243_v9, %s3572_s0 }
0x1280   :  { %v2216_v47 = vpop.xlane.xlu0 %2215 }
0x1282   :  { %v2219_v60 = vpop.xlane.xlu1 %2218 }
0x1283   :  { %3299 = vrcp.f32 %v2219_v60  ;;  %v3346_v60 = vld [vmem:[#allocation13 + $0x14] ss:$8 sps:$4 sm:$0xff]  }
0x1284   :  { %3301 = vrcp.f32 %v2216_v47  ;;  %v3348_v47 = vld [vmem:[#allocation13 + $0x10] ss:$8 sps:$4 sm:$0xff]  }
0x128d   :  { %v3300_v42 = vpop.eup %3299 }
0x128e   :  { %v3302_v52 = vpop.eup %3301  ;;  %v2231_v57 = vmul.f32 %v3300_v42, %v3294_v29  ;;  %v3351_v42 = vld [vmem:[#allocation11 + $0x38] sm:$0xff]  }
0x128f   :  { %v2230_v8 = vmul.f32 %v3302_v52, %v3292_v61 }
0x1291   :  { %v2234_v53 = vpack.c.bf16 %v2231_v57, %v2230_v8 }
0x1293   :  { %v2222_v51 = vpop.xlane.xlu0 %2221 }
0x1294   :  { %3303 = vrcp.f32 %v2222_v51 }
0x1297   :  { %v2238_v46 = vpop.permute.xlu0 %2237  ;;  %v2225_v0 = vpop.xlane.xlu1 %2224 }
0x1298   :  { %v2243_v43 = vsel %vm808_vm2, %v2238_v46, 0  ;;  %3305 = vrcp.f32 %v2225_v0 }
0x1299   :  { %3080 = vmatpush3.bf16.msra.mxu0 %v2243_v43 }
0x129a   :  { %3091 = vmatprep.subr.bf16.mxu0 %v3341_v40 }
0x129b   :  { %v2288_v9 = vpop.permute.xlu1 %2287 }
0x129c   :  { %v2293_v59 = vsel %vm808_vm2, %v2288_v9, 0  ;;  %3082 = vmatmul.mubr.msk.bf16.vlgmr.msra.gmra.mrb[36].mxu0 %vm758_vm3, %v2234_v53  ;;  %v3352_v9 = vld [vmem:[#allocation14] sm:$0xff]  }
0x129d   :  { %3086 = vmatpush3.bf16.msra.mxu1 %v2293_v59  ;;  %3092 = vmatpush3.bf16.msra.mxu0 %v3341_v40  ;;  %v3353_v59 = vld [vmem:[#allocation14 + $0x48] sm:$0xff]  }
0x129e   :  { %3093 = vmatprep.subr.bf16.mxu0 %v3342_v62  ;;  %2465 = vmatprep.subr.bf16.mxu1 %v4008_v50  ;;  %v3304_v29 = vpop.eup %3303  ;;  %v3347_v50 = vld [vmem:[#allocation11 + $0x20] sm:$0xff]  }
0x129f   :  { %v2232_v31 = vmul.f32 %v3304_v29, %v3296_v4  ;;  %v3349_v4 = vld [vmem:[#allocation11 + $0x28] sm:$0xff]  }
0x12a1   :  { %3094 = vmatpush3.bf16.msra.mxu0 %v3342_v62 }
0x12a2   :  { %v3306_v61 = vpop.eup %3305  ;;  %3095 = vmatprep.subr.bf16.mxu0 %v3343_v49 }
0x12a3   :  { %v2233_v55 = vmul.f32 %v3306_v61, %v3298_v36  ;;  %v3350_v36 = vld [vmem:[#allocation11 + $0x30] sm:$0xff]  }
0x12a5   :  { %v2235_v44 = vpack.c.bf16 %v2233_v55, %v2232_v31  ;;  %3096 = vmatpush3.bf16.msra.mxu0 %v3343_v49 }
0x12a6   :  { %3097 = vmatprep.subr.bf16.mxu0 %v3344_v34 }
0x12a7   :  { %3088 = vmatmul.mubr.msk.bf16.vlgmr.msra.gmra.mrb[64].mxu1 %vm758_vm3, %v2235_v44 }
0x12a8   :  { %2466 = vmatpush1.bf16.msra.mxu1 %v3345_v63  ;;  %2497 = vmatprep.mubr.bf16.mxu1 %v3581_v25 }
0x12a9   :  { %3098 = vmatpush3.bf16.msra.mxu0 %v3344_v34  ;;  %2467 = vmatprep.subr.bf16.mxu1 %v3346_v60 }
0x12aa   :  { %3099 = vmatprep.subr.bf16.mxu0 %v3347_v50 }
0x12ac   :  { %2468 = vmatpush1.bf16.msra.mxu1 %v3348_v47 }
0x12ad   :  { %3100 = vmatpush3.bf16.msra.mxu0 %v3347_v50  ;;  %2469 = vmatprep.subr.bf16.mxu1 %v4031_v11 }
0x12ae   :  { %3101 = vmatprep.subr.bf16.mxu0 %v3349_v4 }
0x12b0   :  { %2470 = vmatpush1.bf16.msra.mxu1 %v4033_v12 }
0x12b1   :  { %3102 = vmatpush3.bf16.msra.mxu0 %v3349_v4  ;;  %2471 = vmatprep.subr.bf16.mxu1 %v4037_v13 }
0x12b2   :  { %3103 = vmatprep.subr.bf16.mxu0 %v3350_v36 }
0x12b4   :  { %2472 = vmatpush1.bf16.msra.mxu1 %v4039_v14 }
0x12b5   :  { %3104 = vmatpush3.bf16.msra.mxu0 %v3350_v36  ;;  %2473 = vmatprep.subr.bf16.mxu1 %v4043_v15 }
0x12b6   :  { %3105 = vmatprep.subr.bf16.mxu0 %v3351_v42 }
0x12b8   :  { %2474 = vmatpush1.bf16.msra.mxu1 %v4045_v16 }
0x12b9   :  { %3106 = vmatpush3.bf16.msra.mxu0 %v3351_v42  ;;  %2475 = vmatprep.subr.bf16.mxu1 %v4049_v17 }
0x12ba   :  { %2827 = vmatprep.subr.bf16.mxu0 %v4069_v27 }
0x12bc   :  { %2476 = vmatpush1.bf16.msra.mxu1 %v4051_v18 }
0x12bd   :  { %2477 = vmatprep.subr.bf16.mxu1 %v4055_v19 }
0x12c0   :  { %2478 = vmatpush1.bf16.msra.mxu1 %v4057_v20 }
0x12c1   :  { %2479 = vmatprep.subr.bf16.mxu1 %v4059_v22 }
0x12c4   :  { %2480 = vmatpush1.bf16.msra.mxu1 %v4063_v23 }
0x136f   :  { %v2279_v11 = vpop.f32.mrb[36].mxu0 }
0x1370   :  { %v3083_v12 = vpop.f32.mrb[37].mxu0 }
0x1371   :  { %v2282_v13 = vpop.f32.mrb[38].mxu0 }
0x1372   :  { %v3137_v14 = vpack.i.bf16 %v2282_v13, %v2279_v11  ;;  %v3084_v15 = vpop.f32.mrb[39].mxu0 }
0x1374   :  { %3138 = vrot.lane.b32.xlu1 %v3137_v14, %s3572_s0 }
0x137a   :  { %v2329_v16 = vpop.f32.mrb[64].mxu1 }
0x137b   :  { %v3089_v17 = vpop.f32.mrb[65].mxu1 }
0x137c   :  { %v2332_v27 = vpop.f32.mrb[66].mxu1 }
0x137d   :  { %v3142_v51 = vpack.i.bf16 %v2332_v27, %v2329_v16  ;;  %v3090_v18 = vpop.f32.mrb[67].mxu1 }
0x137e   :  { %v3355_v18 = vld [vmem:[%s4408_s12] ss:$0 sm:$0xff]  ;;  %s3582_s12 = smov [#allocation16]  }
0x137f   :  { %3143 = vrot.lane.b32.xlu1 %v3142_v51, %s3572_s0 }
0x13e6   :  { %v3139_v19 = vpop.permute.xlu1 %3138 }
0x13e7   :  { %v3141_v20 = vunpack.i.h.bf16 %v3139_v19  ;;  %v3140_v52 = vunpack.i.l.bf16 %v3139_v19 }
0x13e9   :  { %v2352_v22 = vsel %vm663_vm1, %v4285_v1, %v3140_v52  ;;  %v2353_v23 = vsel %vm663_vm1, %v4287_v7, %v3141_v20 }
0x13ea   :  { %v2356_v57 = vpack.c.bf16 %v2353_v23, %v2352_v22  ;;  %v3356_v22 = vld [vmem:[%s4409_s13] ss:$0 sm:$0xff]  ;;  %s2586_s13 = sshll.u32 %s3582_s12, 4  ;;  %s2587_s13 = int_to_ptr.vmem [resolvable:$true] %s2586_s13 }
0x13eb   :  { %s3533_s27 = scalar_lea.vmem %s2587_s13, 256  ;;  %p3538_p9 = scmp.lt.s32.totalorder %s2587_s13, %s2587_s13 }
0x13ec   :  { %3107 = vmatprep.mubr.bf16.mxu0 %v2356_v57  ;;  %p3534_p8 = scmp.ne.s32.totalorder %s2587_s13, %s3533_s27  ;;  %p3539_p10 = scmp.lt.s32.totalorder %s3533_s27, %s3533_s27 }
0x13ee   :  { %p3540_p11 = por %p3539_p10, %p3538_p9 }
0x13f0   :  { %p3541_p12 = pnand %p3540_p11, %p3534_p8 }
0x13f1   :  { %v3144_v46 = vpop.permute.xlu1 %3143 }
0x13f2   :  { %v3146_v0 = vunpack.i.h.bf16 %v3144_v46  ;;  %v3145_v8 = vunpack.i.l.bf16 %v3144_v46 }
0x13f4   :  { %v2355_v43 = vsel %vm663_vm1, %v4293_v6, %v3146_v0  ;;  %v2354_v53 = vsel %vm663_vm1, %v4291_v3, %v3145_v8 }
0x13f5   :  { %v2357_v40 = vpack.c.bf16 %v2355_v43, %v2354_v53 }
0x13f7   :  { %3108 = vmatmul.mubr.bf16.vlgmr.msra.gmra.mrb[40].mxu0 %v2357_v40 }
0x13f8   :  { %2828 = vmatpush3.bf16.msra.mxu0 %v3352_v9 }
0x13f9   :  { %2829 = vmatprep.subr.bf16.mxu0 %v3353_v59 }
0x13fc   :  { %2830 = vmatpush3.bf16.msra.mxu0 %v4072_v33 }
0x13fd   :  { %2831 = vmatprep.subr.bf16.mxu0 %v4074_v35 }
0x1400   :  { %2832 = vmatpush3.bf16.msra.mxu0 %v4077_v54  ;;  %v3354_v54 = vld [vmem:[%s4405_s9] ss:$0 sm:$0xff] }
0x1401   :  { %2833 = vmatprep.subr.bf16.mxu0 %v4080_v37 }
0x1404   :  { %2834 = vmatpush3.bf16.msra.mxu0 %v4083_v5 }
0x1405   :  { %2835 = vmatprep.subr.bf16.mxu0 %v4086_v21 }
0x1408   :  { %2836 = vmatpush3.bf16.msra.mxu0 %v4089_v56 }
0x1409   :  { %2837 = vmatprep.subr.bf16.mxu0 %v4092_v39 }
0x140c   :  { %2838 = vmatpush3.bf16.msra.mxu0 %v4122_v24 }
0x140d   :  { %2839 = vmatprep.subr.bf16.mxu0 %v4125_v26 }
0x1410   :  { %2840 = vmatpush3.bf16.msra.mxu0 %v4127_v28 }
0x1411   :  { %2841 = vmatprep.subr.bf16.mxu0 %v4131_v30 }
0x1414   :  { %2842 = vmatpush3.bf16.msra.mxu0 %v4133_v32 }
0x14ca   :  { %v3109_v33 = vpop.f32.mrb[40].mxu0 }
0x14cb   :  { %v2392_v35 = vpop.f32.mrb[41].mxu0  ;;  %v2401_v56 = vadd.f32 %v3354_v54, %v3109_v33 }
0x14cc   :  { %v2393_v37 = vadd.f32 %v3354_v54, %v2392_v35  ;;  %v3110_v5 = vpop.f32.mrb[42].mxu0 }
0x14cd   :  { %v2395_v21 = vpop.f32.mrb[43].mxu0  ;;  %v4356_v28 = vadd.f32 %v2401_v56, %v4185_v45  ;;  %v2404_v30 = vadd.f32 %v3354_v54, %v3110_v5 }
0x14ce   :  { %v4351_v39 = vadd.f32 %v2393_v37, %v4175_v58  ;;  %v2396_v24 = vadd.f32 %v3354_v54, %v2395_v21 }
0x14cf   :  { %v2410_v32 = vadd.f32 %v2404_v30, %v4181_v2 }
0x14d0   :  { %2411 = vadd.xlane.f32.xlu0 %v4351_v39  ;;  %v2408_v26 = vadd.f32 %v2396_v24, %v4171_v41 }
0x14d2   :  { %2413 = vadd.xlane.f32.xlu1 %v2408_v26 }
0x14d4   :  { %2415 = vadd.xlane.f32.xlu0 %v4356_v28 }
0x14d8   :  { %2417 = vadd.xlane.f32.xlu0 %v2410_v32 }
0x155d   :  { %v2412_v1 = vpop.xlane.xlu0 %2411 }
0x155e   :  { %v2419_v7 = vmul.f32 0.0078125, %v2412_v1 }
0x155f   :  { %v2414_v3 = vpop.xlane.xlu1 %2413 }
0x1560   :  { %v2423_v58 = vsub.f32 %v4351_v39, %v2419_v7  ;;  %v2420_v6 = vmul.f32 0.0078125, %v2414_v3 }
0x1561   :  { %v2416_v62 = vpop.xlane.xlu0 %2415 }
0x1562   :  { %v2424_v29 = vsub.f32 %v2408_v26, %v2420_v6  ;;  %v2421_v61 = vmul.f32 0.0078125, %v2416_v62  ;;  %v2427_v41 = vmul.f32 %v2423_v58, %v2423_v58 }
0x1564   :  { %v2425_v45 = vsub.f32 %v4356_v28, %v2421_v61  ;;  %2431 = vadd.xlane.f32.xlu0 %v2427_v41  ;;  %v2428_v49 = vmul.f32 %v2424_v29, %v2424_v29 }
0x1565   :  { %v2418_v31 = vpop.xlane.xlu0 %2417 }
0x1566   :  { %v2422_v55 = vmul.f32 0.0078125, %v2418_v31  ;;  %2433 = vadd.xlane.f32.xlu1 %v2428_v49  ;;  %v2429_v44 = vmul.f32 %v2425_v45, %v2425_v45 }
0x1568   :  { %v2426_v2 = vsub.f32 %v2410_v32, %v2422_v55  ;;  %2435 = vadd.xlane.f32.xlu0 %v2429_v44 }
0x156a   :  { %v2430_v34 = vmul.f32 %v2426_v2, %v2426_v2 }
0x156c   :  { %2437 = vadd.xlane.f32.xlu1 %v2430_v34 }
0x15f1   :  { %v2432_v63 = vpop.xlane.xlu0 %2431 }
0x15f2   :  { %v2439_v60 = vmul.f32 0.0078125, %v2432_v63 }
0x15f3   :  { %v2434_v50 = vpop.xlane.xlu1 %2433 }
0x15f4   :  { %v2443_v47 = vadd.f32 1e-05, %v2439_v60  ;;  %v2440_v4 = vmul.f32 0.0078125, %v2434_v50 }
0x15f5   :  { %v2436_v36 = vpop.xlane.xlu0 %2435 }
0x15f6   :  { %3307 = vrsqrt.f32 %v2443_v47  ;;  %v2444_v42 = vadd.f32 1e-05, %v2440_v4  ;;  %v2441_v11 = vmul.f32 0.0078125, %v2436_v36 }
0x15f8   :  { %3309 = vrsqrt.f32 %v2444_v42  ;;  %v2445_v12 = vadd.f32 1e-05, %v2441_v11 }
0x15f9   :  { %v2438_v13 = vpop.xlane.xlu1 %2437 }
0x15fa   :  { %3311 = vrsqrt.f32 %v2445_v12  ;;  %v2442_v14 = vmul.f32 0.0078125, %v2438_v13 }
0x15fc   :  { %v2446_v15 = vadd.f32 1e-05, %v2442_v14 }
0x15fe   :  { %3313 = vrsqrt.f32 %v2446_v15 }
0x1600   :  { %v3308_v16 = vpop.eup %3307 }
0x1601   :  { %v2451_v17 = vmul.f32 %v3308_v16, %v2423_v58 }
0x1602   :  { %v3310_v27 = vpop.eup %3309 }
0x1603   :  { %v2452_v51 = vmul.f32 %v3310_v27, %v2424_v29  ;;  %v2455_v19 = vmul.f32 %v3355_v18, %v2451_v17 }
0x1604   :  { %v3312_v20 = vpop.eup %3311 }
0x1605   :  { %v2456_v52 = vmul.f32 %v3355_v18, %v2452_v51  ;;  %v2459_v23 = vadd.f32 %v3356_v22, %v2455_v19  ;;  %v2453_v46 = vmul.f32 %v3312_v20, %v2425_v45 }
0x1607   :  { %v2460_v57 = vadd.f32 %v3356_v22, %v2456_v52  ;;  %v2457_v53 = vmul.f32 %v3355_v18, %v2453_v46 }
0x1608   :  { %v3314_v0 = vpop.eup %3313 }
0x1609   :  { %v2463_v8 = vpack.c.bf16 %v2460_v57, %v2459_v23  ;;  %v2454_v43 = vmul.f32 %v3314_v0, %v2426_v2  ;;  %v2461_v59 = vadd.f32 %v3356_v22, %v2457_v53 }
0x160b   :  { %2498 = vmatmul.mubr.bf16.vlgmr.msra.gmra.mrb[68].mxu1 %v2463_v8  ;;  %v2458_v40 = vmul.f32 %v3355_v18, %v2454_v43 }
0x160c   :  { %2507 = vmatprep.mubr.bf16.mxu1 %v3581_v25 }
0x160d   :  { %v2462_v9 = vadd.f32 %v3356_v22, %v2458_v40 }
0x160f   :  { %v2464_v33 = vpack.c.bf16 %v2462_v9, %v2461_v59 }
0x1613   :  { %2508 = vmatmul.mubr.bf16.gmra.mrb[72].mxu1 %v2464_v33 }
0x16de   :  { %v2499_v35 = vpop.f32.mrb[68].mxu1 }
0x16df   :  { %v2500_v54 = vadd.f32 %v2499_v35, %v4141_v48  ;;  %v2501_v37 = vpop.f32.mrb[69].mxu1 }
0x16e0   :  { %v2502_v5 = vadd.f32 %v2501_v37, %v4143_v38  ;;  %v2503_v21 = vpop.f32.mrb[70].mxu1 }
0x16e1   :  { %v2504_v56 = vadd.f32 %v2503_v21, %v4141_v48  ;;  %v2505_v24 = vpop.f32.mrb[71].mxu1  ;;  %v2518_v30 = vmax.f32 %v2500_v54, 0.0 }
0x16e2   :  { %v2506_v26 = vadd.f32 %v2505_v24, %v4143_v38  ;;  %v2519_v1 = vmax.f32 %v2502_v5, 0.0 }
0x16e3   :  { %v2520_v32 = vmax.f32 %v2504_v56, 0.0 }
0x16e4   :  { %v2521_v25 = vmax.f32 %v2506_v26, 0.0 }
0x16e5   :  { %v2526_v7 = vpack.c.bf16 %v2520_v32, %v2518_v30 }
0x16e6   :  { %v2527_v3 = vpack.c.bf16 %v2521_v25, %v2519_v1  ;;  %v2509_v58 = vpop.f32.mrb[72].mxu1 }
0x16e7   :  { %v2510_v6 = vadd.f32 %v2509_v58, %v4141_v48  ;;  %v2511_v62 = vpop.f32.mrb[73].mxu1 }
0x16e8   :  { %v2512_v29 = vadd.f32 %v2511_v62, %v4143_v38  ;;  %v2513_v61 = vpop.f32.mrb[74].mxu1  ;;  %2562 = vmatprep.mubr.bf16.mxu0 %v2527_v3 }
0x16e9   :  { %v2514_v41 = vadd.f32 %v2513_v61, %v4141_v48  ;;  %v2515_v45 = vpop.f32.mrb[75].mxu1  ;;  %2563 = vmatmul.mubr.bf16.vlgmr.msra.gmra.mrb[44].mxu0 %v2526_v7  ;;  %v2522_v31 = vmax.f32 %v2510_v6, 0.0 }
0x16ea   :  { %v2516_v49 = vadd.f32 %v2515_v45, %v4143_v38  ;;  %v2523_v44 = vmax.f32 %v2512_v29, 0.0 }
0x16eb   :  { %v2524_v55 = vmax.f32 %v2514_v41, 0.0 }
0x16ec   :  { %v2525_v2 = vmax.f32 %v2516_v49, 0.0 }
0x16ed   :  { %v2528_v34 = vpack.c.bf16 %v2524_v55, %v2522_v31 }
0x16ee   :  { %v2529_v63 = vpack.c.bf16 %v2525_v2, %v2523_v44 }
0x16f0   :  { %2569 = vmatprep.mubr.bf16.mxu0 %v2529_v63 }
0x16f1   :  { %2570 = vmatmul.mubr.bf16.gmra.mrb[48].mxu0 %v2528_v34 }
0x17bc   :  { %v2843_v60 = vpop.f32.mrb[44].mxu0 }
0x17bd   :  { %v2844_v50 = vpop.f32.mrb[45].mxu0 }
0x17be   :  { %v2845_v47 = vadd.f32 %v2844_v50, %v2843_v60  ;;  %v2846_v4 = vpop.f32.mrb[46].mxu0 }
0x17bf   :  { %v2847_v36 = vpop.f32.mrb[47].mxu0 }
0x17c0   :  { %v2565_v42 = vadd.f32 %v2845_v47, %v4166_v10 }
0x17c2   :  { %v2577_v48 = vadd.f32 %v2565_v42, %v4351_v39 }
0x17c4   :  { %2579 = vst [vmem:[#allocation16] sm:$0xff] %v2577_v48  ;;  %v2849_v11 = vpop.f32.mrb[48].mxu0 }
0x17c5   :  { %v2850_v38 = vpop.f32.mrb[49].mxu0 }
0x17c6   :  { %v2851_v12 = vadd.f32 %v2850_v38, %v2849_v11  ;;  %v2852_v13 = vpop.f32.mrb[50].mxu0 }
0x17c7   :  { %v2853_v14 = vpop.f32.mrb[51].mxu0 }
0x17c8   :  { %v2572_v15 = vadd.f32 %v2851_v12, %v4166_v10 }
0x17ca   :  { %v2578_v16 = vadd.f32 %v2572_v15, %v4356_v28 }
0x17cc   :  { %2580 = vst [vmem:[#allocation16 + $0x8] sm:$0xff] %v2578_v16 }
0x17cd   :  { %3544 = shalt.err (!%p3541_p12)
}
0x17ce   :  { %s4431_s8 = sld [smem:[#allocation27_spill]] }
0x17d4   :  { %s3545_s29 = scalar_lea.hbm %s4431_s8, 256 }
0x17d5   :  { %p3546_p13 = scmp.ne.s32.totalorder %s4431_s8, %s3545_s29  ;;  %p3549_p0 = scmp.lt.u32.totalorder %s3545_s29, %s4431_s8 }
0x17d7   :  { %p3551_p1 = pnand %p3549_p0, %p3546_p13 }
0x17d9   :  { %3554 = shalt.err (!%p3551_p1)
}
0x17da   :  { %2592 = dma.vmem_to_hbm [thread:$0]  %s2587_s13, 256, %s4431_s8, [#allocation4], %s4428_s19, %s4428_s19, %s3569_s24  }
0x17db   :  { %3565 = dma.done.wait [#allocation4], 256  }
0x17dc   :  { %3566 = vsyncadd [#allocation4], 4294967040 }
0x17dd   :  { %2596 = vsyncpa [#allocation3], 1 }
0x17de   :  { %2597 = vsyncpa [#allocation6], 1 }
0x17df   :  { %2598 = vsyncpa [#allocation9], 1 }
0x17e0   :  { %2599 = vsyncpa [#allocation12], 1 }
0x17e1   :  { %2600 = vsyncpa [#allocation15], 1 }
0x17e2   :  { %2601 = vsyncpa [#allocation4], 1 }

// kernel: tpu_custom_call.1
= control target key start
LH: loop header
LB: loop body
LE: loop exit
PB: predicated region body
PF: predicated region fallthrough
CT: control target
= control target key end

     0   :  { %s4396_s0 = inlined_call_operand.hbm [shape: f32[2,8,128], index: 0, kind: input, shape index: {}]   ;;  %s4397_s1 = inlined_call_operand.hbm [shape: f32[2,8,128], index: 1, kind: input, shape index: {}]   ;;  %s4398_s2 = inlined_call_operand.hbm [shape: bf16[128,128], index: 2, kind: input, shape index: {}]   ;;  %s4399_s3 = inlined_call_operand.vmem [shape: f32[1,128], index: 3, kind: input, shape index: {}]   ;;  %s4400_s4 = inlined_call_operand.hbm [shape: bf16[128,128], index: 4, kind: input, shape index: {}]   ;;  %s4401_s5 = inlined_call_operand.vmem [shape: f32[1,128], index: 5, kind: input, shape index: {}]   ;;  %s4402_s6 = inlined_call_operand.hbm [shape: bf16[128,128], index: 6, kind: input, shape index: {}]   ;;  %s4403_s7 = inlined_call_operand.vmem [shape: f32[1,128], index: 7, kind: input, shape index: {}]   ;;  %s4404_s8 = inlined_call_operand.hbm [shape: bf16[128,128], index: 8, kind: input, shape index: {}]   ;;  %s4405_s9 = inlined_call_operand.vmem [shape: f32[1,128], index: 9, kind: input, shape index: {}]   ;;  %s4406_s10 = inlined_call_operand.vmem [shape: f32[1,128], index: 10, kind: input, shape index: {}]   ;;  %s4407_s11 = inlined_call_operand.vmem [shape: f32[1,128], index: 11, kind: input, shape index: {}]   ;;  %s4408_s12 = inlined_call_operand.vmem [shape: f32[1,128], index: 12, kind: input, shape index: {}]   ;;  %s4409_s13 = inlined_call_operand.vmem [shape: f32[1,128], index: 13, kind: input, shape index: {}]   ;;  %s4410_s14 = inlined_call_operand.hbm [shape: bf16[128,256], index: 14, kind: input, shape index: {}]   ;;  %s4411_s15 = inlined_call_operand.vmem [shape: f32[1,256], index: 15, kind: input, shape index: {}]   ;;  %s4412_s16 = inlined_call_operand.hbm [shape: bf16[256,128], index: 16, kind: input, shape index: {}]   ;;  %s4413_s17 = inlined_call_operand.vmem [shape: f32[1,128], index: 17, kind: input, shape index: {}]   ;;  %s4414_s18 = inlined_call_operand.hbm [shape: f32[2,8,128], index: 18, kind: output, shape index: {}]  }
   0x1   :  { %4421 = sst [smem:[#allocation23_spill]] %s4396_s0 }
   0x2   :  { %4422 = sst [smem:[#allocation24_spill]] %s4397_s1 }
   0x3   :  { %4423 = sst [smem:[#allocation25_spill]] %s4398_s2 }
   0x4   :  { %4424 = sst [smem:[#allocation26_spill]] %s4413_s17 }
   0x5   :  { %4425 = sst [smem:[#allocation27_spill]] %s4414_s18 }
   0x6   :  { %23 = vsyncpa [#allocation3], 0 }
   0x7   :  { %24 = vsyncpa [#allocation6], 0 }
   0x8   :  { %25 = vsyncpa [#allocation9], 0 }
   0x9   :  { %26 = vsyncpa [#allocation12], 0 }
   0xa   :  { %27 = vsyncpa [#allocation15], 0 }
   0xb   :  { %28 = vsyncpa [#allocation4], 0  ;;  %s3567_s27 = smov [#allocation5]   ;;  %s4426_s0 = sld [smem:[#allocation24_spill]] }
   0xc   :  { %s46_s28 = sshll.u32 %s3567_s27, 4  ;;  %s47_s28 = int_to_ptr.vmem [resolvable:$true] %s46_s28 }
  0x11   :  { %s3357_s19 = scalar_lea.hbm %s4426_s0, 256 }
  0x12   :  { %p3358_p0 = scmp.ne.s32.totalorder %s4426_s0, %s3357_s19  ;;  %p3361_p1 = scmp.lt.u32.totalorder %s3357_s19, %s4426_s0 }
  0x14   :  { %p3363_p2 = pnand %p3361_p1, %p3358_p0 }
  0x16   :  { %3366 = shalt.err (!%p3363_p2)
}
  0x17   :  { %s3367_s2 = scalar_lea.vmem %s47_s28, 256  ;;  %p3372_p4 = scmp.lt.s32.totalorder %s47_s28, %s47_s28 }
  0x18   :  { %p3368_p3 = scmp.ne.s32.totalorder %s47_s28, %s3367_s2  ;;  %p3373_p5 = scmp.lt.s32.totalorder %s3367_s2, %s3367_s2 }
  0x1a   :  { %p3374_p6 = por %p3373_p5, %p3372_p4 }
  0x1c   :  { %p3375_p7 = pnand %p3374_p6, %p3368_p3 }
  0x1e   :  { %3378 = shalt.err (!%p3375_p7)
}
  0x1f   :  { %s4419_s23 = smov 128   ;;  %s3569_s24 = smov 8  }
  0x20   :  { %52 = dma.hbm_to_vmem [thread:$0]  %s4426_s0, 256, %s47_s28, [#allocation6], %s4419_s23, %s4419_s23, %s3569_s24  }
  0x21   :  { %s3570_s27 = smov [#allocation8]   ;;  %s3571_s30 = smov [#allocation11]  }
  0x22   :  { %s72_s29 = sshll.u32 %s3570_s27, 4  ;;  %s100_s19 = sshll.u32 %s3571_s30, 4  ;;  %s73_s29 = int_to_ptr.vmem [resolvable:$true] %s72_s29  ;;  %s101_s19 = int_to_ptr.vmem [resolvable:$true] %s100_s19 }
  0x23   :  { %s3379_s21 = scalar_lea.hbm %s4400_s4, 1024 }
  0x24   :  { %p3380_p8 = scmp.ne.s32.totalorder %s4400_s4, %s3379_s21  ;;  %p3383_p9 = scmp.lt.u32.totalorder %s3379_s21, %s4400_s4 }
  0x26   :  { %p3385_p10 = pnand %p3383_p9, %p3380_p8 }
  0x28   :  { %3388 = shalt.err (!%p3385_p10)
}
  0x29   :  { %s3389_s28 = scalar_lea.vmem %s73_s29, 1024  ;;  %p3394_p12 = scmp.lt.s32.totalorder %s73_s29, %s73_s29 }
  0x2a   :  { %p3390_p11 = scmp.ne.s32.totalorder %s73_s29, %s3389_s28  ;;  %p3395_p13 = scmp.lt.s32.totalorder %s3389_s28, %s3389_s28 }
  0x2c   :  { %p3396_p0 = por %p3395_p13, %p3394_p12 }
  0x2e   :  { %p3397_p1 = pnand %p3396_p0, %p3390_p11 }
  0x30   :  { %3400 = shalt.err (!%p3397_p1)
}
  0x31   :  { %s3572_s0 = smov 64   ;;  %s3573_s25 = smov 4  }
  0x32   :  { %78 = dma.hbm_to_vmem [thread:$0]  %s4400_s4, 1024, %s73_s29, [#allocation9], %s3572_s0, %s3572_s0, %s3573_s25  }
  0x33   :  { %s3401_s30 = scalar_lea.hbm %s4404_s8, 1024 }
  0x34   :  { %p3402_p2 = scmp.ne.s32.totalorder %s4404_s8, %s3401_s30  ;;  %p3405_p3 = scmp.lt.u32.totalorder %s3401_s30, %s4404_s8 }
  0x36   :  { %p3407_p4 = pnand %p3405_p3, %p3402_p2 }
  0x38   :  { %3410 = shalt.err (!%p3407_p4)
}
  0x39   :  { %s3411_s2 = scalar_lea.vmem %s101_s19, 1024  ;;  %p3416_p6 = scmp.lt.s32.totalorder %s101_s19, %s101_s19 }
  0x3a   :  { %p3412_p5 = scmp.ne.s32.totalorder %s101_s19, %s3411_s2  ;;  %p3417_p7 = scmp.lt.s32.totalorder %s3411_s2, %s3411_s2 }
  0x3c   :  { %p3418_p8 = por %p3417_p7, %p3416_p6 }
  0x3e   :  { %p3419_p9 = pnand %p3418_p8, %p3412_p5 }
  0x40   :  { %3422 = shalt.err (!%p3419_p9)
}
  0x41   :  { %106 = dma.hbm_to_vmem [thread:$0]  %s4404_s8, 1024, %s101_s19, [#allocation12], %s3572_s0, %s3572_s0, %s3573_s25  }
  0x42   :  { %s3574_s28 = smov [#allocation2]   ;;  %s3575_s27 = smov [#allocation7]  }
  0x43   :  { %s34_s26 = sshll.u32 %s3574_s28, 4  ;;  %s58_s17 = sshll.u32 %s3575_s27, 4  ;;  %s35_s26 = int_to_ptr.vmem [resolvable:$true] %s34_s26  ;;  %s59_s17 = int_to_ptr.vmem [resolvable:$true] %s58_s17 }
  0x44   :  { %s4427_s1 = sld [smem:[#allocation23_spill]] }
  0x4a   :  { %s3423_s20 = scalar_lea.hbm %s4427_s1, 256 }
  0x4b   :  { %p3424_p10 = scmp.ne.s32.totalorder %s4427_s1, %s3423_s20  ;;  %p3427_p11 = scmp.lt.u32.totalorder %s3423_s20, %s4427_s1 }
  0x4d   :  { %p3429_p12 = pnand %p3427_p11, %p3424_p10 }
  0x4f   :  { %3432 = shalt.err (!%p3429_p12)
}
  0x50   :  { %s3433_s8 = scalar_lea.vmem %s35_s26, 256  ;;  %p3438_p0 = scmp.lt.s32.totalorder %s35_s26, %s35_s26 }
  0x51   :  { %p3434_p13 = scmp.ne.s32.totalorder %s35_s26, %s3433_s8  ;;  %p3439_p1 = scmp.lt.s32.totalorder %s3433_s8, %s3433_s8 }
  0x53   :  { %p3440_p2 = por %p3439_p1, %p3438_p0 }
  0x55   :  { %p3441_p3 = pnand %p3440_p2, %p3434_p13 }
  0x57   :  { %3444 = shalt.err (!%p3441_p3)
}
  0x58   :  { %s4428_s19 = smov 128   ;;  %s4429_s27 = sld [smem:[#allocation25_spill]] }
  0x59   :  { %40 = dma.hbm_to_vmem [thread:$0]  %s4427_s1, 256, %s35_s26, [#allocation3], %s4428_s19, %s4428_s19, %s3569_s24  }
  0x5e   :  { %s3445_s18 = scalar_lea.hbm %s4429_s27, 1024 }
  0x5f   :  { %p3446_p4 = scmp.ne.s32.totalorder %s4429_s27, %s3445_s18  ;;  %p3449_p5 = scmp.lt.u32.totalorder %s3445_s18, %s4429_s27 }
  0x61   :  { %p3451_p6 = pnand %p3449_p5, %p3446_p4 }
  0x63   :  { %3454 = shalt.err (!%p3451_p6)
}
  0x64   :  { %s3455_s2 = scalar_lea.vmem %s59_s17, 1024  ;;  %p3460_p8 = scmp.lt.s32.totalorder %s59_s17, %s59_s17 }
  0x65   :  { %p3456_p7 = scmp.ne.s32.totalorder %s59_s17, %s3455_s2  ;;  %p3461_p9 = scmp.lt.s32.totalorder %s3455_s2, %s3455_s2 }
  0x67   :  { %p3462_p10 = por %p3461_p9, %p3460_p8 }
  0x69   :  { %p3463_p11 = pnand %p3462_p10, %p3456_p7 }
  0x6b   :  { %3466 = shalt.err (!%p3463_p11)
}
  0x6c   :  { %64 = dma.hbm_to_vmem [thread:$0]  %s4429_s27, 1024, %s59_s17, [#allocation6], %s3572_s0, %s3572_s0, %s3573_s25  }
  0x6d   :  { %s3576_s8 = smov [#allocation10]   ;;  %s3577_s29 = smov [#allocation13]  }
  0x6e   :  { %s86_s4 = sshll.u32 %s3576_s8, 4  ;;  %s122_s28 = sshll.u32 %s3577_s29, 4  ;;  %s87_s4 = int_to_ptr.vmem [resolvable:$true] %s86_s4  ;;  %s123_s28 = int_to_ptr.vmem [resolvable:$true] %s122_s28 }
  0x6f   :  { %s3467_s30 = scalar_lea.hbm %s4402_s6, 1024 }
  0x70   :  { %p3468_p12 = scmp.ne.s32.totalorder %s4402_s6, %s3467_s30  ;;  %p3471_p13 = scmp.lt.u32.totalorder %s3467_s30, %s4402_s6 }
  0x72   :  { %p3473_p0 = pnand %p3471_p13, %p3468_p12 }
  0x74   :  { %3476 = shalt.err (!%p3473_p0)
}
  0x75   :  { %s3477_s17 = scalar_lea.vmem %s87_s4, 1024  ;;  %p3482_p2 = scmp.lt.s32.totalorder %s87_s4, %s87_s4 }
  0x76   :  { %p3478_p1 = scmp.ne.s32.totalorder %s87_s4, %s3477_s17  ;;  %p3483_p3 = scmp.lt.s32.totalorder %s3477_s17, %s3477_s17 }
  0x78   :  { %p3484_p4 = por %p3483_p3, %p3482_p2 }
  0x7a   :  { %p3485_p5 = pnand %p3484_p4, %p3478_p1 }
  0x7c   :  { %3488 = shalt.err (!%p3485_p5)
}
  0x7d   :  { %92 = dma.hbm_to_vmem [thread:$0]  %s4402_s6, 1024, %s87_s4, [#allocation9], %s3572_s0, %s3572_s0, %s3573_s25  }
  0x7e   :  { %s3489_s29 = scalar_lea.hbm %s4410_s14, 2048 }
  0x7f   :  { %p3490_p6 = scmp.ne.s32.totalorder %s4410_s14, %s3489_s29  ;;  %p3493_p7 = scmp.lt.u32.totalorder %s3489_s29, %s4410_s14 }
  0x81   :  { %p3495_p8 = pnand %p3493_p7, %p3490_p6 }
  0x83   :  { %3498 = shalt.err (!%p3495_p8)
}
  0x84   :  { %s3499_s21 = scalar_lea.vmem %s123_s28, 2048  ;;  %p3504_p10 = scmp.lt.s32.totalorder %s123_s28, %s123_s28 }
  0x85   :  { %p3500_p9 = scmp.ne.s32.totalorder %s123_s28, %s3499_s21  ;;  %p3505_p11 = scmp.lt.s32.totalorder %s3499_s21, %s3499_s21 }
  0x87   :  { %p3506_p12 = por %p3505_p11, %p3504_p10 }
  0x89   :  { %p3507_p13 = pnand %p3506_p12, %p3500_p9 }
  0x8b   :  { %3510 = shalt.err (!%p3507_p13)
}
  0x8c   :  { %128 = dma.hbm_to_vmem [thread:$0]  %s4410_s14, 2048, %s123_s28, [#allocation12], %s4428_s19, %s4428_s19, %s3569_s24  }
  0x8d   :  { %s3578_s22 = smov [#allocation14]   ;;  %s3511_s26 = scalar_lea.hbm %s4412_s16, 2048 }
  0x8e   :  { %s136_s2 = sshll.u32 %s3578_s22, 4  ;;  %p3512_p0 = scmp.ne.s32.totalorder %s4412_s16, %s3511_s26  ;;  %s137_s2 = int_to_ptr.vmem [resolvable:$true] %s136_s2 }
  0x8f   :  { %p3515_p1 = scmp.lt.u32.totalorder %s3511_s26, %s4412_s16 }
  0x91   :  { %p3517_p2 = pnand %p3515_p1, %p3512_p0 }
  0x93   :  { %3520 = shalt.err (!%p3517_p2)
}
  0x94   :  { %s3521_s18 = scalar_lea.vmem %s137_s2, 2048  ;;  %p3526_p4 = scmp.lt.s32.totalorder %s137_s2, %s137_s2 }
  0x95   :  { %p3522_p3 = scmp.ne.s32.totalorder %s137_s2, %s3521_s18  ;;  %p3527_p5 = scmp.lt.s32.totalorder %s3521_s18, %s3521_s18 }
  0x97   :  { %p3528_p6 = por %p3527_p5, %p3526_p4 }
  0x99   :  { %p3529_p7 = pnand %p3528_p6, %p3522_p3 }
  0x9b   :  { %3532 = shalt.err (!%p3529_p7)
}
  0x9c   :  { %142 = dma.hbm_to_vmem [thread:$0]  %s4412_s16, 2048, %s137_s2, [#allocation15], %s3572_s0, %s3572_s0, %s3573_s25  }
  0x9d   :  { %3555 = dma.done.wait [#allocation3], 256  }
  0x9e   :  { %3556 = vsyncadd [#allocation3], 4294967040 }
  0x9f   :  { %3557 = dma.done.wait [#allocation6], 1280  }
  0xa0   :  { %3558 = vsyncadd [#allocation6], 4294966016 }
  0xa1   :  { %3559 = dma.done.wait [#allocation9], 2048  }
  0xa2   :  { %3560 = vsyncadd [#allocation9], 4294965248 }
  0xa3   :  { %3561 = dma.done.wait [#allocation12], 3072  }
  0xa4   :  { %3562 = vsyncadd [#allocation12], 4294964224 }
  0xa5   :  { %3563 = dma.done.wait [#allocation15], 2048  }
  0xa6   :  { %3564 = vsyncadd [#allocation15], 4294965248  ;;  %v294_v0 = vld [vmem:[#allocation5] sm:$0xff]  ;;  %v295_v1 = vld [vmem:[#allocation5 + $0x8] sm:$0xff]  ;;  %v3579_v6 = vmov 0.0   ;;  %vm3580_vm0 = vmmov 0  }
  0xa7   :  { %v292_v2 = vld [vmem:[#allocation2] sm:$0xff]  ;;  %298 = vadd.xlane.f32.xlu0 %v294_v0  ;;  %v293_v3 = vld [vmem:[#allocation2 + $0x8] sm:$0xff]  ;;  %2875 = vmatprep.subr.bf16.mxu1 %v3579_v6  ;;  %v3151_v25 = vld [vmem:[#allocation8 + $0x10] sm:$0xff]   ;;  %vm663_vm1 = vcmask 523264   ;;  %vm808_vm2 = vcmask 1043456   ;;  %vm758_vm3 = vcmask 64512  }
  0xa8   :  { %296 = vadd.xlane.f32.xlu1 %v292_v2  ;;  %v3147_v4 = vld [vmem:[#allocation8] sm:$0xff]   ;;  %v3149_v23 = vld [vmem:[#allocation8 + $0x8] sm:$0xff]   ;;  %v3825_v26 = vld [vmem:[#allocation7 + $0x10] sm:$0xff]   ;;  %2891 = vmatprep.mubr.msk.bf16.mxu1 %vm3580_vm0, %v3579_v6  ;;  %s4430_s16 = sld [smem:[#allocation26_spill]] }
  0xa9   :  { %v3798_v5 = vld [vmem:[#allocation7] sm:$0xff]   ;;  %2876 = vmatpush3.bf16.msra.mxu1 %v3147_v4  ;;  %v3820_v24 = vld [vmem:[#allocation7 + $0x8] sm:$0xff]   ;;  %v3153_v27 = vld [vmem:[#allocation8 + $0x18] sm:$0xff]  }
  0xaa   :  { %2855 = vmatprep.subr.bf16.mxu0 %v3798_v5  ;;  %2877 = vmatprep.subr.bf16.mxu1 %v3579_v6  ;;  %v3830_v28 = vld [vmem:[#allocation7 + $0x18] sm:$0xff]   ;;  %v3155_v29 = vld [vmem:[#allocation8 + $0x20] sm:$0xff]   ;;  %v3157_v31 = vld [vmem:[#allocation8 + $0x28] sm:$0xff]  }
  0xab   :  { %302 = vadd.xlane.f32.xlu0 %v295_v1  ;;  %2856 = vmatpush3.bf16.msra.mxu0 %v3798_v5  ;;  %v3835_v30 = vld [vmem:[#allocation7 + $0x20] sm:$0xff]   ;;  %v3837_v32 = vld [vmem:[#allocation7 + $0x28] sm:$0xff]   ;;  %v3159_v33 = vld [vmem:[#allocation8 + $0x30] sm:$0xff]  }
  0xac   :  { %300 = vadd.xlane.f32.xlu1 %v293_v3  ;;  %2857 = vmatprep.subr.bf16.mxu0 %v3820_v24  ;;  %v3845_v34 = vld [vmem:[#allocation7 + $0x30] sm:$0xff]   ;;  %v3161_v35 = vld [vmem:[#allocation8 + $0x38] sm:$0xff]   ;;  %v2602_v51 = vld [vmem:[%s4406_s10] ss:$0 sm:$0xff] }
  0xad   :  { %2878 = vmatpush3.bf16.msra.mxu1 %v3149_v23  ;;  %v3850_v36 = vld [vmem:[#allocation7 + $0x38] sm:$0xff]   ;;  %v2603_v56 = vld [vmem:[%s4407_s11] ss:$0 sm:$0xff] }
  0xae   :  { %2879 = vmatprep.subr.bf16.mxu1 %v3579_v6 }
  0xaf   :  { %2858 = vmatpush3.bf16.msra.mxu0 %v3820_v24 }
  0xb0   :  { %2859 = vmatprep.subr.bf16.mxu0 %v3825_v26 }
  0xb1   :  { %2880 = vmatpush3.bf16.msra.mxu1 %v3151_v25  ;;  %v2604_v25 = vld [vmem:[%s4399_s3] ss:$0 sm:$0xff] }
  0xb2   :  { %2881 = vmatprep.subr.bf16.mxu1 %v3579_v6 }
  0xb3   :  { %2860 = vmatpush3.bf16.msra.mxu0 %v3825_v26 }
  0xb4   :  { %2861 = vmatprep.subr.bf16.mxu0 %v3830_v28 }
  0xb5   :  { %2882 = vmatpush3.bf16.msra.mxu1 %v3153_v27 }
  0xb6   :  { %2883 = vmatprep.subr.bf16.mxu1 %v3579_v6 }
  0xb7   :  { %2862 = vmatpush3.bf16.msra.mxu0 %v3830_v28 }
  0xb8   :  { %2863 = vmatprep.subr.bf16.mxu0 %v3835_v30 }
  0xb9   :  { %2884 = vmatpush3.bf16.msra.mxu1 %v3155_v29 }
  0xba   :  { %2885 = vmatprep.subr.bf16.mxu1 %v3579_v6 }
  0xbb   :  { %2864 = vmatpush3.bf16.msra.mxu0 %v3835_v30 }
  0xbc   :  { %2865 = vmatprep.subr.bf16.mxu0 %v3837_v32 }
  0xbd   :  { %2886 = vmatpush3.bf16.msra.mxu1 %v3157_v31 }
  0xbe   :  { %2887 = vmatprep.subr.bf16.mxu1 %v3579_v6 }
  0xbf   :  { %2866 = vmatpush3.bf16.msra.mxu0 %v3837_v32 }
  0xc0   :  { %2867 = vmatprep.subr.bf16.mxu0 %v3845_v34 }
  0xc1   :  { %2888 = vmatpush3.bf16.msra.mxu1 %v3159_v33 }
  0xc2   :  { %2889 = vmatprep.subr.bf16.mxu1 %v3579_v6 }
  0xc3   :  { %2868 = vmatpush3.bf16.msra.mxu0 %v3845_v34 }
  0xc4   :  { %2869 = vmatprep.subr.bf16.mxu0 %v3850_v36 }
  0xc5   :  { %2890 = vmatpush3.bf16.msra.mxu1 %v3161_v35 }
  0xc6   :  { %2915 = vmatprep.subr.bf16.mxu1 %v3579_v6 }
  0xc7   :  { %2870 = vmatpush3.bf16.msra.mxu0 %v3850_v36 }
  0xc8   :  { %2895 = vmatprep.subr.bf16.mxu0 %v3579_v6 }
 0x134   :  { %v299_v7 = vpop.xlane.xlu0 %298 }
 0x135   :  { %v297_v8 = vpop.xlane.xlu1 %296  ;;  %v306_v9 = vmul.f32 0.0078125, %v299_v7  ;;  %v3163_v7 = vld [vmem:[#allocation10] sm:$0xff]  }
 0x136   :  { %v305_v10 = vmul.f32 0.0078125, %v297_v8 }
 0x137   :  { %v3804_v11 = vsub.f32 %v294_v0, %v306_v9  ;;  %v3164_v9 = vld [vmem:[#allocation10 + $0x8] sm:$0xff]  }
 0x138   :  { %v3806_v12 = vsub.f32 %v292_v2, %v305_v10  ;;  %v303_v13 = vpop.xlane.xlu0 %302  ;;  %v3165_v10 = vld [vmem:[#allocation10 + $0x10] sm:$0xff]  }
 0x139   :  { %v301_v14 = vpop.xlane.xlu1 %300  ;;  %v308_v15 = vmul.f32 0.0078125, %v303_v13  ;;  %v314_v16 = vmul.f32 %v3804_v11, %v3804_v11  ;;  %v3168_v13 = vld [vmem:[#allocation10 + $0x28] sm:$0xff]  }
 0x13a   :  { %v307_v17 = vmul.f32 0.0078125, %v301_v14  ;;  %v313_v20 = vmul.f32 %v3806_v12, %v3806_v12  ;;  %v3169_v14 = vld [vmem:[#allocation10 + $0x30] sm:$0xff]  }
 0x13b   :  { %v3810_v18 = vsub.f32 %v295_v1, %v308_v15  ;;  %319 = vadd.xlane.f32.xlu0 %v314_v16  ;;  %v3170_v15 = vld [vmem:[#allocation10 + $0x38] sm:$0xff]   ;;  %v2613_v16 = vld [vmem:[%s4401_s5] ss:$0 sm:$0xff] }
 0x13c   :  { %v3812_v19 = vsub.f32 %v293_v3, %v307_v17 }
 0x13d   :  { %v316_v21 = vmul.f32 %v3810_v18, %v3810_v18 }
 0x13e   :  { %v315_v22 = vmul.f32 %v3812_v19, %v3812_v19 }
 0x13f   :  { %323 = vadd.xlane.f32.xlu1 %v316_v21  ;;  %317 = vadd.xlane.f32.xlu0 %v313_v20 }
 0x143   :  { %321 = vadd.xlane.f32.xlu1 %v315_v22 }
 0x1c8   :  { %v320_v37 = vpop.xlane.xlu0 %319 }
 0x1c9   :  { %v326_v38 = vmul.f32 0.0078125, %v320_v37 }
 0x1cb   :  { %v330_v39 = vadd.f32 1e-05, %v326_v38 }
 0x1cc   :  { %v318_v40 = vpop.xlane.xlu0 %317  ;;  %v324_v41 = vpop.xlane.xlu1 %323 }
 0x1cd   :  { %3219 = vrsqrt.f32 %v330_v39  ;;  %v325_v42 = vmul.f32 0.0078125, %v318_v40  ;;  %v328_v43 = vmul.f32 0.0078125, %v324_v41 }
 0x1cf   :  { %v329_v44 = vadd.f32 1e-05, %v325_v42  ;;  %v332_v45 = vadd.f32 1e-05, %v328_v43 }
 0x1d0   :  { %v322_v46 = vpop.xlane.xlu1 %321 }
 0x1d1   :  { %3221 = vrsqrt.f32 %v329_v44  ;;  %v327_v47 = vmul.f32 0.0078125, %v322_v46 }
 0x1d2   :  { %3223 = vrsqrt.f32 %v332_v45  ;;  %v3910_v45 = vld [vmem:[%s4403_s7] ss:$0 sm:$0xff] }
 0x1d3   :  { %v331_v48 = vadd.f32 1e-05, %v327_v47 }
 0x1d5   :  { %3225 = vrsqrt.f32 %v331_v48 }
 0x1d7   :  { %v3220_v49 = vpop.eup %3219 }
 0x1d8   :  { %v338_v50 = vmul.f32 %v3220_v49, %v3804_v11  ;;  %v3166_v11 = vld [vmem:[#allocation10 + $0x18] sm:$0xff]  }
 0x1da   :  { %v348_v55 = vmul.f32 %v2602_v51, %v338_v50 }
 0x1db   :  { %v3222_v52 = vpop.eup %3221 }
 0x1dc   :  { %v3224_v53 = vpop.eup %3223  ;;  %v337_v54 = vmul.f32 %v3222_v52, %v3806_v12  ;;  %v358_v62 = vadd.f32 %v2603_v56, %v348_v55  ;;  %v3167_v12 = vld [vmem:[#allocation10 + $0x20] sm:$0xff]  }
 0x1dd   :  { %v340_v57 = vmul.f32 %v3224_v53, %v3810_v18 }
 0x1de   :  { %v347_v58 = vmul.f32 %v2602_v51, %v337_v54 }
 0x1df   :  { %v3226_v59 = vpop.eup %3225  ;;  %v350_v60 = vmul.f32 %v2602_v51, %v340_v57 }
 0x1e0   :  { %v357_v61 = vadd.f32 %v2603_v56, %v347_v58  ;;  %v339_v63 = vmul.f32 %v3226_v59, %v3812_v19 }
 0x1e1   :  { %v360_v0 = vadd.f32 %v2603_v56, %v350_v60 }
 0x1e2   :  { %v361_v1 = vpack.c.bf16 %v358_v62, %v357_v61  ;;  %v349_v2 = vmul.f32 %v2602_v51, %v339_v63 }
 0x1e3   :  { %v363_v3 = vpack.c.bf16 %v360_v0, %v358_v62 }
 0x1e4   :  { %2871 = vmatprep.mubr.bf16.mxu0 %v361_v1  ;;  %v359_v4 = vadd.f32 %v2603_v56, %v349_v2 }
 0x1e5   :  { %2892 = vmatmul.mubr.bf16.vlgmr.msra.gmra.mrb[0].mxu1 %v363_v3 }
 0x1e6   :  { %v362_v8 = vpack.c.bf16 %v360_v0, %v359_v4  ;;  %2917 = vmatprep.mubr.msk.bf16.mxu1 %vm3580_vm0, %v3579_v6 }
 0x1e8   :  { %2872 = vmatmul.mubr.bf16.vlgmr.msra.gmra.mrb[0].mxu0 %v362_v8 }
 0x1e9   :  { %2896 = vmatpush3.bf16.msra.mxu0 %v3163_v7  ;;  %2911 = vmatprep.mubr.msk.bf16.mxu0 %vm3580_vm0, %v3579_v6 }
 0x1ea   :  { %2897 = vmatprep.subr.bf16.mxu0 %v3579_v6 }
 0x1ed   :  { %2898 = vmatpush3.bf16.msra.mxu0 %v3164_v9 }
 0x1ee   :  { %2899 = vmatprep.subr.bf16.mxu0 %v3579_v6 }
 0x1f1   :  { %2900 = vmatpush3.bf16.msra.mxu0 %v3165_v10 }
 0x1f2   :  { %2901 = vmatprep.subr.bf16.mxu0 %v3579_v6 }
 0x1f5   :  { %2902 = vmatpush3.bf16.msra.mxu0 %v3166_v11 }
 0x1f6   :  { %2903 = vmatprep.subr.bf16.mxu0 %v3579_v6 }
 0x1f9   :  { %2904 = vmatpush3.bf16.msra.mxu0 %v3167_v12 }
 0x1fa   :  { %2905 = vmatprep.subr.bf16.mxu0 %v3579_v6 }
 0x1fd   :  { %2906 = vmatpush3.bf16.msra.mxu0 %v3168_v13 }
 0x1fe   :  { %2907 = vmatprep.subr.bf16.mxu0 %v3579_v6 }
 0x201   :  { %2908 = vmatpush3.bf16.msra.mxu0 %v3169_v14 }
 0x202   :  { %2909 = vmatprep.subr.bf16.mxu0 %v3579_v6 }
 0x205   :  { %2910 = vmatpush3.bf16.msra.mxu0 %v3170_v15 }
 0x208   :  { %2912 = vmatmul.mubr.bf16.vlgmr.msra.gmra.mrb[4].mxu0 %v363_v3 }
 0x2b8   :  { %v555_v17 = vpop.f32.mrb[0].mxu1 }
 0x2b9   :  { %v556_v18 = vadd.f32 %v2613_v16, %v555_v17  ;;  %v2893_v19 = vpop.f32.mrb[1].mxu1 }
 0x2ba   :  { %v558_v20 = vpop.f32.mrb[2].mxu1 }
 0x2bb   :  { %v3882_v21 = vpack.c.bf16 %v556_v18, %v556_v18  ;;  %v2894_v22 = vpop.f32.mrb[3].mxu1  ;;  %v2873_v23 = vpop.f32.mrb[0].mxu0  ;;  %v559_v31 = vadd.f32 %v2613_v16, %v558_v20 }
 0x2bc   :  { %v452_v27 = vpop.f32.mrb[1].mxu0  ;;  %v461_v35 = vadd.f32 %v2873_v23, %v2604_v25 }
 0x2bd   :  { %v668_v29 = vsel %vm663_vm1, %v3882_v21, 0  ;;  %v2874_v33 = vpop.f32.mrb[2].mxu0  ;;  %v453_v39 = vadd.f32 %v2604_v25, %v452_v27  ;;  %v3892_v42 = vpack.c.bf16 %v559_v31, %v559_v31 }
 0x2be   :  { %v464_v37 = vadd.f32 %v2874_v33, %v2604_v25  ;;  %2916 = vmatpush3.bf16.xpose.msra.mxu1 %v668_v29  ;;  %v455_v38 = vpop.f32.mrb[3].mxu0 }
 0x2bf   :  { %v456_v40 = vadd.f32 %v2604_v25, %v455_v38  ;;  %2921 = vmatprep.subr.bf16.mxu1 %v3579_v6  ;;  %v715_v44 = vsel %vm663_vm1, %v3892_v42, 0 }
 0x2c0   :  { %v3890_v41 = vpack.c.bf16 %v464_v37, %v461_v35 }
 0x2c1   :  { %v3894_v43 = vpack.c.bf16 %v456_v40, %v453_v39 }
 0x2c5   :  { %2918 = vmatmul.mubr.msk.bf16.vlgmr.msra.gmra.mrb[4].mxu1 %vm663_vm1, %v3894_v43 }
 0x2c6   :  { %2922 = vmatpush3.bf16.xpose.msra.mxu1 %v715_v44  ;;  %2923 = vmatprep.mubr.msk.bf16.mxu1 %vm3580_vm0, %v3579_v6 }
 0x2c7   :  { %2927 = vmatprep.subr.bf16.mxu1 %v3579_v6 }
 0x2cd   :  { %2924 = vmatmul.mubr.msk.bf16.vlgmr.msra.gmra.mrb[8].mxu1 %vm663_vm1, %v3890_v41 }
 0x2ce   :  { %2929 = vmatprep.mubr.msk.bf16.mxu1 %vm3580_vm0, %v3579_v6 }
 0x2db   :  { %v650_v46 = vpop.f32.mrb[4].mxu0 }
 0x2dc   :  { %v651_v47 = vadd.f32 %v3910_v45, %v650_v46  ;;  %v2913_v48 = vpop.f32.mrb[5].mxu0 }
 0x2dd   :  { %v653_v49 = vpop.f32.mrb[6].mxu0 }
 0x2de   :  { %v3913_v50 = vpack.c.bf16 %v651_v47, %v651_v47  ;;  %v2914_v51 = vpop.f32.mrb[7].mxu0  ;;  %v654_v31 = vadd.f32 %v3910_v45, %v653_v49 }
 0x2e0   :  { %v810_v52 = vsel %vm808_vm2, %v3913_v50, 0  ;;  %v3935_v38 = vpack.c.bf16 %v654_v31, %v654_v31 }
 0x2e1   :  { %2928 = vmatpush3.bf16.msra.mxu1 %v810_v52 }
 0x2e2   :  { %2933 = vmatprep.subr.bf16.mxu1 %v3579_v6 }
 0x398   :  { %v704_v53 = vpop.f32.mrb[4].mxu1 }
 0x399   :  { %v2919_v54 = vpop.f32.mrb[5].mxu1  ;;  %v759_v55 = vsel %vm758_vm3, %v704_v53, -inf }
 0x39a   :  { %760 = vmax.xlane.f32.xlu0 %v759_v55  ;;  %v707_v56 = vpop.f32.mrb[6].mxu1 }
 0x39b   :  { %v2920_v57 = vpop.f32.mrb[7].mxu1  ;;  %v762_v58 = vsel %vm758_vm3, %v707_v56, -inf }
 0x39c   :  { %763 = vmax.xlane.f32.xlu1 %v762_v58 }
 0x3a0   :  { %v751_v59 = vpop.f32.mrb[8].mxu1 }
 0x3a1   :  { %v2925_v60 = vpop.f32.mrb[9].mxu1  ;;  %v765_v61 = vsel %vm758_vm3, %v751_v59, -inf }
 0x3a2   :  { %766 = vmax.xlane.f32.xlu0 %v765_v61  ;;  %v754_v62 = vpop.f32.mrb[10].mxu1 }
 0x3a3   :  { %v2926_v63 = vpop.f32.mrb[11].mxu1  ;;  %v768_v0 = vsel %vm758_vm3, %v754_v62, -inf }
 0x3a4   :  { %769 = vmax.xlane.f32.xlu1 %v768_v0 }
 0x427   :  { %v761_v1 = vpop.xlane.xlu0 %760 }
 0x428   :  { %v771_v2 = vsub.f32 %v704_v53, %v761_v1 }
 0x429   :  { %v764_v3 = vpop.xlane.xlu1 %763 }
 0x42a   :  { %v775_v4 = vmul.f32 1.442695, %v771_v2  ;;  %v772_v7 = vsub.f32 %v707_v56, %v764_v3 }
 0x42c   :  { %3227 = vpow2.f32 %v775_v4  ;;  %v777_v8 = vmul.f32 1.442695, %v772_v7 }
 0x42e   :  { %3229 = vpow2.f32 %v777_v8 }
 0x42f   :  { %v767_v9 = vpop.xlane.xlu0 %766 }
 0x430   :  { %v773_v10 = vsub.f32 %v751_v59, %v767_v9 }
 0x431   :  { %v770_v11 = vpop.xlane.xlu1 %769 }
 0x432   :  { %v779_v12 = vmul.f32 1.442695, %v773_v10  ;;  %v774_v13 = vsub.f32 %v754_v62, %v770_v11 }
 0x434   :  { %3231 = vpow2.f32 %v779_v12  ;;  %v781_v14 = vmul.f32 1.442695, %v774_v13 }
 0x436   :  { %v3228_v15 = vpop.eup %3227  ;;  %3233 = vpow2.f32 %v781_v14 }
 0x437   :  { %v783_v16 = vsel %vm758_vm3, %v3228_v15, 0.0 }
 0x438   :  { %v3230_v17 = vpop.eup %3229  ;;  %784 = vadd.xlane.f32.xlu0 %v783_v16 }
 0x439   :  { %v786_v18 = vsel %vm758_vm3, %v3230_v17, 0.0 }
 0x43a   :  { %787 = vadd.xlane.f32.xlu1 %v786_v18 }
 0x43e   :  { %v3232_v19 = vpop.eup %3231 }
 0x43f   :  { %v789_v20 = vsel %vm758_vm3, %v3232_v19, 0.0 }
 0x440   :  { %v3234_v22 = vpop.eup %3233  ;;  %790 = vadd.xlane.f32.xlu0 %v789_v20 }
 0x441   :  { %v792_v23 = vsel %vm758_vm3, %v3234_v22, 0.0 }
 0x442   :  { %793 = vadd.xlane.f32.xlu1 %v792_v23 }
 0x453   :  { %901 = vrot.lane.b32.xlu1 %v3894_v43, %s3572_s0 }
 0x456   :  { %904 = vrot.lane.b32.xlu0 %v3882_v21, %s3572_s0 }
 0x457   :  { %957 = vrot.lane.b32.xlu1 %v3892_v42, %s3572_s0 }
 0x45b   :  { %954 = vrot.lane.b32.xlu1 %v3890_v41, %s3572_s0  ;;  %v857_v41 = vsel %vm808_vm2, %v3935_v38, 0 }
 0x4c5   :  { %v785_v25 = vpop.xlane.xlu0 %784 }
 0x4c6   :  { %3235 = vrcp.f32 %v785_v25 }
 0x4c7   :  { %v788_v27 = vpop.xlane.xlu1 %787 }
 0x4c8   :  { %3237 = vrcp.f32 %v788_v27 }
 0x4cd   :  { %v791_v29 = vpop.xlane.xlu0 %790 }
 0x4ce   :  { %3239 = vrcp.f32 %v791_v29 }
 0x4cf   :  { %v794_v33 = vpop.xlane.xlu1 %793 }
 0x4d0   :  { %v3236_v35 = vpop.eup %3235  ;;  %3241 = vrcp.f32 %v794_v33 }
 0x4d1   :  { %v799_v21 = vmul.f32 %v3236_v35, %v3228_v15  ;;  %v905_v46 = vpop.permute.xlu0 %904 }
 0x4d2   :  { %v3238_v37 = vpop.eup %3237  ;;  %v910_v49 = vsel %vm663_vm1, %v905_v46, 0 }
 0x4d3   :  { %v800_v39 = vmul.f32 %v3238_v37, %v3230_v17  ;;  %v902_v48 = vpop.permute.xlu1 %901 }
 0x4d5   :  { %v803_v40 = vpack.c.bf16 %v800_v39, %v799_v21 }
 0x4d7   :  { %2930 = vmatmul.mubr.msk.bf16.vlgmr.msra.gmra.mrb[12].mxu1 %vm758_vm3, %v803_v40  ;;  %v958_v51 = vpop.permute.xlu1 %957 }
 0x4d8   :  { %v3240_v42 = vpop.eup %3239  ;;  %2934 = vmatpush3.bf16.msra.mxu1 %v857_v41  ;;  %2935 = vmatprep.mubr.msk.bf16.mxu1 %vm3580_vm0, %v3579_v6  ;;  %v963_v52 = vsel %vm663_vm1, %v958_v51, 0 }
 0x4d9   :  { %2939 = vmatprep.subr.bf16.mxu1 %v3579_v6  ;;  %v801_v44 = vmul.f32 %v3240_v42, %v3232_v19 }
 0x4da   :  { %v3242_v43 = vpop.eup %3241 }
 0x4db   :  { %v802_v45 = vmul.f32 %v3242_v43, %v3234_v22  ;;  %v955_v53 = vpop.permute.xlu1 %954 }
 0x4dd   :  { %v804_v47 = vpack.c.bf16 %v802_v45, %v801_v44 }
 0x4df   :  { %2936 = vmatmul.mubr.msk.bf16.vlgmr.msra.gmra.mrb[16].mxu1 %vm758_vm3, %v804_v47 }
 0x4e0   :  { %2941 = vmatprep.mubr.msk.bf16.mxu1 %vm3580_vm0, %v3579_v6 }
 0x4e1   :  { %2940 = vmatpush3.bf16.xpose.msra.mxu1 %v910_v49 }
 0x4e2   :  { %2945 = vmatprep.subr.bf16.mxu1 %v3579_v6 }
 0x4e8   :  { %2942 = vmatmul.mubr.msk.bf16.vlgmr.msra.gmra.mrb[20].mxu1 %vm663_vm1, %v902_v48 }
 0x4e9   :  { %2946 = vmatpush3.bf16.xpose.msra.mxu1 %v963_v52  ;;  %2947 = vmatprep.mubr.msk.bf16.mxu1 %vm3580_vm0, %v3579_v6 }
 0x4ea   :  { %2951 = vmatprep.subr.bf16.mxu1 %v3579_v6 }
 0x4f0   :  { %2948 = vmatmul.mubr.msk.bf16.vlgmr.msra.gmra.mrb[24].mxu1 %vm663_vm1, %v955_v53 }
 0x4f1   :  { %2953 = vmatprep.mubr.msk.bf16.mxu1 %vm3580_vm0, %v3579_v6 }
 0x5aa   :  { %v3956_v54 = vpop.f32.mrb[12].mxu1 }
 0x5ab   :  { %v2931_v55 = vpop.f32.mrb[13].mxu1 }
 0x5ac   :  { %v3958_v56 = vpop.f32.mrb[14].mxu1 }
 0x5ad   :  { %v2932_v57 = vpop.f32.mrb[15].mxu1 }
 0x5b2   :  { %v3960_v58 = vpop.f32.mrb[16].mxu1 }
 0x5b3   :  { %v2937_v59 = vpop.f32.mrb[17].mxu1 }
 0x5b4   :  { %v3962_v60 = vpop.f32.mrb[18].mxu1 }
 0x5b5   :  { %v2938_v61 = vpop.f32.mrb[19].mxu1 }
 0x5b6   :  { %v3171_v61 = vld [vmem:[#allocation11] sm:$0xff]  }
 0x5b7   :  { %2963 = vmatprep.subr.bf16.mxu0 %v3171_v61 }
 0x5b8   :  { %2964 = vmatpush3.bf16.msra.mxu0 %v3171_v61 }
 0x5bb   :  { %v946_v62 = vpop.f32.mrb[20].mxu1 }
 0x5bc   :  { %v2943_v63 = vpop.f32.mrb[21].mxu1  ;;  %v1006_v0 = vsel %vm758_vm3, %v946_v62, -inf }
 0x5bd   :  { %1007 = vmax.xlane.f32.xlu0 %v1006_v0  ;;  %v949_v1 = vpop.f32.mrb[22].mxu1  ;;  %v3173_v63 = vld [vmem:[#allocation11 + $0x10] sm:$0xff]   ;;  %v3174_v0 = vld [vmem:[#allocation11 + $0x18] sm:$0xff]  }
 0x5be   :  { %v2944_v2 = vpop.f32.mrb[23].mxu1  ;;  %v1009_v3 = vsel %vm758_vm3, %v949_v1, -inf }
 0x5bf   :  { %1010 = vmax.xlane.f32.xlu1 %v1009_v3  ;;  %v3176_v2 = vld [vmem:[#allocation11 + $0x28] sm:$0xff]   ;;  %v3177_v3 = vld [vmem:[#allocation11 + $0x30] sm:$0xff]  }
 0x5c3   :  { %v999_v4 = vpop.f32.mrb[24].mxu1 }
 0x5c4   :  { %v2949_v7 = vpop.f32.mrb[25].mxu1  ;;  %v1012_v8 = vsel %vm758_vm3, %v999_v4, -inf }
 0x5c5   :  { %1013 = vmax.xlane.f32.xlu0 %v1012_v8  ;;  %v1002_v9 = vpop.f32.mrb[26].mxu1 }
 0x5c6   :  { %v2950_v10 = vpop.f32.mrb[27].mxu1  ;;  %v1015_v11 = vsel %vm758_vm3, %v1002_v9, -inf }
 0x5c9   :  { %1016 = vmax.xlane.f32.xlu0 %v1015_v11 }
 0x64a   :  { %v1008_v12 = vpop.xlane.xlu0 %1007 }
 0x64b   :  { %v1018_v13 = vsub.f32 %v946_v62, %v1008_v12  ;;  %v3172_v62 = vld [vmem:[#allocation11 + $0x8] sm:$0xff]  }
 0x64c   :  { %v1011_v14 = vpop.xlane.xlu1 %1010  ;;  %2965 = vmatprep.subr.bf16.mxu0 %v3172_v62 }
 0x64d   :  { %v1022_v15 = vmul.f32 1.442695, %v1018_v13  ;;  %v1019_v16 = vsub.f32 %v949_v1, %v1011_v14  ;;  %2966 = vmatpush3.bf16.msra.mxu0 %v3172_v62  ;;  %v3175_v1 = vld [vmem:[#allocation11 + $0x20] sm:$0xff]  }
 0x64e   :  { %2967 = vmatprep.subr.bf16.mxu0 %v3173_v63 }
 0x64f   :  { %3243 = vpow2.f32 %v1022_v15  ;;  %v1024_v17 = vmul.f32 1.442695, %v1019_v16 }
 0x651   :  { %3245 = vpow2.f32 %v1024_v17  ;;  %2968 = vmatpush3.bf16.msra.mxu0 %v3173_v63 }
 0x652   :  { %v1014_v18 = vpop.xlane.xlu0 %1013  ;;  %2969 = vmatprep.subr.bf16.mxu0 %v3174_v0 }
 0x653   :  { %v1020_v19 = vsub.f32 %v999_v4, %v1014_v18 }
 0x655   :  { %v1026_v20 = vmul.f32 1.442695, %v1020_v19  ;;  %2970 = vmatpush3.bf16.msra.mxu0 %v3174_v0 }
 0x656   :  { %v1017_v22 = vpop.xlane.xlu0 %1016  ;;  %2971 = vmatprep.subr.bf16.mxu0 %v3175_v1 }
 0x657   :  { %3247 = vpow2.f32 %v1026_v20  ;;  %v1021_v23 = vsub.f32 %v1002_v9, %v1017_v22  ;;  %v3178_v9 = vld [vmem:[#allocation11 + $0x38] sm:$0xff]  }
 0x659   :  { %v3244_v25 = vpop.eup %3243  ;;  %v1028_v27 = vmul.f32 1.442695, %v1021_v23  ;;  %2972 = vmatpush3.bf16.msra.mxu0 %v3175_v1 }
 0x65a   :  { %v1030_v29 = vsel %vm758_vm3, %v3244_v25, 0.0  ;;  %2973 = vmatprep.subr.bf16.mxu0 %v3176_v2 }
 0x65b   :  { %v3246_v31 = vpop.eup %3245  ;;  %3249 = vpow2.f32 %v1028_v27  ;;  %1031 = vadd.xlane.f32.xlu0 %v1030_v29 }
 0x65c   :  { %v1033_v33 = vsel %vm758_vm3, %v3246_v31, 0.0 }
 0x65d   :  { %1034 = vadd.xlane.f32.xlu1 %v1033_v33  ;;  %2974 = vmatpush3.bf16.msra.mxu0 %v3176_v2 }
 0x65e   :  { %2975 = vmatprep.subr.bf16.mxu0 %v3177_v3 }
 0x661   :  { %v3248_v35 = vpop.eup %3247  ;;  %2976 = vmatpush3.bf16.msra.mxu0 %v3177_v3 }
 0x662   :  { %v1036_v37 = vsel %vm758_vm3, %v3248_v35, 0.0  ;;  %2977 = vmatprep.subr.bf16.mxu0 %v3178_v9 }
 0x663   :  { %1037 = vadd.xlane.f32.xlu0 %v1036_v37 }
 0x665   :  { %v3250_v21 = vpop.eup %3249  ;;  %2978 = vmatpush3.bf16.msra.mxu0 %v3178_v9 }
 0x666   :  { %v1039_v39 = vsel %vm758_vm3, %v3250_v21, 0.0 }
 0x667   :  { %1040 = vadd.xlane.f32.xlu1 %v1039_v39 }
 0x678   :  { %1103 = vrot.lane.b32.xlu1 %v3935_v38, %s3572_s0 }
 0x679   :  { %1053 = vrot.lane.b32.xlu0 %v3913_v50, %s3572_s0 }
 0x6e8   :  { %v1032_v40 = vpop.xlane.xlu0 %1031 }
 0x6e9   :  { %3251 = vrcp.f32 %v1032_v40 }
 0x6ea   :  { %v1035_v41 = vpop.xlane.xlu1 %1034 }
 0x6eb   :  { %3253 = vrcp.f32 %v1035_v41 }
 0x6f0   :  { %v1038_v42 = vpop.xlane.xlu0 %1037 }
 0x6f1   :  { %3255 = vrcp.f32 %v1038_v42  ;;  %v3315_v42 = vld [vmem:[#allocation2] sm:$0xff] }
 0x6f3   :  { %v3252_v43 = vpop.eup %3251 }
 0x6f4   :  { %v1041_v44 = vpop.xlane.xlu1 %1040  ;;  %v1054_v45 = vpop.permute.xlu0 %1053  ;;  %v1046_v48 = vmul.f32 %v3252_v43, %v3244_v25 }
 0x6f5   :  { %v3254_v46 = vpop.eup %3253  ;;  %3257 = vrcp.f32 %v1041_v44  ;;  %v1059_v47 = vsel %vm808_vm2, %v1054_v45, 0 }
 0x6f6   :  { %v1047_v49 = vmul.f32 %v3254_v46, %v3246_v31  ;;  %2952 = vmatpush3.bf16.msra.mxu1 %v1059_v47 }
 0x6f7   :  { %2957 = vmatprep.subr.bf16.mxu1 %v3579_v6 }
 0x6f8   :  { %v1104_v38 = vpop.permute.xlu1 %1103  ;;  %v1050_v50 = vpack.c.bf16 %v1047_v49, %v1046_v48  ;;  %v3318_v48 = vld [vmem:[#allocation5 + $0x8] sm:$0xff] }
 0x6f9   :  { %v1109_v51 = vsel %vm808_vm2, %v1104_v38, 0  ;;  %v3179_v38 = vld [vmem:[#allocation13] ss:$8 sps:$4 sm:$0xff]  }
 0x6fa   :  { %2954 = vmatmul.mubr.msk.bf16.vlgmr.msra.gmra.mrb[28].mxu1 %vm758_vm3, %v1050_v50  ;;  %v4008_v50 = vld [vmem:[#allocation13 + $0x4] ss:$8 sps:$4 sm:$0xff]  }
 0x6fb   :  { %2958 = vmatpush3.bf16.msra.mxu1 %v1109_v51  ;;  %2959 = vmatprep.mubr.msk.bf16.mxu1 %vm3580_vm0, %v3579_v6  ;;  %v3256_v52 = vpop.eup %3255  ;;  %v3184_v51 = vld [vmem:[#allocation13 + $0x14] ss:$8 sps:$4 sm:$0xff]  }
 0x6fc   :  { %v1048_v55 = vmul.f32 %v3256_v52, %v3248_v35  ;;  %1438 = vmatprep.subr.bf16.mxu1 %v4008_v50  ;;  %v3182_v52 = vld [vmem:[#allocation13 + $0x10] ss:$8 sps:$4 sm:$0xff]  }
 0x6ff   :  { %v3258_v53 = vpop.eup %3257 }
 0x700   :  { %v1049_v57 = vmul.f32 %v3258_v53, %v3250_v21 }
 0x702   :  { %v1051_v59 = vpack.c.bf16 %v1049_v57, %v1048_v55 }
 0x704   :  { %2960 = vmatmul.mubr.msk.bf16.vlgmr.msra.gmra.mrb[32].mxu1 %vm758_vm3, %v1051_v59 }
 0x705   :  { %1439 = vmatpush1.bf16.msra.mxu1 %v3179_v38 }
 0x706   :  { %1440 = vmatprep.subr.bf16.mxu1 %v3184_v51 }
 0x709   :  { %1441 = vmatpush1.bf16.msra.mxu1 %v3182_v52 }
 0x7cd   :  { %v1095_v4 = vpop.f32.mrb[28].mxu1 }
 0x7ce   :  { %v2955_v7 = vpop.f32.mrb[29].mxu1 }
 0x7cf   :  { %v1098_v8 = vpop.f32.mrb[30].mxu1 }
 0x7d0   :  { %v3127_v10 = vpack.i.bf16 %v1098_v8, %v1095_v4  ;;  %v2956_v11 = vpop.f32.mrb[31].mxu1 }
 0x7d1   :  { %v4031_v11 = vld [vmem:[#allocation13 + $0x24] ss:$8 sps:$4 sm:$0xff]  }
 0x7d2   :  { %3128 = vrot.lane.b32.xlu1 %v3127_v10, %s3572_s0  ;;  %1442 = vmatprep.subr.bf16.mxu1 %v4031_v11 }
 0x7d7   :  { %v1145_v12 = vpop.f32.mrb[32].mxu1 }
 0x7d8   :  { %v2961_v13 = vpop.f32.mrb[33].mxu1 }
 0x7d9   :  { %v1148_v14 = vpop.f32.mrb[34].mxu1  ;;  %v4037_v13 = vld [vmem:[#allocation13 + $0x34] ss:$8 sps:$4 sm:$0xff]  }
 0x7da   :  { %v3132_v15 = vpack.i.bf16 %v1148_v14, %v1145_v12  ;;  %v2962_v16 = vpop.f32.mrb[35].mxu1  ;;  %v4033_v12 = vld [vmem:[#allocation13 + $0x20] ss:$8 sps:$4 sm:$0xff]   ;;  %v4039_v14 = vld [vmem:[#allocation13 + $0x30] ss:$8 sps:$4 sm:$0xff]  }
 0x7db   :  { %1443 = vmatpush1.bf16.msra.mxu1 %v4033_v12  ;;  %v4045_v16 = vld [vmem:[#allocation13 + $0x40] ss:$8 sps:$4 sm:$0xff]  }
 0x7dc   :  { %3133 = vrot.lane.b32.xlu1 %v3132_v15, %s3572_s0  ;;  %1444 = vmatprep.subr.bf16.mxu1 %v4037_v13  ;;  %v4043_v15 = vld [vmem:[#allocation13 + $0x44] ss:$8 sps:$4 sm:$0xff]  }
 0x7df   :  { %1445 = vmatpush1.bf16.msra.mxu1 %v4039_v14 }
 0x7e0   :  { %1446 = vmatprep.subr.bf16.mxu1 %v4043_v15 }
 0x7e3   :  { %1447 = vmatpush1.bf16.msra.mxu1 %v4045_v16 }
 0x844   :  { %v3129_v17 = vpop.permute.xlu1 %3128 }
 0x845   :  { %v3131_v18 = vunpack.i.h.bf16 %v3129_v17  ;;  %v3130_v19 = vunpack.i.l.bf16 %v3129_v17  ;;  %v4049_v17 = vld [vmem:[#allocation13 + $0x54] ss:$8 sps:$4 sm:$0xff]  }
 0x846   :  { %1448 = vmatprep.subr.bf16.mxu1 %v4049_v17 }
 0x847   :  { %v1168_v20 = vsel %vm663_vm1, %v3956_v54, %v3130_v19  ;;  %v1169_v22 = vsel %vm663_vm1, %v3958_v56, %v3131_v18  ;;  %v2639_v54 = vld [vmem:[%s4405_s9] ss:$0 sm:$0xff]  ;;  %v4051_v18 = vld [vmem:[#allocation13 + $0x50] ss:$8 sps:$4 sm:$0xff]   ;;  %v4055_v19 = vld [vmem:[#allocation13 + $0x64] ss:$8 sps:$4 sm:$0xff]  }
 0x848   :  { %v1172_v23 = vpack.c.bf16 %v1169_v22, %v1168_v20  ;;  %1449 = vmatpush1.bf16.msra.mxu1 %v4051_v18  ;;  %v4057_v20 = vld [vmem:[#allocation13 + $0x60] ss:$8 sps:$4 sm:$0xff]   ;;  %v4059_v22 = vld [vmem:[#allocation13 + $0x74] ss:$8 sps:$4 sm:$0xff]  }
 0x849   :  { %1450 = vmatprep.subr.bf16.mxu1 %v4055_v19 }
 0x84a   :  { %2979 = vmatprep.mubr.bf16.mxu0 %v1172_v23  ;;  %v4063_v23 = vld [vmem:[#allocation13 + $0x70] ss:$8 sps:$4 sm:$0xff]  }
 0x84c   :  { %1451 = vmatpush1.bf16.msra.mxu1 %v4057_v20 }
 0x84d   :  { %1452 = vmatprep.subr.bf16.mxu1 %v4059_v22 }
 0x84e   :  { %v3134_v25 = vpop.permute.xlu1 %3133 }
 0x84f   :  { %v3136_v27 = vunpack.i.h.bf16 %v3134_v25  ;;  %v3135_v29 = vunpack.i.l.bf16 %v3134_v25  ;;  %v3581_v25 = vmov 0  }
 0x850   :  { %1470 = vmatprep.mubr.bf16.mxu1 %v3581_v25  ;;  %1453 = vmatpush1.bf16.msra.mxu1 %v4063_v23 }
 0x851   :  { %v1171_v31 = vsel %vm663_vm1, %v3962_v60, %v3136_v27  ;;  %v1170_v33 = vsel %vm663_vm1, %v3960_v58, %v3135_v29  ;;  %v3316_v60 = vld [vmem:[#allocation5] sm:$0xff]  ;;  %v3317_v58 = vld [vmem:[#allocation2 + $0x8] sm:$0xff]  ;;  %2983 = vmatprep.subr.bf16.mxu1 %v3798_v5  ;;  %v4069_v27 = vld [vmem:[#allocation14 + $0x40] sm:$0xff]  }
 0x852   :  { %v1173_v35 = vpack.c.bf16 %v1171_v31, %v1170_v33  ;;  %v3204_v29 = vld [vmem:[#allocation14] sm:$0xff]   ;;  %v3205_v31 = vld [vmem:[#allocation14 + $0x48] sm:$0xff]   ;;  %2745 = vmatprep.subr.bf16.mxu0 %v4069_v27  ;;  %v4083_v5 = vld [vmem:[#allocation14 + $0x18] sm:$0xff]  }
 0x853   :  { %v4072_v33 = vld [vmem:[#allocation14 + $0x8] sm:$0xff]  }
 0x854   :  { %2980 = vmatmul.mubr.bf16.vlgmr.msra.gmra.mrb[8].mxu0 %v1173_v35  ;;  %v4074_v35 = vld [vmem:[#allocation14 + $0x50] sm:$0xff]  }
 0x855   :  { %2746 = vmatpush3.bf16.msra.mxu0 %v3204_v29 }
 0x856   :  { %2747 = vmatprep.subr.bf16.mxu0 %v3205_v31 }
 0x859   :  { %2748 = vmatpush3.bf16.msra.mxu0 %v4072_v33 }
 0x85a   :  { %2749 = vmatprep.subr.bf16.mxu0 %v4074_v35 }
 0x927   :  { %v2981_v37 = vpop.f32.mrb[8].mxu0 }
 0x928   :  { %v1262_v21 = vpop.f32.mrb[9].mxu0  ;;  %v1271_v41 = vadd.f32 %v2981_v37, %v2639_v54  ;;  %v4080_v37 = vld [vmem:[#allocation14 + $0x58] sm:$0xff]  }
 0x929   :  { %v1263_v56 = vadd.f32 %v2639_v54, %v1262_v21  ;;  %v2982_v39 = vpop.f32.mrb[10].mxu0  ;;  %v4086_v21 = vld [vmem:[#allocation14 + $0x60] sm:$0xff]  }
 0x92a   :  { %v1265_v40 = vpop.f32.mrb[11].mxu0  ;;  %v4001_v46 = vadd.f32 %v3317_v58, %v1271_v41  ;;  %v1274_v47 = vadd.f32 %v2982_v39, %v2639_v54  ;;  %v4092_v39 = vld [vmem:[#allocation14 + $0x68] sm:$0xff]  }
 0x92b   :  { %v3996_v43 = vadd.f32 %v3315_v42, %v1263_v56  ;;  %v1266_v44 = vadd.f32 %v2639_v54, %v1265_v40  ;;  %v4077_v54 = vld [vmem:[#allocation14 + $0x10] sm:$0xff]   ;;  %v4089_v56 = vld [vmem:[#allocation14 + $0x20] sm:$0xff]  }
 0x92c   :  { %v4005_v49 = vadd.f32 %v3318_v48, %v1274_v47  ;;  %2750 = vmatpush3.bf16.msra.mxu0 %v4077_v54 }
 0x92d   :  { %v3998_v45 = vadd.f32 %v3316_v60, %v1266_v44  ;;  %1281 = vadd.xlane.f32.xlu0 %v3996_v43  ;;  %2751 = vmatprep.subr.bf16.mxu0 %v4080_v37 }
 0x92f   :  { %1283 = vadd.xlane.f32.xlu1 %v3998_v45 }
 0x930   :  { %2752 = vmatpush3.bf16.msra.mxu0 %v4083_v5 }
 0x931   :  { %1285 = vadd.xlane.f32.xlu0 %v4001_v46  ;;  %2753 = vmatprep.subr.bf16.mxu0 %v4086_v21 }
 0x934   :  { %2754 = vmatpush3.bf16.msra.mxu0 %v4089_v56 }
 0x935   :  { %1287 = vadd.xlane.f32.xlu0 %v4005_v49  ;;  %2755 = vmatprep.subr.bf16.mxu0 %v4092_v39 }
 0x9ba   :  { %v1282_v53 = vpop.xlane.xlu0 %1281 }
 0x9bb   :  { %v1289_v55 = vmul.f32 0.0078125, %v1282_v53 }
 0x9bc   :  { %v1284_v57 = vpop.xlane.xlu1 %1283 }
 0x9bd   :  { %v4012_v59 = vsub.f32 %v3996_v43, %v1289_v55  ;;  %v1290_v61 = vmul.f32 0.0078125, %v1284_v57  ;;  %v2648_v57 = vld [vmem:[%s4408_s12] ss:$0 sm:$0xff] }
 0x9be   :  { %v1286_v62 = vpop.xlane.xlu0 %1285 }
 0x9bf   :  { %v4015_v63 = vsub.f32 %v3998_v45, %v1290_v61  ;;  %v1291_v0 = vmul.f32 0.0078125, %v1286_v62  ;;  %v1297_v1 = vmul.f32 %v4012_v59, %v4012_v59 }
 0x9c1   :  { %v4020_v2 = vsub.f32 %v4001_v46, %v1291_v0  ;;  %1301 = vadd.xlane.f32.xlu0 %v1297_v1  ;;  %v1298_v3 = vmul.f32 %v4015_v63, %v4015_v63 }
 0x9c2   :  { %v1288_v4 = vpop.xlane.xlu0 %1287 }
 0x9c3   :  { %v1292_v7 = vmul.f32 0.0078125, %v1288_v4  ;;  %1303 = vadd.xlane.f32.xlu1 %v1298_v3  ;;  %v1299_v8 = vmul.f32 %v4020_v2, %v4020_v2  ;;  %v2649_v4 = vld [vmem:[%s4409_s13] ss:$0 sm:$0xff] }
 0x9c5   :  { %v4027_v9 = vsub.f32 %v4005_v49, %v1292_v7  ;;  %1305 = vadd.xlane.f32.xlu0 %v1299_v8 }
 0x9c7   :  { %v1300_v10 = vmul.f32 %v4027_v9, %v4027_v9 }
 0x9c9   :  { %1307 = vadd.xlane.f32.xlu1 %v1300_v10 }
 0xa4e   :  { %v1302_v40 = vpop.xlane.xlu0 %1301 }
 0xa4f   :  { %v1309_v41 = vmul.f32 0.0078125, %v1302_v40 }
 0xa50   :  { %v1304_v42 = vpop.xlane.xlu1 %1303 }
 0xa51   :  { %v1313_v44 = vadd.f32 1e-05, %v1309_v41  ;;  %v1310_v60 = vmul.f32 0.0078125, %v1304_v42 }
 0xa52   :  { %v1306_v58 = vpop.xlane.xlu0 %1305 }
 0xa53   :  { %3259 = vrsqrt.f32 %v1313_v44  ;;  %v1314_v47 = vadd.f32 1e-05, %v1310_v60  ;;  %v1311_v48 = vmul.f32 0.0078125, %v1306_v58 }
 0xa55   :  { %3261 = vrsqrt.f32 %v1314_v47  ;;  %v1315_v38 = vadd.f32 1e-05, %v1311_v48 }
 0xa56   :  { %v1308_v51 = vpop.xlane.xlu1 %1307 }
 0xa57   :  { %3263 = vrsqrt.f32 %v1315_v38  ;;  %v1312_v52 = vmul.f32 0.0078125, %v1308_v51 }
 0xa59   :  { %v1316_v53 = vadd.f32 1e-05, %v1312_v52 }
 0xa5b   :  { %3265 = vrsqrt.f32 %v1316_v53 }
 0xa5d   :  { %v3260_v55 = vpop.eup %3259 }
 0xa5e   :  { %v1321_v61 = vmul.f32 %v3260_v55, %v4012_v59 }
 0xa5f   :  { %v3262_v62 = vpop.eup %3261 }
 0xa60   :  { %v1322_v0 = vmul.f32 %v3262_v62, %v4015_v63  ;;  %v1331_v1 = vmul.f32 %v2648_v57, %v1321_v61  ;;  %v3319_v63 = vld [vmem:[#allocation7] sm:$0xff]  }
 0xa61   :  { %v3264_v3 = vpop.eup %3263 }
 0xa62   :  { %v1332_v7 = vmul.f32 %v2648_v57, %v1322_v0  ;;  %v1341_v8 = vadd.f32 %v2649_v4, %v1331_v1  ;;  %v1323_v29 = vmul.f32 %v3264_v3, %v4020_v2 }
 0xa64   :  { %v1342_v10 = vadd.f32 %v2649_v4, %v1332_v7  ;;  %v1333_v59 = vmul.f32 %v2648_v57, %v1323_v29 }
 0xa65   :  { %v3266_v31 = vpop.eup %3265 }
 0xa66   :  { %v1345_v40 = vpack.c.bf16 %v1342_v10, %v1341_v8  ;;  %v1324_v41 = vmul.f32 %v3266_v31, %v4027_v9  ;;  %v1343_v60 = vadd.f32 %v2649_v4, %v1333_v59  ;;  %v286_v9 = vld [vmem:[%s4411_s15] sm:$0x3] }
 0xa68   :  { %1471 = vmatmul.mubr.bf16.vlgmr.msra.gmra.mrb[36].mxu1 %v1345_v40  ;;  %v1334_v42 = vmul.f32 %v2648_v57, %v1324_v41 }
 0xa69   :  { %1480 = vmatprep.mubr.bf16.mxu1 %v3581_v25  ;;  %2984 = vmatpush3.bf16.msra.mxu1 %v3319_v63 }
 0xa6a   :  { %v1344_v44 = vadd.f32 %v2649_v4, %v1334_v42  ;;  %2985 = vmatprep.subr.bf16.mxu1 %v3820_v24 }
 0xa6c   :  { %v1346_v58 = vpack.c.bf16 %v1344_v44, %v1343_v60  ;;  %v3320_v60 = vld [vmem:[#allocation8] sm:$0xff]  }
 0xa6d   :  { %2986 = vmatpush3.bf16.msra.mxu1 %v3820_v24  ;;  %v4122_v24 = vld [vmem:[#allocation14 + $0x28] sm:$0xff]  }
 0xa6e   :  { %2987 = vmatprep.subr.bf16.mxu1 %v3825_v26  ;;  %2756 = vmatpush3.bf16.msra.mxu0 %v4122_v24 }
 0xa70   :  { %1481 = vmatmul.mubr.bf16.gmra.mrb[40].mxu1 %v1346_v58 }
 0xa71   :  { %2988 = vmatpush3.bf16.msra.mxu1 %v3825_v26  ;;  %v4125_v26 = vld [vmem:[#allocation14 + $0x70] sm:$0xff]  }
 0xa72   :  { %2989 = vmatprep.subr.bf16.mxu1 %v3830_v28  ;;  %2757 = vmatprep.subr.bf16.mxu0 %v4125_v26 }
 0xa75   :  { %2990 = vmatpush3.bf16.msra.mxu1 %v3830_v28  ;;  %v4127_v28 = vld [vmem:[#allocation14 + $0x30] sm:$0xff]  }
 0xa76   :  { %2991 = vmatprep.subr.bf16.mxu1 %v3835_v30  ;;  %2758 = vmatpush3.bf16.msra.mxu0 %v4127_v28 }
 0xa79   :  { %2992 = vmatpush3.bf16.msra.mxu1 %v3835_v30  ;;  %v4131_v30 = vld [vmem:[#allocation14 + $0x78] sm:$0xff]  }
 0xa7a   :  { %2993 = vmatprep.subr.bf16.mxu1 %v3837_v32  ;;  %2759 = vmatprep.subr.bf16.mxu0 %v4131_v30 }
 0xa7d   :  { %2994 = vmatpush3.bf16.msra.mxu1 %v3837_v32  ;;  %v4133_v32 = vld [vmem:[#allocation14 + $0x38] sm:$0xff]  }
 0xa7e   :  { %2995 = vmatprep.subr.bf16.mxu1 %v3845_v34  ;;  %2760 = vmatpush3.bf16.msra.mxu0 %v4133_v32 }
 0xa7f   :  { %3003 = vmatprep.subr.bf16.mxu0 %v3579_v6 }
 0xa81   :  { %2996 = vmatpush3.bf16.msra.mxu1 %v3845_v34  ;;  %v1348_v34 = vlaneseq }
 0xa82   :  { %2997 = vmatprep.subr.bf16.mxu1 %v3850_v36 }
 0xa85   :  { %2998 = vmatpush3.bf16.msra.mxu1 %v3850_v36  ;;  %v1349_v36 = vshrl.u32 %v1348_v34, 7 }
 0xa86   :  { %3023 = vmatprep.subr.bf16.mxu1 %v3579_v6 }
 0xa87   :  { %v1350_v2 = vsub.s32 0, %v1349_v36  ;;  %v1354_v47 = vsub.s32 1, %v1349_v36 }
 0xa89   :  { %v4141_v48 = vrot.slane %v286_v9, %v1350_v2  ;;  %v4143_v38 = vrot.slane %v286_v9, %v1354_v47 }
 0xb3b   :  { %v1472_v51 = vpop.f32.mrb[36].mxu1 }
 0xb3c   :  { %v1473_v52 = vadd.f32 %v1472_v51, %v4141_v48  ;;  %v1474_v53 = vpop.f32.mrb[37].mxu1  ;;  %v3321_v51 = vld [vmem:[#allocation8 + $0x8] sm:$0xff]  }
 0xb3d   :  { %v1475_v55 = vadd.f32 %v1474_v53, %v4143_v38  ;;  %v1476_v57 = vpop.f32.mrb[38].mxu1  ;;  %v3323_v53 = vld [vmem:[#allocation8 + $0x18] sm:$0xff]  }
 0xb3e   :  { %v1477_v61 = vadd.f32 %v1476_v57, %v4141_v48  ;;  %v1478_v62 = vpop.f32.mrb[39].mxu1  ;;  %v1491_v1 = vmax.f32 %v1473_v52, 0.0  ;;  %v3322_v52 = vld [vmem:[#allocation8 + $0x10] sm:$0xff]   ;;  %v3325_v57 = vld [vmem:[#allocation8 + $0x28] sm:$0xff]  }
 0xb3f   :  { %v1479_v0 = vadd.f32 %v1478_v62, %v4143_v38  ;;  %v1492_v4 = vmax.f32 %v1475_v55, 0.0  ;;  %v3324_v55 = vld [vmem:[#allocation8 + $0x20] sm:$0xff]   ;;  %v3327_v62 = vld [vmem:[#allocation8 + $0x38] sm:$0xff]  }
 0xb40   :  { %v1493_v3 = vmax.f32 %v1477_v61, 0.0  ;;  %v3326_v61 = vld [vmem:[#allocation8 + $0x30] sm:$0xff]  }
 0xb41   :  { %v1494_v7 = vmax.f32 %v1479_v0, 0.0 }
 0xb42   :  { %v1499_v8 = vpack.c.bf16 %v1493_v3, %v1491_v1 }
 0xb43   :  { %v1500_v10 = vpack.c.bf16 %v1494_v7, %v1492_v4  ;;  %v1482_v29 = vpop.f32.mrb[40].mxu1 }
 0xb44   :  { %v1483_v31 = vadd.f32 %v1482_v29, %v4141_v48  ;;  %v1484_v40 = vpop.f32.mrb[41].mxu1 }
 0xb45   :  { %v1485_v41 = vadd.f32 %v1484_v40, %v4143_v38  ;;  %v1486_v59 = vpop.f32.mrb[42].mxu1  ;;  %1637 = vmatprep.mubr.bf16.mxu0 %v1500_v10  ;;  %v4166_v10 = vld [vmem:[%s4430_s16] ss:$0 sm:$0xff] }
 0xb46   :  { %v1487_v42 = vadd.f32 %v1486_v59, %v4141_v48  ;;  %v1488_v63 = vpop.f32.mrb[43].mxu1  ;;  %1638 = vmatmul.mubr.bf16.vlgmr.msra.gmra.mrb[12].mxu0 %v1499_v8  ;;  %v1495_v58 = vmax.f32 %v1483_v31, 0.0 }
 0xb47   :  { %v1489_v44 = vadd.f32 %v1488_v63, %v4143_v38  ;;  %3004 = vmatpush3.bf16.msra.mxu0 %v3320_v60  ;;  %v1496_v36 = vmax.f32 %v1485_v41, 0.0 }
 0xb48   :  { %v1497_v34 = vmax.f32 %v1487_v42, 0.0  ;;  %3005 = vmatprep.subr.bf16.mxu0 %v3579_v6 }
 0xb49   :  { %v1498_v2 = vmax.f32 %v1489_v44, 0.0 }
 0xb4a   :  { %v1501_v9 = vpack.c.bf16 %v1497_v34, %v1495_v58 }
 0xb4b   :  { %v1502_v47 = vpack.c.bf16 %v1498_v2, %v1496_v36  ;;  %3006 = vmatpush3.bf16.msra.mxu0 %v3321_v51 }
 0xb4c   :  { %3007 = vmatprep.subr.bf16.mxu0 %v3579_v6 }
 0xb4d   :  { %1645 = vmatprep.mubr.bf16.mxu0 %v1502_v47 }
 0xb4e   :  { %1646 = vmatmul.mubr.bf16.gmra.mrb[16].mxu0 %v1501_v9 }
 0xb4f   :  { %3008 = vmatpush3.bf16.msra.mxu0 %v3322_v52  ;;  %3019 = vmatprep.mubr.msk.bf16.mxu0 %vm3580_vm0, %v3579_v6 }
 0xb50   :  { %3009 = vmatprep.subr.bf16.mxu0 %v3579_v6 }
 0xb53   :  { %3010 = vmatpush3.bf16.msra.mxu0 %v3323_v53 }
 0xb54   :  { %3011 = vmatprep.subr.bf16.mxu0 %v3579_v6 }
 0xb57   :  { %3012 = vmatpush3.bf16.msra.mxu0 %v3324_v55 }
 0xb58   :  { %3013 = vmatprep.subr.bf16.mxu0 %v3579_v6 }
 0xb5b   :  { %3014 = vmatpush3.bf16.msra.mxu0 %v3325_v57 }
 0xb5c   :  { %3015 = vmatprep.subr.bf16.mxu0 %v3579_v6 }
 0xb5f   :  { %3016 = vmatpush3.bf16.msra.mxu0 %v3326_v61 }
 0xb60   :  { %3017 = vmatprep.subr.bf16.mxu0 %v3579_v6 }
 0xb63   :  { %3018 = vmatpush3.bf16.msra.mxu0 %v3327_v62 }
 0xb64   :  { %3043 = vmatprep.subr.bf16.mxu0 %v3579_v6 }
 0xc19   :  { %v2761_v0 = vpop.f32.mrb[12].mxu0 }
 0xc1a   :  { %v2762_v1 = vpop.f32.mrb[13].mxu0 }
 0xc1b   :  { %v2763_v3 = vadd.f32 %v2762_v1, %v2761_v0  ;;  %v2764_v4 = vpop.f32.mrb[14].mxu0 }
 0xc1c   :  { %v2765_v7 = vpop.f32.mrb[15].mxu0 }
 0xc1d   :  { %v2766_v8 = vadd.f32 %v2765_v7, %v2764_v4  ;;  %v1640_v31 = vadd.f32 %v2763_v3, %v4166_v10 }
 0xc1f   :  { %v1643_v29 = vadd.f32 %v2766_v8, %v4166_v10  ;;  %v4175_v58 = vadd.f32 %v1640_v31, %v3996_v43 }
 0xc21   :  { %v2767_v40 = vpop.f32.mrb[16].mxu0  ;;  %v4171_v41 = vadd.f32 %v1643_v29, %v3998_v45 }
 0xc22   :  { %v2768_v59 = vpop.f32.mrb[17].mxu0 }
 0xc23   :  { %v2769_v42 = vadd.f32 %v2768_v59, %v2767_v40  ;;  %v2770_v63 = vpop.f32.mrb[18].mxu0  ;;  %1660 = vadd.xlane.f32.xlu0 %v4171_v41 }
 0xc24   :  { %v2771_v44 = vpop.f32.mrb[19].mxu0 }
 0xc25   :  { %v2772_v60 = vadd.f32 %v2771_v44, %v2770_v63  ;;  %v1648_v36 = vadd.f32 %v2769_v42, %v4166_v10 }
 0xc27   :  { %v1651_v34 = vadd.f32 %v2772_v60, %v4166_v10  ;;  %1658 = vadd.xlane.f32.xlu0 %v4175_v58  ;;  %v4185_v45 = vadd.f32 %v1648_v36, %v4001_v46 }
 0xc29   :  { %v4181_v2 = vadd.f32 %v1651_v34, %v4005_v49 }
 0xc2b   :  { %1664 = vadd.xlane.f32.xlu1 %v4181_v2 }
 0xc2f   :  { %1662 = vadd.xlane.f32.xlu1 %v4185_v45 }
 0xcb0   :  { %v1661_v9 = vpop.xlane.xlu0 %1660 }
 0xcb1   :  { %v1667_v47 = vmul.f32 0.0078125, %v1661_v9 }
 0xcb3   :  { %v1671_v43 = vsub.f32 %v4171_v41, %v1667_v47 }
 0xcb4   :  { %v1659_v51 = vpop.xlane.xlu0 %1658 }
 0xcb5   :  { %v1666_v52 = vmul.f32 0.0078125, %v1659_v51  ;;  %v1675_v53 = vmul.f32 %v1671_v43, %v1671_v43 }
 0xcb7   :  { %v1670_v55 = vsub.f32 %v4175_v58, %v1666_v52  ;;  %1680 = vadd.xlane.f32.xlu0 %v1675_v53  ;;  %v3328_v53 = vld [vmem:[%s4406_s10] ss:$0 sm:$0xff] }
 0xcb8   :  { %v1665_v57 = vpop.xlane.xlu1 %1664 }
 0xcb9   :  { %v1669_v49 = vmul.f32 0.0078125, %v1665_v57  ;;  %v1674_v61 = vmul.f32 %v1670_v55, %v1670_v55 }
 0xcbb   :  { %v1673_v62 = vsub.f32 %v4181_v2, %v1669_v49  ;;  %1678 = vadd.xlane.f32.xlu0 %v1674_v61 }
 0xcbc   :  { %v1663_v46 = vpop.xlane.xlu1 %1662 }
 0xcbd   :  { %v1668_v0 = vmul.f32 0.0078125, %v1663_v46  ;;  %v1677_v1 = vmul.f32 %v1673_v62, %v1673_v62 }
 0xcbf   :  { %v1672_v3 = vsub.f32 %v4185_v45, %v1668_v0  ;;  %1684 = vadd.xlane.f32.xlu1 %v1677_v1  ;;  %v3329_v0 = vld [vmem:[%s4407_s11] ss:$0 sm:$0xff] }
 0xcc1   :  { %v1676_v4 = vmul.f32 %v1672_v3, %v1672_v3 }
 0xcc3   :  { %1682 = vadd.xlane.f32.xlu1 %v1676_v4 }
 0xd44   :  { %v1681_v7 = vpop.xlane.xlu0 %1680 }
 0xd45   :  { %v1687_v8 = vmul.f32 0.0078125, %v1681_v7 }
 0xd47   :  { %v1691_v29 = vadd.f32 1e-05, %v1687_v8 }
 0xd48   :  { %v1679_v31 = vpop.xlane.xlu0 %1678 }
 0xd49   :  { %3267 = vrsqrt.f32 %v1691_v29  ;;  %v1686_v40 = vmul.f32 0.0078125, %v1679_v31 }
 0xd4b   :  { %v1690_v59 = vadd.f32 1e-05, %v1686_v40 }
 0xd4c   :  { %v1685_v42 = vpop.xlane.xlu1 %1684 }
 0xd4d   :  { %3269 = vrsqrt.f32 %v1690_v59  ;;  %v1689_v63 = vmul.f32 0.0078125, %v1685_v42  ;;  %v3330_v42 = vld [vmem:[#allocation10] sm:$0xff]  }
 0xd4f   :  { %v1693_v44 = vadd.f32 1e-05, %v1689_v63  ;;  %v3331_v63 = vld [vmem:[#allocation10 + $0x8] sm:$0xff]  }
 0xd50   :  { %v1683_v60 = vpop.xlane.xlu1 %1682 }
 0xd51   :  { %3271 = vrsqrt.f32 %v1693_v44  ;;  %v1688_v34 = vmul.f32 0.0078125, %v1683_v60  ;;  %v3333_v44 = vld [vmem:[#allocation10 + $0x18] sm:$0xff]   ;;  %v3334_v60 = vld [vmem:[#allocation10 + $0x20] sm:$0xff]  }
 0xd53   :  { %v3268_v36 = vpop.eup %3267  ;;  %v1692_v9 = vadd.f32 1e-05, %v1688_v34  ;;  %v3335_v34 = vld [vmem:[#allocation10 + $0x28] sm:$0xff]  }
 0xd54   :  { %v1699_v47 = vmul.f32 %v3268_v36, %v1671_v43  ;;  %v3336_v36 = vld [vmem:[#allocation10 + $0x30] sm:$0xff]  }
 0xd55   :  { %3273 = vrsqrt.f32 %v1692_v9  ;;  %v3337_v9 = vld [vmem:[#allocation10 + $0x38] sm:$0xff]  }
 0xd56   :  { %v1703_v57 = vmul.f32 %v3328_v53, %v1699_v47 }
 0xd57   :  { %v3270_v51 = vpop.eup %3269 }
 0xd58   :  { %v1698_v52 = vmul.f32 %v3270_v51, %v1670_v55  ;;  %v1707_v4 = vadd.f32 %v3329_v0, %v1703_v57  ;;  %v3338_v51 = vld [vmem:[%s4401_s5] ss:$0 sm:$0xff] }
 0xd5a   :  { %v1702_v49 = vmul.f32 %v3328_v53, %v1698_v52 }
 0xd5b   :  { %v3272_v61 = vpop.eup %3271 }
 0xd5c   :  { %v1701_v46 = vmul.f32 %v3272_v61, %v1673_v62  ;;  %v1706_v1 = vadd.f32 %v3329_v0, %v1702_v49 }
 0xd5e   :  { %v1705_v7 = vmul.f32 %v3328_v53, %v1701_v46  ;;  %v1710_v8 = vpack.c.bf16 %v1707_v4, %v1706_v1 }
 0xd5f   :  { %v3274_v43 = vpop.eup %3273 }
 0xd60   :  { %v1700_v29 = vmul.f32 %v3274_v43, %v1672_v3  ;;  %v1709_v31 = vadd.f32 %v3329_v0, %v1705_v7  ;;  %2999 = vmatprep.mubr.bf16.mxu1 %v1710_v8  ;;  %v3332_v3 = vld [vmem:[#allocation10 + $0x10] sm:$0xff]  }
 0xd62   :  { %v1704_v55 = vmul.f32 %v3328_v53, %v1700_v29  ;;  %v1712_v40 = vpack.c.bf16 %v1709_v31, %v1707_v4  ;;  %v3339_v29 = vld [vmem:[%s4399_s3] ss:$0 sm:$0xff] }
 0xd64   :  { %3020 = vmatmul.mubr.bf16.vlgmr.msra.gmra.mrb[20].mxu0 %v1712_v40  ;;  %v1708_v59 = vadd.f32 %v3329_v0, %v1704_v55 }
 0xd65   :  { %3045 = vmatprep.mubr.msk.bf16.mxu0 %vm3580_vm0, %v3579_v6 }
 0xd66   :  { %v1711_v62 = vpack.c.bf16 %v1709_v31, %v1708_v59 }
 0xd68   :  { %3000 = vmatmul.mubr.bf16.vlgmr.msra.gmra.mrb[44].mxu1 %v1711_v62 }
 0xd69   :  { %3024 = vmatpush3.bf16.msra.mxu1 %v3330_v42  ;;  %3039 = vmatprep.mubr.msk.bf16.mxu1 %vm3580_vm0, %v3579_v6 }
 0xd6a   :  { %3025 = vmatprep.subr.bf16.mxu1 %v3579_v6 }
 0xd6d   :  { %3026 = vmatpush3.bf16.msra.mxu1 %v3331_v63 }
 0xd6e   :  { %3027 = vmatprep.subr.bf16.mxu1 %v3579_v6 }
 0xd71   :  { %3028 = vmatpush3.bf16.msra.mxu1 %v3332_v3 }
 0xd72   :  { %3029 = vmatprep.subr.bf16.mxu1 %v3579_v6 }
 0xd75   :  { %3030 = vmatpush3.bf16.msra.mxu1 %v3333_v44  ;;  %v3340_v44 = vld [vmem:[%s4403_s7] ss:$0 sm:$0xff] }
 0xd76   :  { %3031 = vmatprep.subr.bf16.mxu1 %v3579_v6 }
 0xd79   :  { %3032 = vmatpush3.bf16.msra.mxu1 %v3334_v60 }
 0xd7a   :  { %3033 = vmatprep.subr.bf16.mxu1 %v3579_v6 }
 0xd7d   :  { %3034 = vmatpush3.bf16.msra.mxu1 %v3335_v34 }
 0xd7e   :  { %3035 = vmatprep.subr.bf16.mxu1 %v3579_v6 }
 0xd81   :  { %3036 = vmatpush3.bf16.msra.mxu1 %v3336_v36 }
 0xd82   :  { %3037 = vmatprep.subr.bf16.mxu1 %v3579_v6 }
 0xd85   :  { %3038 = vmatpush3.bf16.msra.mxu1 %v3337_v9 }
 0xd86   :  { %3049 = vmatprep.subr.bf16.mxu1 %v3579_v6 }
 0xd88   :  { %3040 = vmatmul.mubr.bf16.vlgmr.msra.gmra.mrb[48].mxu1 %v1712_v40 }
 0xd89   :  { %3051 = vmatprep.mubr.msk.bf16.mxu1 %vm3580_vm0, %v3579_v6 }
 0xe37   :  { %v1796_v47 = vpop.f32.mrb[20].mxu0 }
 0xe38   :  { %v1797_v52 = vadd.f32 %v3338_v51, %v1796_v47  ;;  %v3021_v53 = vpop.f32.mrb[21].mxu0 }
 0xe39   :  { %v1799_v57 = vpop.f32.mrb[22].mxu0 }
 0xe3a   :  { %v4215_v49 = vpack.c.bf16 %v1797_v52, %v1797_v52  ;;  %v1800_v61 = vadd.f32 %v3338_v51, %v1799_v57  ;;  %v3022_v46 = vpop.f32.mrb[23].mxu0 }
 0xe3b   :  { %v3001_v0 = vpop.f32.mrb[44].mxu1 }
 0xe3c   :  { %v1854_v1 = vsel %vm663_vm1, %v4215_v49, 0  ;;  %v4219_v4 = vpack.c.bf16 %v1800_v61, %v1800_v61  ;;  %v1747_v7 = vpop.f32.mrb[45].mxu1  ;;  %v1756_v31 = vadd.f32 %v3339_v29, %v3001_v0 }
 0xe3d   :  { %v3002_v8 = vpop.f32.mrb[46].mxu1  ;;  %3044 = vmatpush3.bf16.xpose.msra.mxu0 %v1854_v1  ;;  %v1748_v59 = vadd.f32 %v3339_v29, %v1747_v7 }
 0xe3e   :  { %v1901_v43 = vsel %vm663_vm1, %v4219_v4, 0  ;;  %v1759_v55 = vadd.f32 %v3339_v29, %v3002_v8  ;;  %v1750_v40 = vpop.f32.mrb[47].mxu1  ;;  %3055 = vmatprep.subr.bf16.mxu0 %v3579_v6 }
 0xe3f   :  { %v1751_v62 = vadd.f32 %v3339_v29, %v1750_v40  ;;  %3050 = vmatpush3.bf16.xpose.msra.mxu1 %v1901_v43 }
 0xe40   :  { %v4227_v42 = vpack.c.bf16 %v1759_v55, %v1756_v31  ;;  %3061 = vmatprep.subr.bf16.mxu1 %v3579_v6 }
 0xe41   :  { %v4230_v63 = vpack.c.bf16 %v1751_v62, %v1748_v59 }
 0xe44   :  { %3046 = vmatmul.mubr.msk.bf16.vlgmr.msra.gmra.mrb[24].mxu0 %vm663_vm1, %v4230_v63 }
 0xe45   :  { %3057 = vmatprep.mubr.msk.bf16.mxu0 %vm3580_vm0, %v3579_v6 }
 0xe46   :  { %3052 = vmatmul.mubr.msk.bf16.vlgmr.msra.gmra.mrb[52].mxu1 %vm663_vm1, %v4227_v42 }
 0xe47   :  { %3063 = vmatprep.mubr.msk.bf16.mxu1 %vm3580_vm0, %v3579_v6 }
 0xe5b   :  { %v1837_v3 = vpop.f32.mrb[48].mxu1 }
 0xe5c   :  { %v1838_v60 = vadd.f32 %v3340_v44, %v1837_v3  ;;  %v3041_v34 = vpop.f32.mrb[49].mxu1 }
 0xe5d   :  { %v1840_v36 = vpop.f32.mrb[50].mxu1 }
 0xe5e   :  { %v4243_v9 = vpack.c.bf16 %v1838_v60, %v1838_v60  ;;  %v1841_v47 = vadd.f32 %v3340_v44, %v1840_v36  ;;  %v3042_v51 = vpop.f32.mrb[51].mxu1 }
 0xe60   :  { %v1994_v52 = vsel %vm808_vm2, %v4243_v9, 0  ;;  %v4247_v53 = vpack.c.bf16 %v1841_v47, %v1841_v47 }
 0xe61   :  { %3056 = vmatpush3.bf16.msra.mxu0 %v1994_v52 }
 0xe62   :  { %v2041_v57 = vsel %vm808_vm2, %v4247_v53, 0  ;;  %3067 = vmatprep.subr.bf16.mxu0 %v3579_v6 }
 0xe63   :  { %3062 = vmatpush3.bf16.msra.mxu1 %v2041_v57 }
 0xe64   :  { %3073 = vmatprep.subr.bf16.mxu1 %v3579_v6 }
 0xf17   :  { %v1890_v61 = vpop.f32.mrb[24].mxu0 }
 0xf18   :  { %v3047_v46 = vpop.f32.mrb[25].mxu0  ;;  %v1944_v0 = vsel %vm758_vm3, %v1890_v61, -inf }
 0xf19   :  { %v1937_v1 = vpop.f32.mrb[52].mxu1  ;;  %1945 = vmax.xlane.f32.xlu0 %v1944_v0  ;;  %v1893_v7 = vpop.f32.mrb[26].mxu0 }
 0xf1a   :  { %v3048_v8 = vpop.f32.mrb[27].mxu0  ;;  %v3053_v43 = vpop.f32.mrb[53].mxu1  ;;  %v1947_v29 = vsel %vm758_vm3, %v1893_v7, -inf  ;;  %v1950_v40 = vsel %vm758_vm3, %v1937_v1, -inf }
 0xf1b   :  { %v1940_v31 = vpop.f32.mrb[54].mxu1  ;;  %1948 = vmax.xlane.f32.xlu1 %v1947_v29 }
 0xf1c   :  { %v3054_v55 = vpop.f32.mrb[55].mxu1  ;;  %v1953_v59 = vsel %vm758_vm3, %v1940_v31, -inf }
 0xf1d   :  { %1951 = vmax.xlane.f32.xlu0 %v1950_v40 }
 0xf1f   :  { %1954 = vmax.xlane.f32.xlu1 %v1953_v59 }
 0xfa6   :  { %v1946_v62 = vpop.xlane.xlu0 %1945 }
 0xfa7   :  { %v1956_v3 = vsub.f32 %v1890_v61, %v1946_v62 }
 0xfa8   :  { %v1949_v44 = vpop.xlane.xlu1 %1948 }
 0xfa9   :  { %v1960_v60 = vmul.f32 1.442695, %v1956_v3  ;;  %v1957_v34 = vsub.f32 %v1893_v7, %v1949_v44 }
 0xfaa   :  { %v1952_v36 = vpop.xlane.xlu0 %1951 }
 0xfab   :  { %3275 = vpow2.f32 %v1960_v60  ;;  %v1962_v47 = vmul.f32 1.442695, %v1957_v34  ;;  %v1958_v51 = vsub.f32 %v1937_v1, %v1952_v36 }
 0xfac   :  { %v1955_v1 = vpop.xlane.xlu1 %1954 }
 0xfad   :  { %3277 = vpow2.f32 %v1962_v47  ;;  %v1964_v52 = vmul.f32 1.442695, %v1958_v51  ;;  %v1959_v7 = vsub.f32 %v1940_v31, %v1955_v1 }
 0xfaf   :  { %3279 = vpow2.f32 %v1964_v52  ;;  %v1966_v29 = vmul.f32 1.442695, %v1959_v7 }
 0xfb1   :  { %3281 = vpow2.f32 %v1966_v29 }
 0xfb5   :  { %v3276_v57 = vpop.eup %3275 }
 0xfb6   :  { %v1968_v46 = vsel %vm758_vm3, %v3276_v57, 0.0 }
 0xfb7   :  { %v3278_v0 = vpop.eup %3277  ;;  %1969 = vadd.xlane.f32.xlu0 %v1968_v46 }
 0xfb8   :  { %v1971_v8 = vsel %vm758_vm3, %v3278_v0, 0.0 }
 0xfb9   :  { %v3280_v43 = vpop.eup %3279  ;;  %1972 = vadd.xlane.f32.xlu1 %v1971_v8 }
 0xfba   :  { %v1974_v61 = vsel %vm758_vm3, %v3280_v43, 0.0 }
 0xfbb   :  { %1975 = vadd.xlane.f32.xlu0 %v1974_v61  ;;  %v3282_v55 = vpop.eup %3281 }
 0xfbc   :  { %v1977_v40 = vsel %vm758_vm3, %v3282_v55, 0.0 }
 0xfca   :  { %2141 = vrot.lane.b32.xlu1 %v4219_v4, %s3572_s0 }
 0xfd1   :  { %2088 = vrot.lane.b32.xlu0 %v4215_v49, %s3572_s0 }
 0xfee   :  { %1978 = vadd.xlane.f32.xlu1 %v1977_v40 }
 0xfff   :  { %2085 = vrot.lane.b32.xlu1 %v4230_v63, %s3572_s0 }
0x1003   :  { %2138 = vrot.lane.b32.xlu1 %v4227_v42, %s3572_s0 }
0x1044   :  { %v1970_v59 = vpop.xlane.xlu0 %1969 }
0x1045   :  { %3283 = vrcp.f32 %v1970_v59 }
0x1046   :  { %v1973_v4 = vpop.xlane.xlu1 %1972 }
0x1047   :  { %3285 = vrcp.f32 %v1973_v4 }
0x1048   :  { %v1976_v62 = vpop.xlane.xlu0 %1975 }
0x1049   :  { %3287 = vrcp.f32 %v1976_v62 }
0x104a   :  { %v2142_v42 = vpop.permute.xlu1 %2141 }
0x104b   :  { %v2147_v8 = vsel %vm663_vm1, %v2142_v42, 0 }
0x104c   :  { %v2089_v60 = vpop.permute.xlu0 %2088 }
0x104d   :  { %v2094_v36 = vsel %vm663_vm1, %v2089_v60, 0 }
0x104f   :  { %v3284_v49 = vpop.eup %3283 }
0x1050   :  { %v1984_v31 = vmul.f32 %v3284_v49, %v3276_v57 }
0x1051   :  { %v3286_v3 = vpop.eup %3285 }
0x1052   :  { %v1985_v44 = vmul.f32 %v3286_v3, %v3278_v0 }
0x1053   :  { %v3288_v51 = vpop.eup %3287 }
0x1054   :  { %v1988_v34 = vpack.c.bf16 %v1985_v44, %v1984_v31  ;;  %v1986_v57 = vmul.f32 %v3288_v51, %v3280_v43 }
0x1056   :  { %3058 = vmatmul.mubr.msk.bf16.vlgmr.msra.gmra.mrb[28].mxu0 %vm758_vm3, %v1988_v34 }
0x1057   :  { %3068 = vmatpush3.bf16.xpose.msra.mxu0 %v2094_v36  ;;  %3069 = vmatprep.mubr.msk.bf16.mxu0 %vm3580_vm0, %v3579_v6 }
0x1058   :  { %3079 = vmatprep.subr.bf16.mxu0 %v3579_v6 }
0x107b   :  { %v1979_v63 = vpop.xlane.xlu1 %1978 }
0x107c   :  { %3289 = vrcp.f32 %v1979_v63 }
0x107f   :  { %v2086_v47 = vpop.permute.xlu1 %2085 }
0x1080   :  { %3070 = vmatmul.mubr.msk.bf16.vlgmr.msra.gmra.mrb[32].mxu0 %vm663_vm1, %v2086_v47 }
0x1081   :  { %3081 = vmatprep.mubr.msk.bf16.mxu0 %vm3580_vm0, %v3579_v6 }
0x1083   :  { %v2139_v61 = vpop.permute.xlu1 %2138 }
0x1086   :  { %v3290_v52 = vpop.eup %3289 }
0x1087   :  { %v1987_v46 = vmul.f32 %v3290_v52, %v3282_v55 }
0x1089   :  { %v1989_v0 = vpack.c.bf16 %v1987_v46, %v1986_v57 }
0x108b   :  { %3064 = vmatmul.mubr.msk.bf16.vlgmr.msra.gmra.mrb[56].mxu1 %vm758_vm3, %v1989_v0 }
0x108c   :  { %3074 = vmatpush3.bf16.xpose.msra.mxu1 %v2147_v8  ;;  %3075 = vmatprep.mubr.msk.bf16.mxu1 %vm3580_vm0, %v3579_v6 }
0x108d   :  { %3085 = vmatprep.subr.bf16.mxu1 %v3579_v6 }
0x1093   :  { %3076 = vmatmul.mubr.msk.bf16.vlgmr.msra.gmra.mrb[60].mxu1 %vm663_vm1, %v2139_v61 }
0x1094   :  { %3087 = vmatprep.mubr.msk.bf16.mxu1 %vm3580_vm0, %v3579_v6 }
0x1129   :  { %v4285_v1 = vpop.f32.mrb[28].mxu0 }
0x112a   :  { %v3059_v43 = vpop.f32.mrb[29].mxu0 }
0x112b   :  { %v4287_v7 = vpop.f32.mrb[30].mxu0 }
0x112c   :  { %v3060_v29 = vpop.f32.mrb[31].mxu0 }
0x1153   :  { %v2130_v55 = vpop.f32.mrb[32].mxu0 }
0x1154   :  { %v3071_v40 = vpop.f32.mrb[33].mxu0  ;;  %v2190_v59 = vsel %vm758_vm3, %v2130_v55, -inf }
0x1155   :  { %2191 = vmax.xlane.f32.xlu0 %v2190_v59  ;;  %v2133_v4 = vpop.f32.mrb[34].mxu0 }
0x1156   :  { %v3072_v62 = vpop.f32.mrb[35].mxu0  ;;  %v2193_v49 = vsel %vm758_vm3, %v2133_v4, -inf }
0x1157   :  { %2194 = vmax.xlane.f32.xlu1 %v2193_v49 }
0x115e   :  { %v4291_v3 = vpop.f32.mrb[56].mxu1 }
0x115f   :  { %v3065_v31 = vpop.f32.mrb[57].mxu1 }
0x1160   :  { %v4293_v6 = vpop.f32.mrb[58].mxu1 }
0x1161   :  { %v3066_v44 = vpop.f32.mrb[59].mxu1 }
0x1166   :  { %v2183_v60 = vpop.f32.mrb[60].mxu1 }
0x1167   :  { %v3077_v34 = vpop.f32.mrb[61].mxu1  ;;  %v2196_v36 = vsel %vm758_vm3, %v2183_v60, -inf }
0x1168   :  { %v2186_v42 = vpop.f32.mrb[62].mxu1  ;;  %2197 = vmax.xlane.f32.xlu0 %v2196_v36 }
0x1169   :  { %v3078_v63 = vpop.f32.mrb[63].mxu1  ;;  %v2199_v47 = vsel %vm758_vm3, %v2186_v42, -inf }
0x116c   :  { %2200 = vmax.xlane.f32.xlu0 %v2199_v47 }
0x11e2   :  { %v2192_v51 = vpop.xlane.xlu0 %2191 }
0x11e3   :  { %v2202_v52 = vsub.f32 %v2130_v55, %v2192_v51 }
0x11e4   :  { %v2195_v57 = vpop.xlane.xlu1 %2194 }
0x11e5   :  { %v2206_v46 = vmul.f32 1.442695, %v2202_v52  ;;  %v2203_v0 = vsub.f32 %v2133_v4, %v2195_v57 }
0x11e7   :  { %3291 = vpow2.f32 %v2206_v46  ;;  %v2208_v8 = vmul.f32 1.442695, %v2203_v0 }
0x11e9   :  { %3293 = vpow2.f32 %v2208_v8 }
0x11f1   :  { %v3292_v61 = vpop.eup %3291 }
0x11f2   :  { %v2214_v43 = vsel %vm758_vm3, %v3292_v61, 0.0 }
0x11f3   :  { %v3294_v29 = vpop.eup %3293  ;;  %2215 = vadd.xlane.f32.xlu0 %v2214_v43 }
0x11f4   :  { %v2217_v40 = vsel %vm758_vm3, %v3294_v29, 0.0 }
0x11f5   :  { %v2198_v59 = vpop.xlane.xlu0 %2197  ;;  %2218 = vadd.xlane.f32.xlu1 %v2217_v40  ;;  %v3341_v40 = vld [vmem:[#allocation11] sm:$0xff]  }
0x11f6   :  { %v2204_v62 = vsub.f32 %v2183_v60, %v2198_v59 }
0x11f8   :  { %v2210_v49 = vmul.f32 1.442695, %v2204_v62  ;;  %v3342_v62 = vld [vmem:[#allocation11 + $0x8] sm:$0xff]  }
0x11f9   :  { %v2201_v31 = vpop.xlane.xlu0 %2200 }
0x11fa   :  { %3295 = vpow2.f32 %v2210_v49  ;;  %v2205_v55 = vsub.f32 %v2186_v42, %v2201_v31  ;;  %v3343_v49 = vld [vmem:[#allocation11 + $0x10] sm:$0xff]  }
0x11fc   :  { %v2212_v44 = vmul.f32 1.442695, %v2205_v55 }
0x11fe   :  { %3297 = vpow2.f32 %v2212_v44 }
0x1204   :  { %v3296_v4 = vpop.eup %3295 }
0x1205   :  { %v2220_v34 = vsel %vm758_vm3, %v3296_v4, 0.0 }
0x1206   :  { %2221 = vadd.xlane.f32.xlu0 %v2220_v34  ;;  %v3344_v34 = vld [vmem:[#allocation11 + $0x18] sm:$0xff]  }
0x1208   :  { %v3298_v36 = vpop.eup %3297 }
0x1209   :  { %v2223_v63 = vsel %vm758_vm3, %v3298_v36, 0.0 }
0x120a   :  { %2224 = vadd.xlane.f32.xlu1 %v2223_v63  ;;  %v3345_v63 = vld [vmem:[#allocation13] ss:$8 sps:$4 sm:$0xff]  }
0x121b   :  { %2287 = vrot.lane.b32.xlu1 %v4247_v53, %s3572_s0 }
0x121c   :  { %2237 = vrot.lane.b32.xlu0 %v4243_v9, %s3572_s0 }
0x1280   :  { %v2216_v47 = vpop.xlane.xlu0 %2215 }
0x1282   :  { %v2219_v60 = vpop.xlane.xlu1 %2218 }
0x1283   :  { %3299 = vrcp.f32 %v2219_v60  ;;  %v3346_v60 = vld [vmem:[#allocation13 + $0x14] ss:$8 sps:$4 sm:$0xff]  }
0x1284   :  { %3301 = vrcp.f32 %v2216_v47  ;;  %v3348_v47 = vld [vmem:[#allocation13 + $0x10] ss:$8 sps:$4 sm:$0xff]  }
0x128d   :  { %v3300_v42 = vpop.eup %3299 }
0x128e   :  { %v3302_v52 = vpop.eup %3301  ;;  %v2231_v57 = vmul.f32 %v3300_v42, %v3294_v29  ;;  %v3351_v42 = vld [vmem:[#allocation11 + $0x38] sm:$0xff]  }
0x128f   :  { %v2230_v8 = vmul.f32 %v3302_v52, %v3292_v61 }
0x1291   :  { %v2234_v53 = vpack.c.bf16 %v2231_v57, %v2230_v8 }
0x1293   :  { %v2222_v51 = vpop.xlane.xlu0 %2221 }
0x1294   :  { %3303 = vrcp.f32 %v2222_v51 }
0x1297   :  { %v2238_v46 = vpop.permute.xlu0 %2237  ;;  %v2225_v0 = vpop.xlane.xlu1 %2224 }
0x1298   :  { %v2243_v43 = vsel %vm808_vm2, %v2238_v46, 0  ;;  %3305 = vrcp.f32 %v2225_v0 }
0x1299   :  { %3080 = vmatpush3.bf16.msra.mxu0 %v2243_v43 }
0x129a   :  { %3091 = vmatprep.subr.bf16.mxu0 %v3341_v40 }
0x129b   :  { %v2288_v9 = vpop.permute.xlu1 %2287 }
0x129c   :  { %v2293_v59 = vsel %vm808_vm2, %v2288_v9, 0  ;;  %3082 = vmatmul.mubr.msk.bf16.vlgmr.msra.gmra.mrb[36].mxu0 %vm758_vm3, %v2234_v53  ;;  %v3352_v9 = vld [vmem:[#allocation14] sm:$0xff]  }
0x129d   :  { %3086 = vmatpush3.bf16.msra.mxu1 %v2293_v59  ;;  %3092 = vmatpush3.bf16.msra.mxu0 %v3341_v40  ;;  %v3353_v59 = vld [vmem:[#allocation14 + $0x48] sm:$0xff]  }
0x129e   :  { %3093 = vmatprep.subr.bf16.mxu0 %v3342_v62  ;;  %2465 = vmatprep.subr.bf16.mxu1 %v4008_v50  ;;  %v3304_v29 = vpop.eup %3303  ;;  %v3347_v50 = vld [vmem:[#allocation11 + $0x20] sm:$0xff]  }
0x129f   :  { %v2232_v31 = vmul.f32 %v3304_v29, %v3296_v4  ;;  %v3349_v4 = vld [vmem:[#allocation11 + $0x28] sm:$0xff]  }
0x12a1   :  { %3094 = vmatpush3.bf16.msra.mxu0 %v3342_v62 }
0x12a2   :  { %v3306_v61 = vpop.eup %3305  ;;  %3095 = vmatprep.subr.bf16.mxu0 %v3343_v49 }
0x12a3   :  { %v2233_v55 = vmul.f32 %v3306_v61, %v3298_v36  ;;  %v3350_v36 = vld [vmem:[#allocation11 + $0x30] sm:$0xff]  }
0x12a5   :  { %v2235_v44 = vpack.c.bf16 %v2233_v55, %v2232_v31  ;;  %3096 = vmatpush3.bf16.msra.mxu0 %v3343_v49 }
0x12a6   :  { %3097 = vmatprep.subr.bf16.mxu0 %v3344_v34 }
0x12a7   :  { %3088 = vmatmul.mubr.msk.bf16.vlgmr.msra.gmra.mrb[64].mxu1 %vm758_vm3, %v2235_v44 }
0x12a8   :  { %2466 = vmatpush1.bf16.msra.mxu1 %v3345_v63  ;;  %2497 = vmatprep.mubr.bf16.mxu1 %v3581_v25 }
0x12a9   :  { %3098 = vmatpush3.bf16.msra.mxu0 %v3344_v34  ;;  %2467 = vmatprep.subr.bf16.mxu1 %v3346_v60 }
0x12aa   :  { %3099 = vmatprep.subr.bf16.mxu0 %v3347_v50 }
0x12ac   :  { %2468 = vmatpush1.bf16.msra.mxu1 %v3348_v47 }
0x12ad   :  { %3100 = vmatpush3.bf16.msra.mxu0 %v3347_v50  ;;  %2469 = vmatprep.subr.bf16.mxu1 %v4031_v11 }
0x12ae   :  { %3101 = vmatprep.subr.bf16.mxu0 %v3349_v4 }
0x12b0   :  { %2470 = vmatpush1.bf16.msra.mxu1 %v4033_v12 }
0x12b1   :  { %3102 = vmatpush3.bf16.msra.mxu0 %v3349_v4  ;;  %2471 = vmatprep.subr.bf16.mxu1 %v4037_v13 }
0x12b2   :  { %3103 = vmatprep.subr.bf16.mxu0 %v3350_v36 }
0x12b4   :  { %2472 = vmatpush1.bf16.msra.mxu1 %v4039_v14 }
0x12b5   :  { %3104 = vmatpush3.bf16.msra.mxu0 %v3350_v36  ;;  %2473 = vmatprep.subr.bf16.mxu1 %v4043_v15 }
0x12b6   :  { %3105 = vmatprep.subr.bf16.mxu0 %v3351_v42 }
0x12b8   :  { %2474 = vmatpush1.bf16.msra.mxu1 %v4045_v16 }
0x12b9   :  { %3106 = vmatpush3.bf16.msra.mxu0 %v3351_v42  ;;  %2475 = vmatprep.subr.bf16.mxu1 %v4049_v17 }
0x12ba   :  { %2827 = vmatprep.subr.bf16.mxu0 %v4069_v27 }
0x12bc   :  { %2476 = vmatpush1.bf16.msra.mxu1 %v4051_v18 }
0x12bd   :  { %2477 = vmatprep.subr.bf16.mxu1 %v4055_v19 }
0x12c0   :  { %2478 = vmatpush1.bf16.msra.mxu1 %v4057_v20 }
0x12c1   :  { %2479 = vmatprep.subr.bf16.mxu1 %v4059_v22 }
0x12c4   :  { %2480 = vmatpush1.bf16.msra.mxu1 %v4063_v23 }
0x136f   :  { %v2279_v11 = vpop.f32.mrb[36].mxu0 }
0x1370   :  { %v3083_v12 = vpop.f32.mrb[37].mxu0 }
0x1371   :  { %v2282_v13 = vpop.f32.mrb[38].mxu0 }
0x1372   :  { %v3137_v14 = vpack.i.bf16 %v2282_v13, %v2279_v11  ;;  %v3084_v15 = vpop.f32.mrb[39].mxu0 }
0x1374   :  { %3138 = vrot.lane.b32.xlu1 %v3137_v14, %s3572_s0 }
0x137a   :  { %v2329_v16 = vpop.f32.mrb[64].mxu1 }
0x137b   :  { %v3089_v17 = vpop.f32.mrb[65].mxu1 }
0x137c   :  { %v2332_v27 = vpop.f32.mrb[66].mxu1 }
0x137d   :  { %v3142_v51 = vpack.i.bf16 %v2332_v27, %v2329_v16  ;;  %v3090_v18 = vpop.f32.mrb[67].mxu1 }
0x137e   :  { %v3355_v18 = vld [vmem:[%s4408_s12] ss:$0 sm:$0xff]  ;;  %s3582_s12 = smov [#allocation16]  }
0x137f   :  { %3143 = vrot.lane.b32.xlu1 %v3142_v51, %s3572_s0 }
0x13e6   :  { %v3139_v19 = vpop.permute.xlu1 %3138 }
0x13e7   :  { %v3141_v20 = vunpack.i.h.bf16 %v3139_v19  ;;  %v3140_v52 = vunpack.i.l.bf16 %v3139_v19 }
0x13e9   :  { %v2352_v22 = vsel %vm663_vm1, %v4285_v1, %v3140_v52  ;;  %v2353_v23 = vsel %vm663_vm1, %v4287_v7, %v3141_v20 }
0x13ea   :  { %v2356_v57 = vpack.c.bf16 %v2353_v23, %v2352_v22  ;;  %v3356_v22 = vld [vmem:[%s4409_s13] ss:$0 sm:$0xff]  ;;  %s2586_s13 = sshll.u32 %s3582_s12, 4  ;;  %s2587_s13 = int_to_ptr.vmem [resolvable:$true] %s2586_s13 }
0x13eb   :  { %s3533_s27 = scalar_lea.vmem %s2587_s13, 256  ;;  %p3538_p9 = scmp.lt.s32.totalorder %s2587_s13, %s2587_s13 }
0x13ec   :  { %3107 = vmatprep.mubr.bf16.mxu0 %v2356_v57  ;;  %p3534_p8 = scmp.ne.s32.totalorder %s2587_s13, %s3533_s27  ;;  %p3539_p10 = scmp.lt.s32.totalorder %s3533_s27, %s3533_s27 }
0x13ee   :  { %p3540_p11 = por %p3539_p10, %p3538_p9 }
0x13f0   :  { %p3541_p12 = pnand %p3540_p11, %p3534_p8 }
0x13f1   :  { %v3144_v46 = vpop.permute.xlu1 %3143 }
0x13f2   :  { %v3146_v0 = vunpack.i.h.bf16 %v3144_v46  ;;  %v3145_v8 = vunpack.i.l.bf16 %v3144_v46 }
0x13f4   :  { %v2355_v43 = vsel %vm663_vm1, %v4293_v6, %v3146_v0  ;;  %v2354_v53 = vsel %vm663_vm1, %v4291_v3, %v3145_v8 }
0x13f5   :  { %v2357_v40 = vpack.c.bf16 %v2355_v43, %v2354_v53 }
0x13f7   :  { %3108 = vmatmul.mubr.bf16.vlgmr.msra.gmra.mrb[40].mxu0 %v2357_v40 }
0x13f8   :  { %2828 = vmatpush3.bf16.msra.mxu0 %v3352_v9 }
0x13f9   :  { %2829 = vmatprep.subr.bf16.mxu0 %v3353_v59 }
0x13fc   :  { %2830 = vmatpush3.bf16.msra.mxu0 %v4072_v33 }
0x13fd   :  { %2831 = vmatprep.subr.bf16.mxu0 %v4074_v35 }
0x1400   :  { %2832 = vmatpush3.bf16.msra.mxu0 %v4077_v54  ;;  %v3354_v54 = vld [vmem:[%s4405_s9] ss:$0 sm:$0xff] }
0x1401   :  { %2833 = vmatprep.subr.bf16.mxu0 %v4080_v37 }
0x1404   :  { %2834 = vmatpush3.bf16.msra.mxu0 %v4083_v5 }
0x1405   :  { %2835 = vmatprep.subr.bf16.mxu0 %v4086_v21 }
0x1408   :  { %2836 = vmatpush3.bf16.msra.mxu0 %v4089_v56 }
0x1409   :  { %2837 = vmatprep.subr.bf16.mxu0 %v4092_v39 }
0x140c   :  { %2838 = vmatpush3.bf16.msra.mxu0 %v4122_v24 }
0x140d   :  { %2839 = vmatprep.subr.bf16.mxu0 %v4125_v26 }
0x1410   :  { %2840 = vmatpush3.bf16.msra.mxu0 %v4127_v28 }
0x1411   :  { %2841 = vmatprep.subr.bf16.mxu0 %v4131_v30 }
0x1414   :  { %2842 = vmatpush3.bf16.msra.mxu0 %v4133_v32 }
0x14ca   :  { %v3109_v33 = vpop.f32.mrb[40].mxu0 }
0x14cb   :  { %v2392_v35 = vpop.f32.mrb[41].mxu0  ;;  %v2401_v56 = vadd.f32 %v3354_v54, %v3109_v33 }
0x14cc   :  { %v2393_v37 = vadd.f32 %v3354_v54, %v2392_v35  ;;  %v3110_v5 = vpop.f32.mrb[42].mxu0 }
0x14cd   :  { %v2395_v21 = vpop.f32.mrb[43].mxu0  ;;  %v4356_v28 = vadd.f32 %v2401_v56, %v4185_v45  ;;  %v2404_v30 = vadd.f32 %v3354_v54, %v3110_v5 }
0x14ce   :  { %v4351_v39 = vadd.f32 %v2393_v37, %v4175_v58  ;;  %v2396_v24 = vadd.f32 %v3354_v54, %v2395_v21 }
0x14cf   :  { %v2410_v32 = vadd.f32 %v2404_v30, %v4181_v2 }
0x14d0   :  { %2411 = vadd.xlane.f32.xlu0 %v4351_v39  ;;  %v2408_v26 = vadd.f32 %v2396_v24, %v4171_v41 }
0x14d2   :  { %2413 = vadd.xlane.f32.xlu1 %v2408_v26 }
0x14d4   :  { %2415 = vadd.xlane.f32.xlu0 %v4356_v28 }
0x14d8   :  { %2417 = vadd.xlane.f32.xlu0 %v2410_v32 }
0x155d   :  { %v2412_v1 = vpop.xlane.xlu0 %2411 }
0x155e   :  { %v2419_v7 = vmul.f32 0.0078125, %v2412_v1 }
0x155f   :  { %v2414_v3 = vpop.xlane.xlu1 %2413 }
0x1560   :  { %v2423_v58 = vsub.f32 %v4351_v39, %v2419_v7  ;;  %v2420_v6 = vmul.f32 0.0078125, %v2414_v3 }
0x1561   :  { %v2416_v62 = vpop.xlane.xlu0 %2415 }
0x1562   :  { %v2424_v29 = vsub.f32 %v2408_v26, %v2420_v6  ;;  %v2421_v61 = vmul.f32 0.0078125, %v2416_v62  ;;  %v2427_v41 = vmul.f32 %v2423_v58, %v2423_v58 }
0x1564   :  { %v2425_v45 = vsub.f32 %v4356_v28, %v2421_v61  ;;  %2431 = vadd.xlane.f32.xlu0 %v2427_v41  ;;  %v2428_v49 = vmul.f32 %v2424_v29, %v2424_v29 }
0x1565   :  { %v2418_v31 = vpop.xlane.xlu0 %2417 }
0x1566   :  { %v2422_v55 = vmul.f32 0.0078125, %v2418_v31  ;;  %2433 = vadd.xlane.f32.xlu1 %v2428_v49  ;;  %v2429_v44 = vmul.f32 %v2425_v45, %v2425_v45 }
0x1568   :  { %v2426_v2 = vsub.f32 %v2410_v32, %v2422_v55  ;;  %2435 = vadd.xlane.f32.xlu0 %v2429_v44 }
0x156a   :  { %v2430_v34 = vmul.f32 %v2426_v2, %v2426_v2 }
0x156c   :  { %2437 = vadd.xlane.f32.xlu1 %v2430_v34 }
0x15f1   :  { %v2432_v63 = vpop.xlane.xlu0 %2431 }
0x15f2   :  { %v2439_v60 = vmul.f32 0.0078125, %v2432_v63 }
0x15f3   :  { %v2434_v50 = vpop.xlane.xlu1 %2433 }
0x15f4   :  { %v2443_v47 = vadd.f32 1e-05, %v2439_v60  ;;  %v2440_v4 = vmul.f32 0.0078125, %v2434_v50 }
0x15f5   :  { %v2436_v36 = vpop.xlane.xlu0 %2435 }
0x15f6   :  { %3307 = vrsqrt.f32 %v2443_v47  ;;  %v2444_v42 = vadd.f32 1e-05, %v2440_v4  ;;  %v2441_v11 = vmul.f32 0.0078125, %v2436_v36 }
0x15f8   :  { %3309 = vrsqrt.f32 %v2444_v42  ;;  %v2445_v12 = vadd.f32 1e-05, %v2441_v11 }
0x15f9   :  { %v2438_v13 = vpop.xlane.xlu1 %2437 }
0x15fa   :  { %3311 = vrsqrt.f32 %v2445_v12  ;;  %v2442_v14 = vmul.f32 0.0078125, %v2438_v13 }
0x15fc   :  { %v2446_v15 = vadd.f32 1e-05, %v2442_v14 }
0x15fe   :  { %3313 = vrsqrt.f32 %v2446_v15 }
0x1600   :  { %v3308_v16 = vpop.eup %3307 }
0x1601   :  { %v2451_v17 = vmul.f32 %v3308_v16, %v2423_v58 }
0x1602   :  { %v3310_v27 = vpop.eup %3309 }
0x1603   :  { %v2452_v51 = vmul.f32 %v3310_v27, %v2424_v29  ;;  %v2455_v19 = vmul.f32 %v3355_v18, %v2451_v17 }
0x1604   :  { %v3312_v20 = vpop.eup %3311 }
0x1605   :  { %v2456_v52 = vmul.f32 %v3355_v18, %v2452_v51  ;;  %v2459_v23 = vadd.f32 %v3356_v22, %v2455_v19  ;;  %v2453_v46 = vmul.f32 %v3312_v20, %v2425_v45 }
0x1607   :  { %v2460_v57 = vadd.f32 %v3356_v22, %v2456_v52  ;;  %v2457_v53 = vmul.f32 %v3355_v18, %v2453_v46 }
0x1608   :  { %v3314_v0 = vpop.eup %3313 }
0x1609   :  { %v2463_v8 = vpack.c.bf16 %v2460_v57, %v2459_v23  ;;  %v2454_v43 = vmul.f32 %v3314_v0, %v2426_v2  ;;  %v2461_v59 = vadd.f32 %v3356_v22, %v2457_v53 }
0x160b   :  { %2498 = vmatmul.mubr.bf16.vlgmr.msra.gmra.mrb[68].mxu1 %v2463_v8  ;;  %v2458_v40 = vmul.f32 %v3355_v18, %v2454_v43 }
0x160c   :  { %2507 = vmatprep.mubr.bf16.mxu1 %v3581_v25 }
0x160d   :  { %v2462_v9 = vadd.f32 %v3356_v22, %v2458_v40 }
0x160f   :  { %v2464_v33 = vpack.c.bf16 %v2462_v9, %v2461_v59 }
0x1613   :  { %2508 = vmatmul.mubr.bf16.gmra.mrb[72].mxu1 %v2464_v33 }
0x16de   :  { %v2499_v35 = vpop.f32.mrb[68].mxu1 }
0x16df   :  { %v2500_v54 = vadd.f32 %v2499_v35, %v4141_v48  ;;  %v2501_v37 = vpop.f32.mrb[69].mxu1 }
0x16e0   :  { %v2502_v5 = vadd.f32 %v2501_v37, %v4143_v38  ;;  %v2503_v21 = vpop.f32.mrb[70].mxu1 }
0x16e1   :  { %v2504_v56 = vadd.f32 %v2503_v21, %v4141_v48  ;;  %v2505_v24 = vpop.f32.mrb[71].mxu1  ;;  %v2518_v30 = vmax.f32 %v2500_v54, 0.0 }
0x16e2   :  { %v2506_v26 = vadd.f32 %v2505_v24, %v4143_v38  ;;  %v2519_v1 = vmax.f32 %v2502_v5, 0.0 }
0x16e3   :  { %v2520_v32 = vmax.f32 %v2504_v56, 0.0 }
0x16e4   :  { %v2521_v25 = vmax.f32 %v2506_v26, 0.0 }
0x16e5   :  { %v2526_v7 = vpack.c.bf16 %v2520_v32, %v2518_v30 }
0x16e6   :  { %v2527_v3 = vpack.c.bf16 %v2521_v25, %v2519_v1  ;;  %v2509_v58 = vpop.f32.mrb[72].mxu1 }
0x16e7   :  { %v2510_v6 = vadd.f32 %v2509_v58, %v4141_v48  ;;  %v2511_v62 = vpop.f32.mrb[73].mxu1 }
0x16e8   :  { %v2512_v29 = vadd.f32 %v2511_v62, %v4143_v38  ;;  %v2513_v61 = vpop.f32.mrb[74].mxu1  ;;  %2562 = vmatprep.mubr.bf16.mxu0 %v2527_v3 }
0x16e9   :  { %v2514_v41 = vadd.f32 %v2513_v61, %v4141_v48  ;;  %v2515_v45 = vpop.f32.mrb[75].mxu1  ;;  %2563 = vmatmul.mubr.bf16.vlgmr.msra.gmra.mrb[44].mxu0 %v2526_v7  ;;  %v2522_v31 = vmax.f32 %v2510_v6, 0.0 }
0x16ea   :  { %v2516_v49 = vadd.f32 %v2515_v45, %v4143_v38  ;;  %v2523_v44 = vmax.f32 %v2512_v29, 0.0 }
0x16eb   :  { %v2524_v55 = vmax.f32 %v2514_v41, 0.0 }
0x16ec   :  { %v2525_v2 = vmax.f32 %v2516_v49, 0.0 }
0x16ed   :  { %v2528_v34 = vpack.c.bf16 %v2524_v55, %v2522_v31 }
0x16ee   :  { %v2529_v63 = vpack.c.bf16 %v2525_v2, %v2523_v44 }
0x16f0   :  { %2569 = vmatprep.mubr.bf16.mxu0 %v2529_v63 }
0x16f1   :  { %2570 = vmatmul.mubr.bf16.gmra.mrb[48].mxu0 %v2528_v34 }
0x17bc   :  { %v2843_v60 = vpop.f32.mrb[44].mxu0 }
0x17bd   :  { %v2844_v50 = vpop.f32.mrb[45].mxu0 }
0x17be   :  { %v2845_v47 = vadd.f32 %v2844_v50, %v2843_v60  ;;  %v2846_v4 = vpop.f32.mrb[46].mxu0 }
0x17bf   :  { %v2847_v36 = vpop.f32.mrb[47].mxu0 }
0x17c0   :  { %v2565_v42 = vadd.f32 %v2845_v47, %v4166_v10 }
0x17c2   :  { %v2577_v48 = vadd.f32 %v2565_v42, %v4351_v39 }
0x17c4   :  { %2579 = vst [vmem:[#allocation16] sm:$0xff] %v2577_v48  ;;  %v2849_v11 = vpop.f32.mrb[48].mxu0 }
0x17c5   :  { %v2850_v38 = vpop.f32.mrb[49].mxu0 }
0x17c6   :  { %v2851_v12 = vadd.f32 %v2850_v38, %v2849_v11  ;;  %v2852_v13 = vpop.f32.mrb[50].mxu0 }
0x17c7   :  { %v2853_v14 = vpop.f32.mrb[51].mxu0 }
0x17c8   :  { %v2572_v15 = vadd.f32 %v2851_v12, %v4166_v10 }
0x17ca   :  { %v2578_v16 = vadd.f32 %v2572_v15, %v4356_v28 }
0x17cc   :  { %2580 = vst [vmem:[#allocation16 + $0x8] sm:$0xff] %v2578_v16 }
0x17cd   :  { %3544 = shalt.err (!%p3541_p12)
}
0x17ce   :  { %s4431_s8 = sld [smem:[#allocation27_spill]] }
0x17d4   :  { %s3545_s29 = scalar_lea.hbm %s4431_s8, 256 }
0x17d5   :  { %p3546_p13 = scmp.ne.s32.totalorder %s4431_s8, %s3545_s29  ;;  %p3549_p0 = scmp.lt.u32.totalorder %s3545_s29, %s4431_s8 }
0x17d7   :  { %p3551_p1 = pnand %p3549_p0, %p3546_p13 }
0x17d9   :  { %3554 = shalt.err (!%p3551_p1)
}
0x17da   :  { %2592 = dma.vmem_to_hbm [thread:$0]  %s2587_s13, 256, %s4431_s8, [#allocation4], %s4428_s19, %s4428_s19, %s3569_s24  }
0x17db   :  { %3565 = dma.done.wait [#allocation4], 256  }
0x17dc   :  { %3566 = vsyncadd [#allocation4], 4294967040 }
0x17dd   :  { %2596 = vsyncpa [#allocation3], 1 }
0x17de   :  { %2597 = vsyncpa [#allocation6], 1 }
0x17df   :  { %2598 = vsyncpa [#allocation9], 1 }
0x17e0   :  { %2599 = vsyncpa [#allocation12], 1 }
0x17e1   :  { %2600 = vsyncpa [#allocation15], 1 }
0x17e2   :  { %2601 = vsyncpa [#allocation4], 1 }

</bundles_post_ra>
